<compile_context>
chip_gen: v7x
topology: tpu7x:2x2x1
jax: 0.10.0
libtpu: 0.0.40
codegen_flags: <defaults>
</compile_context>

<pallas_src>
import functools

import jax
import jax.numpy as jnp
from jax.experimental import pallas as pl
from jax.experimental.pallas import tpu as pltpu


# --------------------------------------------------------------------------
# Kernel 1: fused 3x3 conv (zero-pad H, circular-pad W) + BN partial stats
# --------------------------------------------------------------------------
def _conv3x3_bnstat_kernel(x_ref, w_ref, mask_ref, o_ref, sum_ref, ssq_ref,
                           *, H, W, Cin):
    row = W + 2                     # width of the W-padded rows
    M = H * row                     # rows of the (width-padded) conv output
    tn = o_ref.shape[-1]
    acc = jnp.zeros((M, tn), jnp.float32)
    for t in range(9):              # unrolled taps: 9 x (M,Cin)@(Cin,tn) on MXU
        kh, kw = t // 3, t % 3
        off = kh * row + kw         # static row offset into the flat activation
        a = x_ref[pl.ds(off, M), :]                # (M, Cin)   bf16
        wk = w_ref[pl.ds(t * Cin, Cin), :]         # (Cin, tn)  bf16
        acc += jnp.dot(a, wk, preferred_element_type=jnp.float32)
    acc = acc * mask_ref[...]       # zero the 2 garbage columns of each row
    o_ref[...] = acc.astype(o_ref.dtype)
    sum_ref[...] = jnp.sum(acc, axis=0, keepdims=True)
    ssq_ref[...] = jnp.sum(acc * acc, axis=0, keepdims=True)


# --------------------------------------------------------------------------
# Kernel 2: BatchNorm-apply + ReLU (gridded, lane-dense, bf16 out)
# --------------------------------------------------------------------------
def _bn_relu_kernel(x_ref, scale_ref, shift_ref, o_ref):
    y = x_ref[...].astype(jnp.float32) * scale_ref[...] + shift_ref[...]
    o_ref[...] = jnp.maximum(y, 0.0).astype(o_ref.dtype)


def _bn_relu_apply(conv, scale, shift, tn):
    B, M, Cout = conv.shape
    return pl.pallas_call(
        _bn_relu_kernel,
        out_shape=jax.ShapeDtypeStruct((B, M, Cout), conv.dtype),
        grid_spec=pltpu.PrefetchScalarGridSpec(
            num_scalar_prefetch=0,
            grid=(B, Cout // tn),
            in_specs=[pl.BlockSpec((None, M, tn), lambda b, j: (b, 0, j)),
                      pl.BlockSpec((1, tn), lambda b, j: (0, j)),
                      pl.BlockSpec((1, tn), lambda b, j: (0, j))],
            out_specs=pl.BlockSpec((None, M, tn), lambda b, j: (b, 0, j))),
        compiler_params=pltpu.CompilerParams(
            dimension_semantics=("parallel", "parallel")),
    )(conv, scale, shift)


# --------------------------------------------------------------------------
# One (conv3x3 -> BN(train) -> ReLU) stage of VGGBlock
# --------------------------------------------------------------------------
def conv3x3_bn_relu(x, w2d, gamma, beta):
    """x: (B,H,W,Cin) bf16 NHWC.  w2d: (9*Cinp, Cout) bf16.  -> (B,H,W,Cout) bf16."""
    B, H, W, Cin = x.shape
    Cinp = w2d.shape[0] // 9
    Cout = w2d.shape[1]
    if Cinp != Cin:                                   # channel pad (exact zeros)
        x = jnp.pad(x, ((0, 0), (0, 0), (0, 0), (0, Cinp - Cin)))
    tn = 128 if Cout % 128 == 0 else Cout
    row = W + 2
    M = H * row
    P = (H + 3) * row

    # zero-pad H (1 top, 2 bottom: the extra zero row keeps the last tap's flat
    # row-slice in bounds; it is only ever read for masked-out columns), then
    # circular-pad W by 1, then flatten (H,W) -> flat rows.
    # TODO(synk): this re-pad between stages is plain-XLA glue; it could be
    # fused into the BN-apply epilogue to save one bf16 copy pass.
    xp = jnp.pad(x, ((0, 0), (1, 2), (0, 0), (0, 0)))
    xp = jnp.concatenate([xp[:, :, -1:, :], xp, xp[:, :, :1, :]], axis=2)
    x_flat = xp.reshape(B, P, Cinp)

    mask = (jnp.arange(M, dtype=jnp.int32) % row < W).astype(jnp.float32)
    mask = mask.reshape(M, 1)

    conv, s, ss = pl.pallas_call(
        functools.partial(_conv3x3_bnstat_kernel, H=H, W=W, Cin=Cinp),
        out_shape=(jax.ShapeDtypeStruct((B, M, Cout), jnp.bfloat16),
                   jax.ShapeDtypeStruct((B, 1, Cout), jnp.float32),
                   jax.ShapeDtypeStruct((B, 1, Cout), jnp.float32)),
        grid_spec=pltpu.PrefetchScalarGridSpec(
            num_scalar_prefetch=0,
            grid=(B, Cout // tn),
            in_specs=[pl.BlockSpec((None, P, Cinp), lambda b, j: (b, 0, 0)),
                      pl.BlockSpec((9 * Cinp, tn), lambda b, j: (0, j)),
                      pl.BlockSpec((M, 1), lambda b, j: (0, 0))],
            out_specs=[pl.BlockSpec((None, M, tn), lambda b, j: (b, 0, j)),
                       pl.BlockSpec((None, 1, tn), lambda b, j: (b, 0, j)),
                       pl.BlockSpec((None, 1, tn), lambda b, j: (b, 0, j))]),
        compiler_params=pltpu.CompilerParams(
            dimension_semantics=("parallel", "parallel")),
    )(x_flat, w2d, mask)

    # BatchNorm2d (training mode): biased variance over (N,H,W), eps = 1e-5.
    count = jnp.asarray(B * H * W, jnp.float32)
    tot = jnp.sum(s[:, 0, :], axis=0)
    tot2 = jnp.sum(ss[:, 0, :], axis=0)
    mean = tot / count
    var = jnp.maximum(tot2 / count - mean * mean, 0.0)
    scale = gamma / jnp.sqrt(var + 1e-5)
    shift = beta - mean * scale

    out = _bn_relu_apply(conv, scale.reshape(1, Cout), shift.reshape(1, Cout), tn)
    # drop the 2 garbage columns of the width-padded layout
    return out.reshape(B, H, row, Cout)[:, :, :W, :]


# --------------------------------------------------------------------------
# VGGBlock parameters & forward
# --------------------------------------------------------------------------
def _pack_conv_weight(w):
    """(3,3,Cin,Cout) f32 -> (9*Cinp, Cout) bf16 with Cin padded to a multiple of 16."""
    _, _, cin, cout = w.shape
    cinp = ((cin + 15) // 16) * 16
    w = jnp.pad(w, ((0, 0), (0, 0), (0, cinp - cin), (0, 0)))
    return w.reshape(9 * cinp, cout).astype(jnp.bfloat16)


def init_vgg_block_params(key, in_channels, out_channels, mid_channels=None):
    if mid_channels is None:
        mid_channels = out_channels
    k1, k2 = jax.random.split(key)
    w1 = jax.random.normal(k1, (3, 3, in_channels, mid_channels),
                           jnp.float32) / jnp.sqrt(9.0 * in_channels)
    w2 = jax.random.normal(k2, (3, 3, mid_channels, out_channels),
                           jnp.float32) / jnp.sqrt(9.0 * mid_channels)
    return {
        'w1': _pack_conv_weight(w1),
        'g1': jnp.ones((mid_channels,), jnp.float32),
        'b1': jnp.zeros((mid_channels,), jnp.float32),
        'w2': _pack_conv_weight(w2),
        'g2': jnp.ones((out_channels,), jnp.float32),
        'b2': jnp.zeros((out_channels,), jnp.float32),
    }


def vgg_block_forward(params, x_nchw):
    x = jnp.transpose(x_nchw, (0, 2, 3, 1)).astype(jnp.bfloat16)   # NCHW -> NHWC
    h = conv3x3_bn_relu(x, params['w1'], params['g1'], params['b1'])
    h = conv3x3_bn_relu(h, params['w2'], params['g2'], params['b2'])
    return jnp.transpose(h, (0, 3, 1, 2)).astype(jnp.float32)      # back to NCHW


# --------------------------------------------------------------------------
# Pure-JAX reference (f32 math on the same bf16-rounded inputs/intermediates)
# --------------------------------------------------------------------------
def _reference(params, x_nchw):
    x = jnp.transpose(x_nchw, (0, 2, 3, 1)).astype(jnp.bfloat16).astype(jnp.float32)

    def stage(x, w2d, gamma, beta):
        B, H, W, Cin = x.shape
        Cout = w2d.shape[1]
        Cinp = w2d.shape[0] // 9
        w = w2d.astype(jnp.float32).reshape(3, 3, Cinp, Cout)[:, :, :Cin, :]
        xp = jnp.pad(x, ((0, 0), (1, 1), (0, 0), (0, 0)))
        xp = jnp.concatenate([xp[:, :, -1:, :], xp, xp[:, :, :1, :]], axis=2)
        conv = sum(jnp.einsum('bhwc,co->bhwo', xp[:, kh:kh + H, kw:kw + W, :],
                              w[kh, kw])
                   for kh in range(3) for kw in range(3))
        mean = jnp.mean(conv, axis=(0, 1, 2))
        var = jnp.mean(jnp.square(conv - mean), axis=(0, 1, 2))
        y = (conv - mean) / jnp.sqrt(var + 1e-5) * gamma + beta
        y = jnp.maximum(y, 0.0)
        return y.astype(jnp.bfloat16).astype(jnp.float32)   # mirror bf16 storage

    h = stage(x, params['w1'], params['g1'], params['b1'])
    h = stage(h, params['w2'], params['g2'], params['b2'])
    return jnp.transpose(h, (0, 3, 1, 2))


if __name__ == "__main__":
    key = jax.random.PRNGKey(0)
    pkey, xkey = jax.random.split(key)
    B, Cin, H, W = 2, 4, 16, 16
    Cmid, Cout = 64, 128            # VGGBlock(in=4, out=128, mid=64)
    params = init_vgg_block_params(pkey, Cin, Cout, Cmid)
    x = jax.random.normal(xkey, (B, Cin, H, W), jnp.float32)

    fwd = jax.jit(vgg_block_forward)
    out = fwd(params, x)
    jax.block_until_ready(out)

    assert out.shape == (B, Cout, H, W), out.shape
    assert bool(jnp.all(jnp.isfinite(out)))
    ref = _reference(params, x)
    err = float(jnp.max(jnp.abs(out - ref)))
    assert err < 0.25, f"max abs err vs reference: {err}"
    print("KERNEL_OK")
</pallas_src>

<mosaic_0001>
module attributes {stable_mosaic.version = 11 : i64} {
  func.func @_conv3x3_bnstat_kernel(%arg0: i32, %arg1: i32, %arg2: memref<1x342x16xbf16, #tpu.memory_space<vmem>>, %arg3: memref<144x64xbf16, #tpu.memory_space<vmem>>, %arg4: memref<288x1xf32, #tpu.memory_space<vmem>>, %arg5: memref<1x288x64xbf16, #tpu.memory_space<vmem>>, %arg6: memref<1x1x64xf32, #tpu.memory_space<vmem>>, %arg7: memref<1x1x64xf32, #tpu.memory_space<vmem>>) attributes {dimension_semantics = [#tpu.dimension_semantics<parallel>, #tpu.dimension_semantics<parallel>], iteration_bounds = array<i64: 2, 1>, scalar_prefetch = 0 : i64, scratch_operands = 0 : i64, tpu.core_type = #tpu.core_type<tc>, window_params = [{transform_indices = @transform_0, window_bounds = array<i64: 1, 342, 16>}, {transform_indices = @transform_1, window_bounds = array<i64: 144, 64>}, {pipeline_mode = #tpu.pipeline_mode<synchronous>, transform_indices = @transform_2, window_bounds = array<i64: 288, 1>}, {transform_indices = @transform_3, window_bounds = array<i64: 1, 288, 64>}, {transform_indices = @transform_4, window_bounds = array<i64: 1, 1, 64>}, {transform_indices = @transform_5, window_bounds = array<i64: 1, 1, 64>}]} {
    %cst = arith.constant 0.000000e+00 : f32
    %0 = vector.broadcast %cst : f32 to vector<288x64xf32>
    %c0 = arith.constant 0 : index
    %c0_0 = arith.constant 0 : index
    %c0_1 = arith.constant 0 : index
    %1 = vector.load %arg2[%c0, %c0_0, %c0_1] : memref<1x342x16xbf16, #tpu.memory_space<vmem>>, vector<1x288x16xbf16>
    %2 = vector.shape_cast %1 : vector<1x288x16xbf16> to vector<288x16xbf16>
    %c0_2 = arith.constant 0 : index
    %c0_3 = arith.constant 0 : index
    %3 = vector.load %arg3[%c0_2, %c0_3] : memref<144x64xbf16, #tpu.memory_space<vmem>>, vector<16x64xbf16>
    %cst_4 = arith.constant dense<0.000000e+00> : vector<288x64xf32>
    %4 = tpu.matmul %2, %3, %cst_4 {dimension_numbers = #tpu.dot_dimension_numbers<[1], [0], [0], [1], [0, 0, 1, 1], [], []>} : vector<288x16xbf16>, vector<16x64xbf16>, vector<288x64xf32> -> vector<288x64xf32>
    %5 = arith.addf %0, %4 : vector<288x64xf32>
    %c0_5 = arith.constant 0 : index
    %c1 = arith.constant 1 : index
    %c0_6 = arith.constant 0 : index
    %6 = vector.load %arg2[%c0_5, %c1, %c0_6] : memref<1x342x16xbf16, #tpu.memory_space<vmem>>, vector<1x288x16xbf16>
    %7 = vector.shape_cast %6 : vector<1x288x16xbf16> to vector<288x16xbf16>
    %c16 = arith.constant 16 : index
    %c0_7 = arith.constant 0 : index
    %8 = vector.load %arg3[%c16, %c0_7] : memref<144x64xbf16, #tpu.memory_space<vmem>>, vector<16x64xbf16>
    %cst_8 = arith.constant dense<0.000000e+00> : vector<288x64xf32>
    %9 = tpu.matmul %7, %8, %cst_8 {dimension_numbers = #tpu.dot_dimension_numbers<[1], [0], [0], [1], [0, 0, 1, 1], [], []>} : vector<288x16xbf16>, vector<16x64xbf16>, vector<288x64xf32> -> vector<288x64xf32>
    %10 = arith.addf %5, %9 : vector<288x64xf32>
    %c0_9 = arith.constant 0 : index
    %c2 = arith.constant 2 : index
    %c0_10 = arith.constant 0 : index
    %11 = vector.load %arg2[%c0_9, %c2, %c0_10] : memref<1x342x16xbf16, #tpu.memory_space<vmem>>, vector<1x288x16xbf16>
    %12 = vector.shape_cast %11 : vector<1x288x16xbf16> to vector<288x16xbf16>
    %c32 = arith.constant 32 : index
    %c0_11 = arith.constant 0 : index
    %13 = vector.load %arg3[%c32, %c0_11] : memref<144x64xbf16, #tpu.memory_space<vmem>>, vector<16x64xbf16>
    %cst_12 = arith.constant dense<0.000000e+00> : vector<288x64xf32>
    %14 = tpu.matmul %12, %13, %cst_12 {dimension_numbers = #tpu.dot_dimension_numbers<[1], [0], [0], [1], [0, 0, 1, 1], [], []>} : vector<288x16xbf16>, vector<16x64xbf16>, vector<288x64xf32> -> vector<288x64xf32>
    %15 = arith.addf %10, %14 : vector<288x64xf32>
    %c0_13 = arith.constant 0 : index
    %c18 = arith.constant 18 : index
    %c0_14 = arith.constant 0 : index
    %16 = vector.load %arg2[%c0_13, %c18, %c0_14] : memref<1x342x16xbf16, #tpu.memory_space<vmem>>, vector<1x288x16xbf16>
    %17 = vector.shape_cast %16 : vector<1x288x16xbf16> to vector<288x16xbf16>
    %c48 = arith.constant 48 : index
    %c0_15 = arith.constant 0 : index
    %18 = vector.load %arg3[%c48, %c0_15] : memref<144x64xbf16, #tpu.memory_space<vmem>>, vector<16x64xbf16>
    %cst_16 = arith.constant dense<0.000000e+00> : vector<288x64xf32>
    %19 = tpu.matmul %17, %18, %cst_16 {dimension_numbers = #tpu.dot_dimension_numbers<[1], [0], [0], [1], [0, 0, 1, 1], [], []>} : vector<288x16xbf16>, vector<16x64xbf16>, vector<288x64xf32> -> vector<288x64xf32>
    %20 = arith.addf %15, %19 : vector<288x64xf32>
    %c0_17 = arith.constant 0 : index
    %c19 = arith.constant 19 : index
    %c0_18 = arith.constant 0 : index
    %21 = vector.load %arg2[%c0_17, %c19, %c0_18] : memref<1x342x16xbf16, #tpu.memory_space<vmem>>, vector<1x288x16xbf16>
    %22 = vector.shape_cast %21 : vector<1x288x16xbf16> to vector<288x16xbf16>
    %c64 = arith.constant 64 : index
    %c0_19 = arith.constant 0 : index
    %23 = vector.load %arg3[%c64, %c0_19] : memref<144x64xbf16, #tpu.memory_space<vmem>>, vector<16x64xbf16>
    %cst_20 = arith.constant dense<0.000000e+00> : vector<288x64xf32>
    %24 = tpu.matmul %22, %23, %cst_20 {dimension_numbers = #tpu.dot_dimension_numbers<[1], [0], [0], [1], [0, 0, 1, 1], [], []>} : vector<288x16xbf16>, vector<16x64xbf16>, vector<288x64xf32> -> vector<288x64xf32>
    %25 = arith.addf %20, %24 : vector<288x64xf32>
    %c0_21 = arith.constant 0 : index
    %c20 = arith.constant 20 : index
    %c0_22 = arith.constant 0 : index
    %26 = vector.load %arg2[%c0_21, %c20, %c0_22] : memref<1x342x16xbf16, #tpu.memory_space<vmem>>, vector<1x288x16xbf16>
    %27 = vector.shape_cast %26 : vector<1x288x16xbf16> to vector<288x16xbf16>
    %c80 = arith.constant 80 : index
    %c0_23 = arith.constant 0 : index
    %28 = vector.load %arg3[%c80, %c0_23] : memref<144x64xbf16, #tpu.memory_space<vmem>>, vector<16x64xbf16>
    %cst_24 = arith.constant dense<0.000000e+00> : vector<288x64xf32>
    %29 = tpu.matmul %27, %28, %cst_24 {dimension_numbers = #tpu.dot_dimension_numbers<[1], [0], [0], [1], [0, 0, 1, 1], [], []>} : vector<288x16xbf16>, vector<16x64xbf16>, vector<288x64xf32> -> vector<288x64xf32>
    %30 = arith.addf %25, %29 : vector<288x64xf32>
    %c0_25 = arith.constant 0 : index
    %c36 = arith.constant 36 : index
    %c0_26 = arith.constant 0 : index
    %31 = vector.load %arg2[%c0_25, %c36, %c0_26] : memref<1x342x16xbf16, #tpu.memory_space<vmem>>, vector<1x288x16xbf16>
    %32 = vector.shape_cast %31 : vector<1x288x16xbf16> to vector<288x16xbf16>
    %c96 = arith.constant 96 : index
    %c0_27 = arith.constant 0 : index
    %33 = vector.load %arg3[%c96, %c0_27] : memref<144x64xbf16, #tpu.memory_space<vmem>>, vector<16x64xbf16>
    %cst_28 = arith.constant dense<0.000000e+00> : vector<288x64xf32>
    %34 = tpu.matmul %32, %33, %cst_28 {dimension_numbers = #tpu.dot_dimension_numbers<[1], [0], [0], [1], [0, 0, 1, 1], [], []>} : vector<288x16xbf16>, vector<16x64xbf16>, vector<288x64xf32> -> vector<288x64xf32>
    %35 = arith.addf %30, %34 : vector<288x64xf32>
    %c0_29 = arith.constant 0 : index
    %c37 = arith.constant 37 : index
    %c0_30 = arith.constant 0 : index
    %36 = vector.load %arg2[%c0_29, %c37, %c0_30] : memref<1x342x16xbf16, #tpu.memory_space<vmem>>, vector<1x288x16xbf16>
    %37 = vector.shape_cast %36 : vector<1x288x16xbf16> to vector<288x16xbf16>
    %c112 = arith.constant 112 : index
    %c0_31 = arith.constant 0 : index
    %38 = vector.load %arg3[%c112, %c0_31] : memref<144x64xbf16, #tpu.memory_space<vmem>>, vector<16x64xbf16>
    %cst_32 = arith.constant dense<0.000000e+00> : vector<288x64xf32>
    %39 = tpu.matmul %37, %38, %cst_32 {dimension_numbers = #tpu.dot_dimension_numbers<[1], [0], [0], [1], [0, 0, 1, 1], [], []>} : vector<288x16xbf16>, vector<16x64xbf16>, vector<288x64xf32> -> vector<288x64xf32>
    %40 = arith.addf %35, %39 : vector<288x64xf32>
    %c0_33 = arith.constant 0 : index
    %c38 = arith.constant 38 : index
    %c0_34 = arith.constant 0 : index
    %41 = vector.load %arg2[%c0_33, %c38, %c0_34] : memref<1x342x16xbf16, #tpu.memory_space<vmem>>, vector<1x288x16xbf16>
    %42 = vector.shape_cast %41 : vector<1x288x16xbf16> to vector<288x16xbf16>
    %c128 = arith.constant 128 : index
    %c0_35 = arith.constant 0 : index
    %43 = vector.load %arg3[%c128, %c0_35] : memref<144x64xbf16, #tpu.memory_space<vmem>>, vector<16x64xbf16>
    %cst_36 = arith.constant dense<0.000000e+00> : vector<288x64xf32>
    %44 = tpu.matmul %42, %43, %cst_36 {dimension_numbers = #tpu.dot_dimension_numbers<[1], [0], [0], [1], [0, 0, 1, 1], [], []>} : vector<288x16xbf16>, vector<16x64xbf16>, vector<288x64xf32> -> vector<288x64xf32>
    %45 = arith.addf %40, %44 : vector<288x64xf32>
    %c0_37 = arith.constant 0 : index
    %c0_38 = arith.constant 0 : index
    %46 = vector.load %arg4[%c0_37, %c0_38] : memref<288x1xf32, #tpu.memory_space<vmem>>, vector<288x1xf32>
    %47 = vector.broadcast %46 : vector<288x1xf32> to vector<288x64xf32>
    %48 = arith.mulf %45, %47 : vector<288x64xf32>
    %49 = arith.truncf %48 : vector<288x64xf32> to vector<288x64xbf16>
    %c0_39 = arith.constant 0 : index
    %c0_40 = arith.constant 0 : index
    %c0_41 = arith.constant 0 : index
    %50 = vector.load %arg5[%c0_39, %c0_40, %c0_41] : memref<1x288x64xbf16, #tpu.memory_space<vmem>>, vector<1x288x64xbf16>
    %51 = vector.shape_cast %50 : vector<1x288x64xbf16> to vector<288x64xbf16>
    %52 = vector.shape_cast %49 : vector<288x64xbf16> to vector<1x288x64xbf16>
    tpu.vector_store %arg5[%c0_39, %c0_40, %c0_41], %52 {strides = array<i32>} : memref<1x288x64xbf16, #tpu.memory_space<vmem>>, vector<1x288x64xbf16>,
    %cst_42 = arith.constant dense<0.000000e+00> : vector<64xf32>
    %53 = vector.multi_reduction <add>, %48, %cst_42 [0] : vector<288x64xf32> to vector<64xf32>
    %54 = vector.shape_cast %53 : vector<64xf32> to vector<1x64xf32>
    %c0_43 = arith.constant 0 : index
    %c0_44 = arith.constant 0 : index
    %c0_45 = arith.constant 0 : index
    %55 = vector.load %arg6[%c0_43, %c0_44, %c0_45] : memref<1x1x64xf32, #tpu.memory_space<vmem>>, vector<1x1x64xf32>
    %56 = vector.shape_cast %55 : vector<1x1x64xf32> to vector<1x64xf32>
    %57 = vector.shape_cast %54 : vector<1x64xf32> to vector<1x1x64xf32>
    tpu.vector_store %arg6[%c0_43, %c0_44, %c0_45], %57 {strides = array<i32>} : memref<1x1x64xf32, #tpu.memory_space<vmem>>, vector<1x1x64xf32>,
    %58 = arith.mulf %48, %48 : vector<288x64xf32>
    %cst_46 = arith.constant dense<0.000000e+00> : vector<64xf32>
    %59 = vector.multi_reduction <add>, %58, %cst_46 [0] : vector<288x64xf32> to vector<64xf32>
    %60 = vector.shape_cast %59 : vector<64xf32> to vector<1x64xf32>
    %c0_47 = arith.constant 0 : index
    %c0_48 = arith.constant 0 : index
    %c0_49 = arith.constant 0 : index
    %61 = vector.load %arg7[%c0_47, %c0_48, %c0_49] : memref<1x1x64xf32, #tpu.memory_space<vmem>>, vector<1x1x64xf32>
    %62 = vector.shape_cast %61 : vector<1x1x64xf32> to vector<1x64xf32>
    %63 = vector.shape_cast %60 : vector<1x64xf32> to vector<1x1x64xf32>
    tpu.vector_store %arg7[%c0_47, %c0_48, %c0_49], %63 {strides = array<i32>} : memref<1x1x64xf32, #tpu.memory_space<vmem>>, vector<1x1x64xf32>,
    return
  }
  func.func @transform_0(%arg0: i32, %arg1: i32) -> (i32, i32, i32) {
    %c0_i32 = arith.constant 0 : i32
    %c0_i32_0 = arith.constant 0 : i32
    %c0_i32_1 = arith.constant 0 : i32
    return %arg0, %c0_i32, %c0_i32_0 : i32, i32, i32
  }
  func.func @transform_1(%arg0: i32, %arg1: i32) -> (i32, i32) {
    %c0_i32 = arith.constant 0 : i32
    %c0_i32_0 = arith.constant 0 : i32
    return %c0_i32, %arg1 : i32, i32
  }
  func.func @transform_2(%arg0: i32, %arg1: i32) -> (i32, i32) {
    %c0_i32 = arith.constant 0 : i32
    %c0_i32_0 = arith.constant 0 : i32
    %c0_i32_1 = arith.constant 0 : i32
    return %c0_i32, %c0_i32_0 : i32, i32
  }
  func.func @transform_3(%arg0: i32, %arg1: i32) -> (i32, i32, i32) {
    %c0_i32 = arith.constant 0 : i32
    %c0_i32_0 = arith.constant 0 : i32
    return %arg0, %c0_i32, %arg1 : i32, i32, i32
  }
  func.func @transform_4(%arg0: i32, %arg1: i32) -> (i32, i32, i32) {
    %c0_i32 = arith.constant 0 : i32
    %c0_i32_0 = arith.constant 0 : i32
    return %arg0, %c0_i32, %arg1 : i32, i32, i32
  }
  func.func @transform_5(%arg0: i32, %arg1: i32) -> (i32, i32, i32) {
    %c0_i32 = arith.constant 0 : i32
    %c0_i32_0 = arith.constant 0 : i32
    return %arg0, %c0_i32, %arg1 : i32, i32, i32
  }
}

module attributes {stable_mosaic.version = 11 : i64} {
  func.func @_bn_relu_kernel(%arg0: i32, %arg1: i32, %arg2: memref<1x288x64xbf16, #tpu.memory_space<vmem>>, %arg3: memref<1x64xf32, #tpu.memory_space<vmem>>, %arg4: memref<1x64xf32, #tpu.memory_space<vmem>>, %arg5: memref<1x288x64xbf16, #tpu.memory_space<vmem>>) attributes {dimension_semantics = [#tpu.dimension_semantics<parallel>, #tpu.dimension_semantics<parallel>], iteration_bounds = array<i64: 2, 1>, scalar_prefetch = 0 : i64, scratch_operands = 0 : i64, tpu.core_type = #tpu.core_type<tc>, window_params = [{transform_indices = @transform_0, window_bounds = array<i64: 1, 288, 64>}, {transform_indices = @transform_1, window_bounds = array<i64: 1, 64>}, {transform_indices = @transform_2, window_bounds = array<i64: 1, 64>}, {transform_indices = @transform_3, window_bounds = array<i64: 1, 288, 64>}]} {
    %c0 = arith.constant 0 : index
    %c0_0 = arith.constant 0 : index
    %c0_1 = arith.constant 0 : index
    %0 = vector.load %arg2[%c0, %c0_0, %c0_1] : memref<1x288x64xbf16, #tpu.memory_space<vmem>>, vector<1x288x64xbf16>
    %1 = vector.shape_cast %0 : vector<1x288x64xbf16> to vector<288x64xbf16>
    %2 = arith.extf %1 : vector<288x64xbf16> to vector<288x64xf32>
    %c0_2 = arith.constant 0 : index
    %c0_3 = arith.constant 0 : index
    %3 = vector.load %arg3[%c0_2, %c0_3] : memref<1x64xf32, #tpu.memory_space<vmem>>, vector<1x64xf32>
    %4 = vector.broadcast %3 : vector<1x64xf32> to vector<288x64xf32>
    %5 = arith.mulf %2, %4 : vector<288x64xf32>
    %c0_4 = arith.constant 0 : index
    %c0_5 = arith.constant 0 : index
    %6 = vector.load %arg4[%c0_4, %c0_5] : memref<1x64xf32, #tpu.memory_space<vmem>>, vector<1x64xf32>
    %7 = vector.broadcast %6 : vector<1x64xf32> to vector<288x64xf32>
    %8 = arith.addf %5, %7 : vector<288x64xf32>
    %cst = arith.constant 0.000000e+00 : f32
    %9 = vector.broadcast %cst : f32 to vector<288x64xf32>
    %10 = arith.maximumf %8, %9 : vector<288x64xf32>
    %11 = arith.truncf %10 : vector<288x64xf32> to vector<288x64xbf16>
    %c0_6 = arith.constant 0 : index
    %c0_7 = arith.constant 0 : index
    %c0_8 = arith.constant 0 : index
    %12 = vector.load %arg5[%c0_6, %c0_7, %c0_8] : memref<1x288x64xbf16, #tpu.memory_space<vmem>>, vector<1x288x64xbf16>
    %13 = vector.shape_cast %12 : vector<1x288x64xbf16> to vector<288x64xbf16>
    %14 = vector.shape_cast %11 : vector<288x64xbf16> to vector<1x288x64xbf16>
    tpu.vector_store %arg5[%c0_6, %c0_7, %c0_8], %14 {strides = array<i32>} : memref<1x288x64xbf16, #tpu.memory_space<vmem>>, vector<1x288x64xbf16>,
    return
  }
  func.func @transform_0(%arg0: i32, %arg1: i32) -> (i32, i32, i32) {
    %c0_i32 = arith.constant 0 : i32
    %c0_i32_0 = arith.constant 0 : i32
    return %arg0, %c0_i32, %arg1 : i32, i32, i32
  }
  func.func @transform_1(%arg0: i32, %arg1: i32) -> (i32, i32) {
    %c0_i32 = arith.constant 0 : i32
    %c0_i32_0 = arith.constant 0 : i32
    return %c0_i32, %arg1 : i32, i32
  }
  func.func @transform_2(%arg0: i32, %arg1: i32) -> (i32, i32) {
    %c0_i32 = arith.constant 0 : i32
    %c0_i32_0 = arith.constant 0 : i32
    return %c0_i32, %arg1 : i32, i32
  }
  func.func @transform_3(%arg0: i32, %arg1: i32) -> (i32, i32, i32) {
    %c0_i32 = arith.constant 0 : i32
    %c0_i32_0 = arith.constant 0 : i32
    return %arg0, %c0_i32, %arg1 : i32, i32, i32
  }
}

module attributes {stable_mosaic.version = 11 : i64} {
  func.func @_conv3x3_bnstat_kernel(%arg0: i32, %arg1: i32, %arg2: memref<1x342x64xbf16, #tpu.memory_space<vmem>>, %arg3: memref<576x128xbf16, #tpu.memory_space<vmem>>, %arg4: memref<288x1xf32, #tpu.memory_space<vmem>>, %arg5: memref<1x288x128xbf16, #tpu.memory_space<vmem>>, %arg6: memref<1x1x128xf32, #tpu.memory_space<vmem>>, %arg7: memref<1x1x128xf32, #tpu.memory_space<vmem>>) attributes {dimension_semantics = [#tpu.dimension_semantics<parallel>, #tpu.dimension_semantics<parallel>], iteration_bounds = array<i64: 2, 1>, scalar_prefetch = 0 : i64, scratch_operands = 0 : i64, tpu.core_type = #tpu.core_type<tc>, window_params = [{transform_indices = @transform_0, window_bounds = array<i64: 1, 342, 64>}, {transform_indices = @transform_1, window_bounds = array<i64: 576, 128>}, {pipeline_mode = #tpu.pipeline_mode<synchronous>, transform_indices = @transform_2, window_bounds = array<i64: 288, 1>}, {transform_indices = @transform_3, window_bounds = array<i64: 1, 288, 128>}, {transform_indices = @transform_4, window_bounds = array<i64: 1, 1, 128>}, {transform_indices = @transform_5, window_bounds = array<i64: 1, 1, 128>}]} {
    %cst = arith.constant 0.000000e+00 : f32
    %0 = vector.broadcast %cst : f32 to vector<288x128xf32>
    %c0 = arith.constant 0 : index
    %c0_0 = arith.constant 0 : index
    %c0_1 = arith.constant 0 : index
    %1 = vector.load %arg2[%c0, %c0_0, %c0_1] : memref<1x342x64xbf16, #tpu.memory_space<vmem>>, vector<1x288x64xbf16>
    %2 = vector.shape_cast %1 : vector<1x288x64xbf16> to vector<288x64xbf16>
    %c0_2 = arith.constant 0 : index
    %c0_3 = arith.constant 0 : index
    %3 = vector.load %arg3[%c0_2, %c0_3] : memref<576x128xbf16, #tpu.memory_space<vmem>>, vector<64x128xbf16>
    %cst_4 = arith.constant dense<0.000000e+00> : vector<288x128xf32>
    %4 = tpu.matmul %2, %3, %cst_4 {dimension_numbers = #tpu.dot_dimension_numbers<[1], [0], [0], [1], [0, 0, 1, 1], [], []>} : vector<288x64xbf16>, vector<64x128xbf16>, vector<288x128xf32> -> vector<288x128xf32>
    %5 = arith.addf %0, %4 : vector<288x128xf32>
    %c0_5 = arith.constant 0 : index
    %c1 = arith.constant 1 : index
    %c0_6 = arith.constant 0 : index
    %6 = vector.load %arg2[%c0_5, %c1, %c0_6] : memref<1x342x64xbf16, #tpu.memory_space<vmem>>, vector<1x288x64xbf16>
    %7 = vector.shape_cast %6 : vector<1x288x64xbf16> to vector<288x64xbf16>
    %c64 = arith.constant 64 : index
    %c0_7 = arith.constant 0 : index
    %8 = vector.load %arg3[%c64, %c0_7] : memref<576x128xbf16, #tpu.memory_space<vmem>>, vector<64x128xbf16>
    %cst_8 = arith.constant dense<0.000000e+00> : vector<288x128xf32>
    %9 = tpu.matmul %7, %8, %cst_8 {dimension_numbers = #tpu.dot_dimension_numbers<[1], [0], [0], [1], [0, 0, 1, 1], [], []>} : vector<288x64xbf16>, vector<64x128xbf16>, vector<288x128xf32> -> vector<288x128xf32>
    %10 = arith.addf %5, %9 : vector<288x128xf32>
    %c0_9 = arith.constant 0 : index
    %c2 = arith.constant 2 : index
    %c0_10 = arith.constant 0 : index
    %11 = vector.load %arg2[%c0_9, %c2, %c0_10] : memref<1x342x64xbf16, #tpu.memory_space<vmem>>, vector<1x288x64xbf16>
    %12 = vector.shape_cast %11 : vector<1x288x64xbf16> to vector<288x64xbf16>
    %c128 = arith.constant 128 : index
    %c0_11 = arith.constant 0 : index
    %13 = vector.load %arg3[%c128, %c0_11] : memref<576x128xbf16, #tpu.memory_space<vmem>>, vector<64x128xbf16>
    %cst_12 = arith.constant dense<0.000000e+00> : vector<288x128xf32>
    %14 = tpu.matmul %12, %13, %cst_12 {dimension_numbers = #tpu.dot_dimension_numbers<[1], [0], [0], [1], [0, 0, 1, 1], [], []>} : vector<288x64xbf16>, vector<64x128xbf16>, vector<288x128xf32> -> vector<288x128xf32>
    %15 = arith.addf %10, %14 : vector<288x128xf32>
    %c0_13 = arith.constant 0 : index
    %c18 = arith.constant 18 : index
    %c0_14 = arith.constant 0 : index
    %16 = vector.load %arg2[%c0_13, %c18, %c0_14] : memref<1x342x64xbf16, #tpu.memory_space<vmem>>, vector<1x288x64xbf16>
    %17 = vector.shape_cast %16 : vector<1x288x64xbf16> to vector<288x64xbf16>
    %c192 = arith.constant 192 : index
    %c0_15 = arith.constant 0 : index
    %18 = vector.load %arg3[%c192, %c0_15] : memref<576x128xbf16, #tpu.memory_space<vmem>>, vector<64x128xbf16>
    %cst_16 = arith.constant dense<0.000000e+00> : vector<288x128xf32>
    %19 = tpu.matmul %17, %18, %cst_16 {dimension_numbers = #tpu.dot_dimension_numbers<[1], [0], [0], [1], [0, 0, 1, 1], [], []>} : vector<288x64xbf16>, vector<64x128xbf16>, vector<288x128xf32> -> vector<288x128xf32>
    %20 = arith.addf %15, %19 : vector<288x128xf32>
    %c0_17 = arith.constant 0 : index
    %c19 = arith.constant 19 : index
    %c0_18 = arith.constant 0 : index
    %21 = vector.load %arg2[%c0_17, %c19, %c0_18] : memref<1x342x64xbf16, #tpu.memory_space<vmem>>, vector<1x288x64xbf16>
    %22 = vector.shape_cast %21 : vector<1x288x64xbf16> to vector<288x64xbf16>
    %c256 = arith.constant 256 : index
    %c0_19 = arith.constant 0 : index
    %23 = vector.load %arg3[%c256, %c0_19] : memref<576x128xbf16, #tpu.memory_space<vmem>>, vector<64x128xbf16>
    %cst_20 = arith.constant dense<0.000000e+00> : vector<288x128xf32>
    %24 = tpu.matmul %22, %23, %cst_20 {dimension_numbers = #tpu.dot_dimension_numbers<[1], [0], [0], [1], [0, 0, 1, 1], [], []>} : vector<288x64xbf16>, vector<64x128xbf16>, vector<288x128xf32> -> vector<288x128xf32>
    %25 = arith.addf %20, %24 : vector<288x128xf32>
    %c0_21 = arith.constant 0 : index
    %c20 = arith.constant 20 : index
    %c0_22 = arith.constant 0 : index
    %26 = vector.load %arg2[%c0_21, %c20, %c0_22] : memref<1x342x64xbf16, #tpu.memory_space<vmem>>, vector<1x288x64xbf16>
    %27 = vector.shape_cast %26 : vector<1x288x64xbf16> to vector<288x64xbf16>
    %c320 = arith.constant 320 : index
    %c0_23 = arith.constant 0 : index
    %28 = vector.load %arg3[%c320, %c0_23] : memref<576x128xbf16, #tpu.memory_space<vmem>>, vector<64x128xbf16>
    %cst_24 = arith.constant dense<0.000000e+00> : vector<288x128xf32>
    %29 = tpu.matmul %27, %28, %cst_24 {dimension_numbers = #tpu.dot_dimension_numbers<[1], [0], [0], [1], [0, 0, 1, 1], [], []>} : vector<288x64xbf16>, vector<64x128xbf16>, vector<288x128xf32> -> vector<288x128xf32>
    %30 = arith.addf %25, %29 : vector<288x128xf32>
    %c0_25 = arith.constant 0 : index
    %c36 = arith.constant 36 : index
    %c0_26 = arith.constant 0 : index
    %31 = vector.load %arg2[%c0_25, %c36, %c0_26] : memref<1x342x64xbf16, #tpu.memory_space<vmem>>, vector<1x288x64xbf16>
    %32 = vector.shape_cast %31 : vector<1x288x64xbf16> to vector<288x64xbf16>
    %c384 = arith.constant 384 : index
    %c0_27 = arith.constant 0 : index
    %33 = vector.load %arg3[%c384, %c0_27] : memref<576x128xbf16, #tpu.memory_space<vmem>>, vector<64x128xbf16>
    %cst_28 = arith.constant dense<0.000000e+00> : vector<288x128xf32>
    %34 = tpu.matmul %32, %33, %cst_28 {dimension_numbers = #tpu.dot_dimension_numbers<[1], [0], [0], [1], [0, 0, 1, 1], [], []>} : vector<288x64xbf16>, vector<64x128xbf16>, vector<288x128xf32> -> vector<288x128xf32>
    %35 = arith.addf %30, %34 : vector<288x128xf32>
    %c0_29 = arith.constant 0 : index
    %c37 = arith.constant 37 : index
    %c0_30 = arith.constant 0 : index
    %36 = vector.load %arg2[%c0_29, %c37, %c0_30] : memref<1x342x64xbf16, #tpu.memory_space<vmem>>, vector<1x288x64xbf16>
    %37 = vector.shape_cast %36 : vector<1x288x64xbf16> to vector<288x64xbf16>
    %c448 = arith.constant 448 : index
    %c0_31 = arith.constant 0 : index
    %38 = vector.load %arg3[%c448, %c0_31] : memref<576x128xbf16, #tpu.memory_space<vmem>>, vector<64x128xbf16>
    %cst_32 = arith.constant dense<0.000000e+00> : vector<288x128xf32>
    %39 = tpu.matmul %37, %38, %cst_32 {dimension_numbers = #tpu.dot_dimension_numbers<[1], [0], [0], [1], [0, 0, 1, 1], [], []>} : vector<288x64xbf16>, vector<64x128xbf16>, vector<288x128xf32> -> vector<288x128xf32>
    %40 = arith.addf %35, %39 : vector<288x128xf32>
    %c0_33 = arith.constant 0 : index
    %c38 = arith.constant 38 : index
    %c0_34 = arith.constant 0 : index
    %41 = vector.load %arg2[%c0_33, %c38, %c0_34] : memref<1x342x64xbf16, #tpu.memory_space<vmem>>, vector<1x288x64xbf16>
    %42 = vector.shape_cast %41 : vector<1x288x64xbf16> to vector<288x64xbf16>
    %c512 = arith.constant 512 : index
    %c0_35 = arith.constant 0 : index
    %43 = vector.load %arg3[%c512, %c0_35] : memref<576x128xbf16, #tpu.memory_space<vmem>>, vector<64x128xbf16>
    %cst_36 = arith.constant dense<0.000000e+00> : vector<288x128xf32>
    %44 = tpu.matmul %42, %43, %cst_36 {dimension_numbers = #tpu.dot_dimension_numbers<[1], [0], [0], [1], [0, 0, 1, 1], [], []>} : vector<288x64xbf16>, vector<64x128xbf16>, vector<288x128xf32> -> vector<288x128xf32>
    %45 = arith.addf %40, %44 : vector<288x128xf32>
    %c0_37 = arith.constant 0 : index
    %c0_38 = arith.constant 0 : index
    %46 = vector.load %arg4[%c0_37, %c0_38] : memref<288x1xf32, #tpu.memory_space<vmem>>, vector<288x1xf32>
    %47 = vector.broadcast %46 : vector<288x1xf32> to vector<288x128xf32>
    %48 = arith.mulf %45, %47 : vector<288x128xf32>
    %49 = arith.truncf %48 : vector<288x128xf32> to vector<288x128xbf16>
    %c0_39 = arith.constant 0 : index
    %c0_40 = arith.constant 0 : index
    %c0_41 = arith.constant 0 : index
    %50 = vector.load %arg5[%c0_39, %c0_40, %c0_41] : memref<1x288x128xbf16, #tpu.memory_space<vmem>>, vector<1x288x128xbf16>
    %51 = vector.shape_cast %50 : vector<1x288x128xbf16> to vector<288x128xbf16>
    %52 = vector.shape_cast %49 : vector<288x128xbf16> to vector<1x288x128xbf16>
    tpu.vector_store %arg5[%c0_39, %c0_40, %c0_41], %52 {strides = array<i32>} : memref<1x288x128xbf16, #tpu.memory_space<vmem>>, vector<1x288x128xbf16>,
    %cst_42 = arith.constant dense<0.000000e+00> : vector<128xf32>
    %53 = vector.multi_reduction <add>, %48, %cst_42 [0] : vector<288x128xf32> to vector<128xf32>
    %54 = vector.shape_cast %53 : vector<128xf32> to vector<1x128xf32>
    %c0_43 = arith.constant 0 : index
    %c0_44 = arith.constant 0 : index
    %c0_45 = arith.constant 0 : index
    %55 = vector.load %arg6[%c0_43, %c0_44, %c0_45] : memref<1x1x128xf32, #tpu.memory_space<vmem>>, vector<1x1x128xf32>
    %56 = vector.shape_cast %55 : vector<1x1x128xf32> to vector<1x128xf32>
    %57 = vector.shape_cast %54 : vector<1x128xf32> to vector<1x1x128xf32>
    tpu.vector_store %arg6[%c0_43, %c0_44, %c0_45], %57 {strides = array<i32>} : memref<1x1x128xf32, #tpu.memory_space<vmem>>, vector<1x1x128xf32>,
    %58 = arith.mulf %48, %48 : vector<288x128xf32>
    %cst_46 = arith.constant dense<0.000000e+00> : vector<128xf32>
    %59 = vector.multi_reduction <add>, %58, %cst_46 [0] : vector<288x128xf32> to vector<128xf32>
    %60 = vector.shape_cast %59 : vector<128xf32> to vector<1x128xf32>
    %c0_47 = arith.constant 0 : index
    %c0_48 = arith.constant 0 : index
    %c0_49 = arith.constant 0 : index
    %61 = vector.load %arg7[%c0_47, %c0_48, %c0_49] : memref<1x1x128xf32, #tpu.memory_space<vmem>>, vector<1x1x128xf32>
    %62 = vector.shape_cast %61 : vector<1x1x128xf32> to vector<1x128xf32>
    %63 = vector.shape_cast %60 : vector<1x128xf32> to vector<1x1x128xf32>
    tpu.vector_store %arg7[%c0_47, %c0_48, %c0_49], %63 {strides = array<i32>} : memref<1x1x128xf32, #tpu.memory_space<vmem>>, vector<1x1x128xf32>,
    return
  }
  func.func @transform_0(%arg0: i32, %arg1: i32) -> (i32, i32, i32) {
    %c0_i32 = arith.constant 0 : i32
    %c0_i32_0 = arith.constant 0 : i32
    %c0_i32_1 = arith.constant 0 : i32
    return %arg0, %c0_i32, %c0_i32_0 : i32, i32, i32
  }
  func.func @transform_1(%arg0: i32, %arg1: i32) -> (i32, i32) {
    %c0_i32 = arith.constant 0 : i32
    %c0_i32_0 = arith.constant 0 : i32
    return %c0_i32, %arg1 : i32, i32
  }
  func.func @transform_2(%arg0: i32, %arg1: i32) -> (i32, i32) {
    %c0_i32 = arith.constant 0 : i32
    %c0_i32_0 = arith.constant 0 : i32
    %c0_i32_1 = arith.constant 0 : i32
    return %c0_i32, %c0_i32_0 : i32, i32
  }
  func.func @transform_3(%arg0: i32, %arg1: i32) -> (i32, i32, i32) {
    %c0_i32 = arith.constant 0 : i32
    %c0_i32_0 = arith.constant 0 : i32
    return %arg0, %c0_i32, %arg1 : i32, i32, i32
  }
  func.func @transform_4(%arg0: i32, %arg1: i32) -> (i32, i32, i32) {
    %c0_i32 = arith.constant 0 : i32
    %c0_i32_0 = arith.constant 0 : i32
    return %arg0, %c0_i32, %arg1 : i32, i32, i32
  }
  func.func @transform_5(%arg0: i32, %arg1: i32) -> (i32, i32, i32) {
    %c0_i32 = arith.constant 0 : i32
    %c0_i32_0 = arith.constant 0 : i32
    return %arg0, %c0_i32, %arg1 : i32, i32, i32
  }
}

module attributes {stable_mosaic.version = 11 : i64} {
  func.func @_bn_relu_kernel(%arg0: i32, %arg1: i32, %arg2: memref<1x288x128xbf16, #tpu.memory_space<vmem>>, %arg3: memref<1x128xf32, #tpu.memory_space<vmem>>, %arg4: memref<1x128xf32, #tpu.memory_space<vmem>>, %arg5: memref<1x288x128xbf16, #tpu.memory_space<vmem>>) attributes {dimension_semantics = [#tpu.dimension_semantics<parallel>, #tpu.dimension_semantics<parallel>], iteration_bounds = array<i64: 2, 1>, scalar_prefetch = 0 : i64, scratch_operands = 0 : i64, tpu.core_type = #tpu.core_type<tc>, window_params = [{transform_indices = @transform_0, window_bounds = array<i64: 1, 288, 128>}, {transform_indices = @transform_1, window_bounds = array<i64: 1, 128>}, {transform_indices = @transform_2, window_bounds = array<i64: 1, 128>}, {transform_indices = @transform_3, window_bounds = array<i64: 1, 288, 128>}]} {
    %c0 = arith.constant 0 : index
    %c0_0 = arith.constant 0 : index
    %c0_1 = arith.constant 0 : index
    %0 = vector.load %arg2[%c0, %c0_0, %c0_1] : memref<1x288x128xbf16, #tpu.memory_space<vmem>>, vector<1x288x128xbf16>
    %1 = vector.shape_cast %0 : vector<1x288x128xbf16> to vector<288x128xbf16>
    %2 = arith.extf %1 : vector<288x128xbf16> to vector<288x128xf32>
    %c0_2 = arith.constant 0 : index
    %c0_3 = arith.constant 0 : index
    %3 = vector.load %arg3[%c0_2, %c0_3] : memref<1x128xf32, #tpu.memory_space<vmem>>, vector<1x128xf32>
    %4 = vector.broadcast %3 : vector<1x128xf32> to vector<288x128xf32>
    %5 = arith.mulf %2, %4 : vector<288x128xf32>
    %c0_4 = arith.constant 0 : index
    %c0_5 = arith.constant 0 : index
    %6 = vector.load %arg4[%c0_4, %c0_5] : memref<1x128xf32, #tpu.memory_space<vmem>>, vector<1x128xf32>
    %7 = vector.broadcast %6 : vector<1x128xf32> to vector<288x128xf32>
    %8 = arith.addf %5, %7 : vector<288x128xf32>
    %cst = arith.constant 0.000000e+00 : f32
    %9 = vector.broadcast %cst : f32 to vector<288x128xf32>
    %10 = arith.maximumf %8, %9 : vector<288x128xf32>
    %11 = arith.truncf %10 : vector<288x128xf32> to vector<288x128xbf16>
    %c0_6 = arith.constant 0 : index
    %c0_7 = arith.constant 0 : index
    %c0_8 = arith.constant 0 : index
    %12 = vector.load %arg5[%c0_6, %c0_7, %c0_8] : memref<1x288x128xbf16, #tpu.memory_space<vmem>>, vector<1x288x128xbf16>
    %13 = vector.shape_cast %12 : vector<1x288x128xbf16> to vector<288x128xbf16>
    %14 = vector.shape_cast %11 : vector<288x128xbf16> to vector<1x288x128xbf16>
    tpu.vector_store %arg5[%c0_6, %c0_7, %c0_8], %14 {strides = array<i32>} : memref<1x288x128xbf16, #tpu.memory_space<vmem>>, vector<1x288x128xbf16>,
    return
  }
  func.func @transform_0(%arg0: i32, %arg1: i32) -> (i32, i32, i32) {
    %c0_i32 = arith.constant 0 : i32
    %c0_i32_0 = arith.constant 0 : i32
    return %arg0, %c0_i32, %arg1 : i32, i32, i32
  }
  func.func @transform_1(%arg0: i32, %arg1: i32) -> (i32, i32) {
    %c0_i32 = arith.constant 0 : i32
    %c0_i32_0 = arith.constant 0 : i32
    return %c0_i32, %arg1 : i32, i32
  }
  func.func @transform_2(%arg0: i32, %arg1: i32) -> (i32, i32) {
    %c0_i32 = arith.constant 0 : i32
    %c0_i32_0 = arith.constant 0 : i32
    return %c0_i32, %arg1 : i32, i32
  }
  func.func @transform_3(%arg0: i32, %arg1: i32) -> (i32, i32, i32) {
    %c0_i32 = arith.constant 0 : i32
    %c0_i32_0 = arith.constant 0 : i32
    return %arg0, %c0_i32, %arg1 : i32, i32, i32
  }
}

</mosaic_0001>

<bundles_post_ra>
// kernel: vgg_block_forward.5
= control target key start
LH: loop header
LB: loop body
LE: loop exit
PB: predicated region body
PF: predicated region fallthrough
CT: control target
= control target key end

     0   :  { %s956_s12 = smov 0   ;;  %s958_s13 = smov 0   ;;  %s1172_s0 = inlined_call_operand.vmem [shape: bf16[2,288,64], index: 0, kind: input, shape index: {}]   ;;  %s1173_s1 = inlined_call_operand.vmem [shape: f32[1,64], index: 1, kind: input, shape index: {}]   ;;  %s1174_s2 = inlined_call_operand.vmem [shape: f32[1,64], index: 2, kind: input, shape index: {}]   ;;  %s1175_s3 = inlined_call_operand.vmem [shape: bf16[2,288,64], index: 3, kind: output, shape index: {}]  }
   0x1   :  { %s960_s14 = smov 0  }
   0x2 LB: > { %s25_s15 = sadd.s32 1, %s930_s13  ;;  %p719_p0 = scmp.ge.s32.totalorder %s934_s14, 1  ;;  %s934_s14 = sphi %s960_s14, %s13_s14   ;;  %s930_s13 = sphi %s958_s13, %s1177_s13   ;;  %s926_s12 = sphi %s956_s12, %s1176_s12  }
   0x3   : > { %p27_p1 = scmp.ge.s32.totalorder %s25_s15, 2  ;;  %p172_p2 = scmp.lt.s32.totalorder %s934_s14, 3 }
   0x5   : > { %s1179_s15 = smov (%p27_p1, %s25_s15), 0  ;;  %p173_p3 = pnand %p719_p0, %p172_p2 }
   0x6   : > { %p208_p4 = scmp.lt.s32.totalorder (!%p173_p3), %s926_s12, 1  ;;  %v987_v0 = vld [vmem:[%s1173_s1] ss:$0 sm:$0xff] (!%p173_p3)  ;;  %vm568_vm0 = vcmask (!%p173_p3), 519168  }
   0x7   : > { %176 = sbr.rel (%p173_p3) target bundleno = 70 (0x46), region = 32  ;;  %v996_v9 = vld [vmem:[%s1174_s2] ss:$0 sm:$0xff] (!%p173_p3) }
   0xe   : > { %s1181_s12 = smov (!%p208_p4, %s926_s12), 1 }
   0xf   : > { %s887_s16 = smul.u32 144, %s1181_s12 }
  0x11   : > { %s982_s19 = scalar_lea.vmem %s1172_s0, %s887_s16  ;;  %s1019_s26 = scalar_lea.vmem %s1175_s3, %s887_s16 }
  0x12   : > { %v799_v1 = vld [vmem:[%s982_s19] sm:$0xff]   ;;  %v870_v2 = vld [vmem:[%s982_s19 + $0x8] sm:$0xff]   ;;  %v871_v3 = vld [vmem:[%s982_s19 + $0x10] sm:$0xff]  }
  0x13   : > { %v800_v4 = vunpack.c.l.bf16 %v799_v1  ;;  %v801_v5 = vunpack.c.h.bf16 %v799_v1  ;;  %v804_v6 = vunpack.c.l.bf16 %v870_v2  ;;  %v805_v7 = vunpack.c.h.bf16 %v870_v2  ;;  %v872_v8 = vld [vmem:[%s982_s19 + $0x18] sm:$0xff]   ;;  %v873_v38 = vld [vmem:[%s982_s19 + $0x20] sm:$0xff]   ;;  %v874_v39 = vld [vmem:[%s982_s19 + $0x28] sm:$0xff]  }
  0x14   : > { %v808_v10 = vunpack.c.l.bf16 %v871_v3  ;;  %v809_v11 = vunpack.c.h.bf16 %v871_v3  ;;  %v812_v12 = vunpack.c.l.bf16 %v872_v8  ;;  %v813_v13 = vunpack.c.h.bf16 %v872_v8  ;;  %v875_v44 = vld [vmem:[%s982_s19 + $0x30] sm:$0xff]   ;;  %v876_v45 = vld [vmem:[%s982_s19 + $0x38] sm:$0xff]  }
  0x15   : > { %v309_v14 = vmul.f32 %v800_v4, %v987_v0  ;;  %v310_v15 = vmul.f32 %v801_v5, %v987_v0  ;;  %v311_v16 = vmul.f32 %v804_v6, %v987_v0  ;;  %v312_v17 = vmul.f32 %v805_v7, %v987_v0 }
  0x16   : > { %v313_v18 = vmul.f32 %v808_v10, %v987_v0  ;;  %v314_v19 = vmul.f32 %v809_v11, %v987_v0  ;;  %v315_v20 = vmul.f32 %v812_v12, %v987_v0  ;;  %v316_v21 = vmul.f32 %v813_v13, %v987_v0 }
  0x17   : > { %v352_v22 = vadd.f32 %v996_v9, %v309_v14  ;;  %v353_v23 = vadd.f32 %v996_v9, %v310_v15  ;;  %v354_v24 = vadd.f32 %v996_v9, %v311_v16  ;;  %v355_v25 = vadd.f32 %v996_v9, %v312_v17 }
  0x18   : > { %v356_v26 = vadd.f32 %v996_v9, %v313_v18  ;;  %v357_v27 = vadd.f32 %v996_v9, %v314_v19  ;;  %v358_v28 = vadd.f32 %v996_v9, %v315_v20  ;;  %v359_v29 = vadd.f32 %v996_v9, %v316_v21  ;;  %v877_v20 = vld [vmem:[%s982_s19 + $0x40] sm:$0xff]   ;;  %v878_v21 = vld [vmem:[%s982_s19 + $0x48] sm:$0xff]  }
  0x19   : > { %v388_v30 = vmax.f32 %v352_v22, 0.0  ;;  %v389_v31 = vmax.f32 %v353_v23, 0.0  ;;  %v390_v32 = vmax.f32 %v354_v24, 0.0  ;;  %v391_v33 = vmax.f32 %v355_v25, 0.0 }
  0x1a   : > { %v392_v34 = vmax.f32 %v356_v26, 0.0  ;;  %v393_v35 = vmax.f32 %v357_v27, 0.0  ;;  %v394_v36 = vmax.f32 %v358_v28, 0.0  ;;  %v395_v37 = vmax.f32 %v359_v29, 0.0  ;;  %v879_v26 = vld [vmem:[%s982_s19 + $0x50] sm:$0xff]   ;;  %v880_v27 = vld [vmem:[%s982_s19 + $0x58] sm:$0xff]  }
  0x1b   : > { %v762_v40 = vpack.c.bf16 %v388_v30, %v388_v30  ;;  %v763_v41 = vpack.c.bf16 %v389_v31, %v389_v31  ;;  %v764_v42 = vpack.c.bf16 %v390_v32, %v390_v32  ;;  %v765_v43 = vpack.c.bf16 %v391_v33, %v391_v33 }
  0x1c   : > { %v766_v46 = vpack.c.bf16 %v392_v34, %v392_v34  ;;  %v767_v47 = vpack.c.bf16 %v393_v35, %v393_v35  ;;  %v768_v48 = vpack.c.bf16 %v394_v36, %v394_v36  ;;  %v769_v49 = vpack.c.bf16 %v395_v37, %v395_v37 }
  0x1d   : > { %569 = vst.msk [vmem:[%s1019_s26] sm:$0xf] %vm568_vm0, %v762_v40  ;;  %570 = vst.msk [vmem:[%s1019_s26 + $0x4] sm:$0xf] %vm568_vm0, %v763_v41  ;;  %v816_v50 = vunpack.c.l.bf16 %v873_v38  ;;  %v817_v51 = vunpack.c.h.bf16 %v873_v38  ;;  %v820_v52 = vunpack.c.l.bf16 %v874_v39  ;;  %v821_v53 = vunpack.c.h.bf16 %v874_v39 }
  0x1e   : > { %571 = vst.msk [vmem:[%s1019_s26 + $0x8] sm:$0xf] %vm568_vm0, %v764_v42  ;;  %572 = vst.msk [vmem:[%s1019_s26 + $0xc] sm:$0xf] %vm568_vm0, %v765_v43  ;;  %v824_v54 = vunpack.c.l.bf16 %v875_v44  ;;  %v825_v55 = vunpack.c.h.bf16 %v875_v44  ;;  %v828_v56 = vunpack.c.l.bf16 %v876_v45  ;;  %v829_v57 = vunpack.c.h.bf16 %v876_v45 }
  0x1f   : > { %573 = vst.msk [vmem:[%s1019_s26 + $0x10] sm:$0xf] %vm568_vm0, %v766_v46  ;;  %574 = vst.msk [vmem:[%s1019_s26 + $0x14] sm:$0xf] %vm568_vm0, %v767_v47  ;;  %v317_v58 = vmul.f32 %v816_v50, %v987_v0  ;;  %v318_v59 = vmul.f32 %v817_v51, %v987_v0  ;;  %v319_v60 = vmul.f32 %v820_v52, %v987_v0  ;;  %v832_v32 = vunpack.c.l.bf16 %v877_v20 }
  0x20   : > { %575 = vst.msk [vmem:[%s1019_s26 + $0x18] sm:$0xf] %vm568_vm0, %v768_v48  ;;  %576 = vst.msk [vmem:[%s1019_s26 + $0x1c] sm:$0xf] %vm568_vm0, %v769_v49  ;;  %v320_v61 = vmul.f32 %v821_v53, %v987_v0  ;;  %v321_v62 = vmul.f32 %v824_v54, %v987_v0  ;;  %v322_v63 = vmul.f32 %v825_v55, %v987_v0  ;;  %v833_v33 = vunpack.c.h.bf16 %v877_v20 }
  0x21   : > { %v323_v1 = vmul.f32 %v828_v56, %v987_v0  ;;  %v324_v2 = vmul.f32 %v829_v57, %v987_v0  ;;  %v360_v3 = vadd.f32 %v996_v9, %v317_v58  ;;  %v361_v4 = vadd.f32 %v996_v9, %v318_v59 }
  0x22   : > { %v362_v5 = vadd.f32 %v996_v9, %v319_v60  ;;  %v363_v6 = vadd.f32 %v996_v9, %v320_v61  ;;  %v364_v7 = vadd.f32 %v996_v9, %v321_v62  ;;  %v365_v8 = vadd.f32 %v996_v9, %v322_v63 }
  0x23   : > { %v366_v10 = vadd.f32 %v996_v9, %v323_v1  ;;  %v367_v11 = vadd.f32 %v996_v9, %v324_v2  ;;  %v396_v12 = vmax.f32 %v360_v3, 0.0  ;;  %v397_v13 = vmax.f32 %v361_v4, 0.0  ;;  %v881_v1 = vld [vmem:[%s982_s19 + $0x60] sm:$0xff]   ;;  %v882_v2 = vld [vmem:[%s982_s19 + $0x68] sm:$0xff]  }
  0x24   : > { %v398_v14 = vmax.f32 %v362_v5, 0.0  ;;  %v399_v15 = vmax.f32 %v363_v6, 0.0  ;;  %v400_v16 = vmax.f32 %v364_v7, 0.0  ;;  %v401_v17 = vmax.f32 %v365_v8, 0.0  ;;  %v883_v7 = vld [vmem:[%s982_s19 + $0x70] sm:$0xff]   ;;  %v884_v8 = vld [vmem:[%s982_s19 + $0x78] sm:$0xff]  }
  0x25   : > { %v402_v18 = vmax.f32 %v366_v10, 0.0  ;;  %v403_v19 = vmax.f32 %v367_v11, 0.0  ;;  %v770_v22 = vpack.c.bf16 %v396_v12, %v396_v12  ;;  %v771_v23 = vpack.c.bf16 %v397_v13, %v397_v13 }
  0x26   : > { %v772_v24 = vpack.c.bf16 %v398_v14, %v398_v14  ;;  %v773_v25 = vpack.c.bf16 %v399_v15, %v399_v15  ;;  %v774_v28 = vpack.c.bf16 %v400_v16, %v400_v16  ;;  %v775_v29 = vpack.c.bf16 %v401_v17, %v401_v17 }
  0x27   : > { %v776_v30 = vpack.c.bf16 %v402_v18, %v402_v18  ;;  %v777_v31 = vpack.c.bf16 %v403_v19, %v403_v19  ;;  %577 = vst.msk [vmem:[%s1019_s26 + $0x20] sm:$0xf] %vm568_vm0, %v770_v22  ;;  %578 = vst.msk [vmem:[%s1019_s26 + $0x24] sm:$0xf] %vm568_vm0, %v771_v23  ;;  %v836_v34 = vunpack.c.l.bf16 %v878_v21  ;;  %v837_v35 = vunpack.c.h.bf16 %v878_v21 }
  0x28   : > { %579 = vst.msk [vmem:[%s1019_s26 + $0x28] sm:$0xf] %vm568_vm0, %v772_v24  ;;  %580 = vst.msk [vmem:[%s1019_s26 + $0x2c] sm:$0xf] %vm568_vm0, %v773_v25  ;;  %v840_v36 = vunpack.c.l.bf16 %v879_v26  ;;  %v841_v37 = vunpack.c.h.bf16 %v879_v26  ;;  %v844_v38 = vunpack.c.l.bf16 %v880_v27  ;;  %v845_v39 = vunpack.c.h.bf16 %v880_v27 }
  0x29   : > { %581 = vst.msk [vmem:[%s1019_s26 + $0x30] sm:$0xf] %vm568_vm0, %v774_v28  ;;  %582 = vst.msk [vmem:[%s1019_s26 + $0x34] sm:$0xf] %vm568_vm0, %v775_v29  ;;  %v325_v40 = vmul.f32 %v832_v32, %v987_v0  ;;  %v326_v41 = vmul.f32 %v833_v33, %v987_v0  ;;  %v327_v42 = vmul.f32 %v836_v34, %v987_v0  ;;  %v848_v14 = vunpack.c.l.bf16 %v881_v1 }
  0x2a   : > { %583 = vst.msk [vmem:[%s1019_s26 + $0x38] sm:$0xf] %vm568_vm0, %v776_v30  ;;  %584 = vst.msk [vmem:[%s1019_s26 + $0x3c] sm:$0xf] %vm568_vm0, %v777_v31  ;;  %v328_v43 = vmul.f32 %v837_v35, %v987_v0  ;;  %v329_v44 = vmul.f32 %v840_v36, %v987_v0  ;;  %v330_v45 = vmul.f32 %v841_v37, %v987_v0  ;;  %v849_v15 = vunpack.c.h.bf16 %v881_v1 }
  0x2b   : > { %v331_v46 = vmul.f32 %v844_v38, %v987_v0  ;;  %v332_v47 = vmul.f32 %v845_v39, %v987_v0  ;;  %v368_v48 = vadd.f32 %v996_v9, %v325_v40  ;;  %v369_v49 = vadd.f32 %v996_v9, %v326_v41 }
  0x2c   : > { %v370_v50 = vadd.f32 %v996_v9, %v327_v42  ;;  %v371_v51 = vadd.f32 %v996_v9, %v328_v43  ;;  %v372_v52 = vadd.f32 %v996_v9, %v329_v44  ;;  %v373_v53 = vadd.f32 %v996_v9, %v330_v45 }
  0x2d   : > { %v374_v54 = vadd.f32 %v996_v9, %v331_v46  ;;  %v375_v55 = vadd.f32 %v996_v9, %v332_v47  ;;  %v404_v56 = vmax.f32 %v368_v48, 0.0  ;;  %v405_v57 = vmax.f32 %v369_v49, 0.0  ;;  %v885_v46 = vld [vmem:[%s982_s19 + $0x80] sm:$0xff]   ;;  %v886_v47 = vld [vmem:[%s982_s19 + $0x88] sm:$0xff]  }
  0x2e   : > { %v406_v58 = vmax.f32 %v370_v50, 0.0  ;;  %v407_v59 = vmax.f32 %v371_v51, 0.0  ;;  %v408_v60 = vmax.f32 %v372_v52, 0.0  ;;  %v409_v61 = vmax.f32 %v373_v53, 0.0 }
  0x2f   : > { %v410_v62 = vmax.f32 %v374_v54, 0.0  ;;  %v411_v63 = vmax.f32 %v375_v55, 0.0  ;;  %v778_v3 = vpack.c.bf16 %v404_v56, %v404_v56  ;;  %v779_v4 = vpack.c.bf16 %v405_v57, %v405_v57 }
  0x30   : > { %v780_v5 = vpack.c.bf16 %v406_v58, %v406_v58  ;;  %v781_v6 = vpack.c.bf16 %v407_v59, %v407_v59  ;;  %v782_v10 = vpack.c.bf16 %v408_v60, %v408_v60  ;;  %v783_v11 = vpack.c.bf16 %v409_v61, %v409_v61 }
  0x31   : > { %v784_v12 = vpack.c.bf16 %v410_v62, %v410_v62  ;;  %v785_v13 = vpack.c.bf16 %v411_v63, %v411_v63  ;;  %585 = vst.msk [vmem:[%s1019_s26 + $0x40] sm:$0xf] %vm568_vm0, %v778_v3  ;;  %586 = vst.msk [vmem:[%s1019_s26 + $0x44] sm:$0xf] %vm568_vm0, %v779_v4  ;;  %v852_v16 = vunpack.c.l.bf16 %v882_v2  ;;  %v853_v17 = vunpack.c.h.bf16 %v882_v2 }
  0x32   : > { %587 = vst.msk [vmem:[%s1019_s26 + $0x48] sm:$0xf] %vm568_vm0, %v780_v5  ;;  %588 = vst.msk [vmem:[%s1019_s26 + $0x4c] sm:$0xf] %vm568_vm0, %v781_v6  ;;  %v856_v18 = vunpack.c.l.bf16 %v883_v7  ;;  %v857_v19 = vunpack.c.h.bf16 %v883_v7  ;;  %v860_v20 = vunpack.c.l.bf16 %v884_v8  ;;  %v861_v21 = vunpack.c.h.bf16 %v884_v8 }
  0x33   : > { %589 = vst.msk [vmem:[%s1019_s26 + $0x50] sm:$0xf] %vm568_vm0, %v782_v10  ;;  %590 = vst.msk [vmem:[%s1019_s26 + $0x54] sm:$0xf] %vm568_vm0, %v783_v11  ;;  %v333_v22 = vmul.f32 %v848_v14, %v987_v0  ;;  %v334_v23 = vmul.f32 %v849_v15, %v987_v0  ;;  %v335_v24 = vmul.f32 %v852_v16, %v987_v0  ;;  %v864_v56 = vunpack.c.l.bf16 %v885_v46 }
  0x34   : > { %591 = vst.msk [vmem:[%s1019_s26 + $0x58] sm:$0xf] %vm568_vm0, %v784_v12  ;;  %592 = vst.msk [vmem:[%s1019_s26 + $0x5c] sm:$0xf] %vm568_vm0, %v785_v13  ;;  %v336_v25 = vmul.f32 %v853_v17, %v987_v0  ;;  %v337_v26 = vmul.f32 %v856_v18, %v987_v0  ;;  %v338_v27 = vmul.f32 %v857_v19, %v987_v0  ;;  %v865_v57 = vunpack.c.h.bf16 %v885_v46 }
  0x35   : > { %v339_v28 = vmul.f32 %v860_v20, %v987_v0  ;;  %v340_v29 = vmul.f32 %v861_v21, %v987_v0  ;;  %v376_v30 = vadd.f32 %v996_v9, %v333_v22  ;;  %v377_v31 = vadd.f32 %v996_v9, %v334_v23 }
  0x36   : > { %v378_v32 = vadd.f32 %v996_v9, %v335_v24  ;;  %v379_v33 = vadd.f32 %v996_v9, %v336_v25  ;;  %v380_v34 = vadd.f32 %v996_v9, %v337_v26  ;;  %v381_v35 = vadd.f32 %v996_v9, %v338_v27 }
  0x37   : > { %v382_v36 = vadd.f32 %v996_v9, %v339_v28  ;;  %v383_v37 = vadd.f32 %v996_v9, %v340_v29  ;;  %v412_v38 = vmax.f32 %v376_v30, 0.0  ;;  %v413_v39 = vmax.f32 %v377_v31, 0.0 }
  0x38   : > { %v414_v40 = vmax.f32 %v378_v32, 0.0  ;;  %v415_v41 = vmax.f32 %v379_v33, 0.0  ;;  %v416_v42 = vmax.f32 %v380_v34, 0.0  ;;  %v417_v43 = vmax.f32 %v381_v35, 0.0 }
  0x39   : > { %v418_v44 = vmax.f32 %v382_v36, 0.0  ;;  %v419_v45 = vmax.f32 %v383_v37, 0.0  ;;  %v786_v48 = vpack.c.bf16 %v412_v38, %v412_v38  ;;  %v787_v49 = vpack.c.bf16 %v413_v39, %v413_v39 }
  0x3a   : > { %v788_v50 = vpack.c.bf16 %v414_v40, %v414_v40  ;;  %v789_v51 = vpack.c.bf16 %v415_v41, %v415_v41  ;;  %v790_v52 = vpack.c.bf16 %v416_v42, %v416_v42  ;;  %v791_v53 = vpack.c.bf16 %v417_v43, %v417_v43 }
  0x3b   : > { %v792_v54 = vpack.c.bf16 %v418_v44, %v418_v44  ;;  %v793_v55 = vpack.c.bf16 %v419_v45, %v419_v45  ;;  %593 = vst.msk [vmem:[%s1019_s26 + $0x60] sm:$0xf] %vm568_vm0, %v786_v48  ;;  %594 = vst.msk [vmem:[%s1019_s26 + $0x64] sm:$0xf] %vm568_vm0, %v787_v49  ;;  %v868_v58 = vunpack.c.l.bf16 %v886_v47  ;;  %v869_v59 = vunpack.c.h.bf16 %v886_v47 }
  0x3c   : > { %595 = vst.msk [vmem:[%s1019_s26 + $0x68] sm:$0xf] %vm568_vm0, %v788_v50  ;;  %596 = vst.msk [vmem:[%s1019_s26 + $0x6c] sm:$0xf] %vm568_vm0, %v789_v51  ;;  %v341_v60 = vmul.f32 %v864_v56, %v987_v0  ;;  %v342_v61 = vmul.f32 %v865_v57, %v987_v0 }
  0x3d   : > { %597 = vst.msk [vmem:[%s1019_s26 + $0x70] sm:$0xf] %vm568_vm0, %v790_v52  ;;  %598 = vst.msk [vmem:[%s1019_s26 + $0x74] sm:$0xf] %vm568_vm0, %v791_v53  ;;  %v343_v62 = vmul.f32 %v868_v58, %v987_v0  ;;  %v344_v63 = vmul.f32 %v869_v59, %v987_v0 }
  0x3e   : > { %599 = vst.msk [vmem:[%s1019_s26 + $0x78] sm:$0xf] %vm568_vm0, %v792_v54  ;;  %600 = vst.msk [vmem:[%s1019_s26 + $0x7c] sm:$0xf] %vm568_vm0, %v793_v55  ;;  %v384_v1 = vadd.f32 %v996_v9, %v341_v60  ;;  %v385_v2 = vadd.f32 %v996_v9, %v342_v61 }
  0x3f   : > { %v386_v3 = vadd.f32 %v996_v9, %v343_v62  ;;  %v387_v4 = vadd.f32 %v996_v9, %v344_v63 }
  0x40   : > { %v420_v5 = vmax.f32 %v384_v1, 0.0  ;;  %v421_v6 = vmax.f32 %v385_v2, 0.0 }
  0x41   : > { %v422_v7 = vmax.f32 %v386_v3, 0.0  ;;  %v423_v8 = vmax.f32 %v387_v4, 0.0 }
  0x42   : > { %v794_v10 = vpack.c.bf16 %v420_v5, %v420_v5  ;;  %v795_v11 = vpack.c.bf16 %v421_v6, %v421_v6 }
  0x43   : > { %v796_v12 = vpack.c.bf16 %v422_v7, %v422_v7  ;;  %v797_v13 = vpack.c.bf16 %v423_v8, %v423_v8 }
  0x44   : > { %601 = vst.msk [vmem:[%s1019_s26 + $0x80] sm:$0xf] %vm568_vm0, %v794_v10  ;;  %602 = vst.msk [vmem:[%s1019_s26 + $0x84] sm:$0xf] %vm568_vm0, %v795_v11 }
  0x45   : > { %603 = vst.msk [vmem:[%s1019_s26 + $0x88] sm:$0xf] %vm568_vm0, %v796_v12  ;;  %604 = vst.msk [vmem:[%s1019_s26 + $0x8c] sm:$0xf] %vm568_vm0, %v797_v13 }
  0x46 PF: > { %s13_s14 = sadd.s32 1, %s934_s14   ;;  %s1176_s12 = smov %s930_s13 }
  0x47   : > { %p10_p5 = scmp.ge.s32.totalorder %s13_s14, 4   ;;  %s1177_s13 = smov %s1179_s15 }
  0x49   :  { %12 = sbr.rel (!%p10_p5) target bundleno = 2 (0x2), region = 68 }

// kernel: vgg_block_forward.7
= control target key start
LH: loop header
LB: loop body
LE: loop exit
PB: predicated region body
PF: predicated region fallthrough
CT: control target
= control target key end

     0   :  { %s1062_s12 = smov 0   ;;  %s1064_s13 = smov 0   ;;  %s1224_s0 = inlined_call_operand.vmem [shape: bf16[2,288,128], index: 0, kind: input, shape index: {}]   ;;  %s1225_s1 = inlined_call_operand.vmem [shape: f32[1,128], index: 1, kind: input, shape index: {}]   ;;  %s1226_s2 = inlined_call_operand.vmem [shape: f32[1,128], index: 2, kind: input, shape index: {}]   ;;  %s1227_s3 = inlined_call_operand.vmem [shape: bf16[2,288,128], index: 3, kind: output, shape index: {}]  }
   0x1   :  { %s1066_s14 = smov 0  }
   0x2 LB: > { %s25_s15 = sadd.s32 1, %s1036_s13  ;;  %p718_p0 = scmp.ge.s32.totalorder %s1040_s14, 1  ;;  %s1040_s14 = sphi %s1066_s14, %s13_s14   ;;  %s1036_s13 = sphi %s1064_s13, %s1229_s13   ;;  %s1032_s12 = sphi %s1062_s12, %s1228_s12  }
   0x3   : > { %p27_p1 = scmp.ge.s32.totalorder %s25_s15, 2  ;;  %p172_p2 = scmp.lt.s32.totalorder %s1040_s14, 3 }
   0x5   : > { %s1231_s15 = smov (%p27_p1, %s25_s15), 0  ;;  %p173_p3 = pnand %p718_p0, %p172_p2 }
   0x6   : > { %p208_p4 = scmp.lt.s32.totalorder (!%p173_p3), %s1032_s12, 1  ;;  %v1093_v0 = vld [vmem:[%s1225_s1] ss:$0 sm:$0xff] (!%p173_p3) }
   0x7   : > { %176 = sbr.rel (%p173_p3) target bundleno = 66 (0x42), region = 32  ;;  %v1102_v9 = vld [vmem:[%s1226_s2] ss:$0 sm:$0xff] (!%p173_p3) }
   0xe   : > { %s1233_s12 = smov (!%p208_p4, %s1032_s12), 1 }
   0xf   : > { %s993_s16 = smul.u32 144, %s1233_s12 }
  0x11   : > { %s1088_s19 = scalar_lea.vmem %s1224_s0, %s993_s16  ;;  %s1127_s26 = scalar_lea.vmem %s1227_s3, %s993_s16 }
  0x12   : > { %v798_v1 = vld [vmem:[%s1088_s19] sm:$0xff]   ;;  %v959_v2 = vld [vmem:[%s1088_s19 + $0x8] sm:$0xff]   ;;  %v960_v3 = vld [vmem:[%s1088_s19 + $0x10] sm:$0xff]  }
  0x13   : > { %v799_v4 = vunpack.c.l.bf16 %v798_v1  ;;  %v800_v5 = vunpack.c.h.bf16 %v798_v1  ;;  %v803_v6 = vunpack.c.l.bf16 %v959_v2  ;;  %v804_v7 = vunpack.c.h.bf16 %v959_v2  ;;  %v961_v8 = vld [vmem:[%s1088_s19 + $0x18] sm:$0xff]   ;;  %v962_v30 = vld [vmem:[%s1088_s19 + $0x20] sm:$0xff]   ;;  %v963_v35 = vld [vmem:[%s1088_s19 + $0x28] sm:$0xff]  }
  0x14   : > { %v807_v10 = vunpack.c.l.bf16 %v960_v3  ;;  %v808_v11 = vunpack.c.h.bf16 %v960_v3  ;;  %v811_v12 = vunpack.c.l.bf16 %v961_v8  ;;  %v812_v13 = vunpack.c.h.bf16 %v961_v8  ;;  %v964_v40 = vld [vmem:[%s1088_s19 + $0x30] sm:$0xff]   ;;  %v965_v45 = vld [vmem:[%s1088_s19 + $0x38] sm:$0xff]   ;;  %v966_v3 = vld [vmem:[%s1088_s19 + $0x40] sm:$0xff]  }
  0x15   : > { %v309_v14 = vmul.f32 %v799_v4, %v1093_v0  ;;  %v310_v15 = vmul.f32 %v800_v5, %v1093_v0  ;;  %v311_v16 = vmul.f32 %v803_v6, %v1093_v0  ;;  %v312_v17 = vmul.f32 %v804_v7, %v1093_v0 }
  0x16   : > { %v313_v18 = vmul.f32 %v807_v10, %v1093_v0  ;;  %v314_v19 = vmul.f32 %v808_v11, %v1093_v0  ;;  %v315_v20 = vmul.f32 %v811_v12, %v1093_v0  ;;  %v316_v21 = vmul.f32 %v812_v13, %v1093_v0  ;;  %v967_v13 = vld [vmem:[%s1088_s19 + $0x48] sm:$0xff]  }
  0x17   : > { %v352_v22 = vadd.f32 %v1102_v9, %v309_v14  ;;  %v353_v23 = vadd.f32 %v1102_v9, %v310_v15  ;;  %v354_v24 = vadd.f32 %v1102_v9, %v311_v16  ;;  %v355_v25 = vadd.f32 %v1102_v9, %v312_v17 }
  0x18   : > { %v356_v26 = vadd.f32 %v1102_v9, %v313_v18  ;;  %v357_v27 = vadd.f32 %v1102_v9, %v314_v19  ;;  %v358_v28 = vadd.f32 %v1102_v9, %v315_v20  ;;  %v359_v29 = vadd.f32 %v1102_v9, %v316_v21  ;;  %v968_v18 = vld [vmem:[%s1088_s19 + $0x50] sm:$0xff]  }
  0x19   : > { %v388_v31 = vmax.f32 %v352_v22, 0.0  ;;  %v389_v32 = vmax.f32 %v353_v23, 0.0  ;;  %v390_v33 = vmax.f32 %v354_v24, 0.0  ;;  %v391_v34 = vmax.f32 %v355_v25, 0.0  ;;  %v969_v23 = vld [vmem:[%s1088_s19 + $0x58] sm:$0xff]  }
  0x1a   : > { %v392_v36 = vmax.f32 %v356_v26, 0.0  ;;  %v393_v37 = vmax.f32 %v357_v27, 0.0  ;;  %v394_v38 = vmax.f32 %v358_v28, 0.0  ;;  %v395_v39 = vmax.f32 %v359_v29, 0.0 }
  0x1b   : > { %v872_v41 = vpack.c.bf16 %v389_v32, %v388_v31  ;;  %v877_v42 = vpack.c.bf16 %v391_v34, %v390_v33  ;;  %v815_v43 = vunpack.c.l.bf16 %v962_v30  ;;  %v816_v44 = vunpack.c.h.bf16 %v962_v30 }
  0x1c   : > { %v882_v46 = vpack.c.bf16 %v393_v37, %v392_v36  ;;  %v887_v47 = vpack.c.bf16 %v395_v39, %v394_v38  ;;  %v819_v48 = vunpack.c.l.bf16 %v963_v35  ;;  %v820_v49 = vunpack.c.h.bf16 %v963_v35 }
  0x1d   : > { %873 = vst [vmem:[%s1127_s26] sm:$0xff] %v872_v41   ;;  %976 = vst [vmem:[%s1127_s26 + $0x8] sm:$0xff] %v877_v42   ;;  %v317_v50 = vmul.f32 %v815_v43, %v1093_v0  ;;  %v318_v51 = vmul.f32 %v816_v44, %v1093_v0  ;;  %v823_v52 = vunpack.c.l.bf16 %v964_v40  ;;  %v824_v53 = vunpack.c.h.bf16 %v964_v40  ;;  %v970_v40 = vld [vmem:[%s1088_s19 + $0x60] sm:$0xff]  }
  0x1e   : > { %977 = vst [vmem:[%s1127_s26 + $0x10] sm:$0xff] %v882_v46   ;;  %978 = vst [vmem:[%s1127_s26 + $0x18] sm:$0xff] %v887_v47   ;;  %v319_v54 = vmul.f32 %v819_v48, %v1093_v0  ;;  %v320_v55 = vmul.f32 %v820_v49, %v1093_v0  ;;  %v827_v56 = vunpack.c.l.bf16 %v965_v45  ;;  %v828_v57 = vunpack.c.h.bf16 %v965_v45 }
  0x1f   : > { %v360_v58 = vadd.f32 %v1102_v9, %v317_v50  ;;  %v361_v59 = vadd.f32 %v1102_v9, %v318_v51  ;;  %v321_v60 = vmul.f32 %v823_v52, %v1093_v0  ;;  %v322_v61 = vmul.f32 %v824_v53, %v1093_v0  ;;  %v971_v53 = vld [vmem:[%s1088_s19 + $0x68] sm:$0xff]  }
  0x20   : > { %v362_v62 = vadd.f32 %v1102_v9, %v319_v54  ;;  %v363_v63 = vadd.f32 %v1102_v9, %v320_v55  ;;  %v323_v1 = vmul.f32 %v827_v56, %v1093_v0  ;;  %v324_v2 = vmul.f32 %v828_v57, %v1093_v0 }
  0x21   : > { %v396_v4 = vmax.f32 %v360_v58, 0.0  ;;  %v397_v5 = vmax.f32 %v361_v59, 0.0  ;;  %v364_v6 = vadd.f32 %v1102_v9, %v321_v60  ;;  %v365_v7 = vadd.f32 %v1102_v9, %v322_v61  ;;  %v972_v58 = vld [vmem:[%s1088_s19 + $0x70] sm:$0xff]  }
  0x22   : > { %v398_v8 = vmax.f32 %v362_v62, 0.0  ;;  %v399_v10 = vmax.f32 %v363_v63, 0.0  ;;  %v366_v11 = vadd.f32 %v1102_v9, %v323_v1  ;;  %v367_v12 = vadd.f32 %v1102_v9, %v324_v2  ;;  %v973_v63 = vld [vmem:[%s1088_s19 + $0x78] sm:$0xff]  }
  0x23   : > { %v892_v14 = vpack.c.bf16 %v397_v5, %v396_v4  ;;  %v400_v15 = vmax.f32 %v364_v6, 0.0  ;;  %v401_v16 = vmax.f32 %v365_v7, 0.0  ;;  %v831_v17 = vunpack.c.l.bf16 %v966_v3 }
  0x24   : > { %v897_v19 = vpack.c.bf16 %v399_v10, %v398_v8  ;;  %v402_v20 = vmax.f32 %v366_v11, 0.0  ;;  %v403_v21 = vmax.f32 %v367_v12, 0.0  ;;  %v832_v22 = vunpack.c.h.bf16 %v966_v3 }
  0x25   : > { %979 = vst [vmem:[%s1127_s26 + $0x20] sm:$0xff] %v892_v14   ;;  %v902_v24 = vpack.c.bf16 %v401_v16, %v400_v15  ;;  %v325_v25 = vmul.f32 %v831_v17, %v1093_v0  ;;  %v835_v26 = vunpack.c.l.bf16 %v967_v13  ;;  %v836_v27 = vunpack.c.h.bf16 %v967_v13  ;;  %v974_v14 = vld [vmem:[%s1088_s19 + $0x80] sm:$0xff]  }
  0x26   : > { %980 = vst [vmem:[%s1127_s26 + $0x28] sm:$0xff] %v897_v19   ;;  %v907_v28 = vpack.c.bf16 %v403_v21, %v402_v20  ;;  %v326_v29 = vmul.f32 %v832_v22, %v1093_v0  ;;  %v839_v30 = vunpack.c.l.bf16 %v968_v18  ;;  %v840_v31 = vunpack.c.h.bf16 %v968_v18 }
  0x27   : > { %981 = vst [vmem:[%s1127_s26 + $0x30] sm:$0xff] %v902_v24   ;;  %v368_v32 = vadd.f32 %v1102_v9, %v325_v25  ;;  %v327_v33 = vmul.f32 %v835_v26, %v1093_v0  ;;  %v328_v34 = vmul.f32 %v836_v27, %v1093_v0  ;;  %v843_v35 = vunpack.c.l.bf16 %v969_v23 }
  0x28   : > { %982 = vst [vmem:[%s1127_s26 + $0x38] sm:$0xff] %v907_v28   ;;  %v369_v36 = vadd.f32 %v1102_v9, %v326_v29  ;;  %v329_v37 = vmul.f32 %v839_v30, %v1093_v0  ;;  %v330_v38 = vmul.f32 %v840_v31, %v1093_v0  ;;  %v844_v39 = vunpack.c.h.bf16 %v969_v23  ;;  %v975_v31 = vld [vmem:[%s1088_s19 + $0x88] sm:$0xff]  }
  0x29   : > { %v404_v41 = vmax.f32 %v368_v32, 0.0  ;;  %v370_v42 = vadd.f32 %v1102_v9, %v327_v33  ;;  %v371_v43 = vadd.f32 %v1102_v9, %v328_v34  ;;  %v331_v44 = vmul.f32 %v843_v35, %v1093_v0 }
  0x2a   : > { %v405_v45 = vmax.f32 %v369_v36, 0.0  ;;  %v372_v46 = vadd.f32 %v1102_v9, %v329_v37  ;;  %v373_v47 = vadd.f32 %v1102_v9, %v330_v38  ;;  %v332_v48 = vmul.f32 %v844_v39, %v1093_v0 }
  0x2b   : > { %v406_v49 = vmax.f32 %v370_v42, 0.0  ;;  %v407_v50 = vmax.f32 %v371_v43, 0.0  ;;  %v374_v51 = vadd.f32 %v1102_v9, %v331_v44  ;;  %v847_v52 = vunpack.c.l.bf16 %v970_v40 }
  0x2c   : > { %v912_v54 = vpack.c.bf16 %v405_v45, %v404_v41  ;;  %v408_v55 = vmax.f32 %v372_v46, 0.0  ;;  %v409_v56 = vmax.f32 %v373_v47, 0.0  ;;  %v375_v57 = vadd.f32 %v1102_v9, %v332_v48 }
  0x2d   : > { %v917_v59 = vpack.c.bf16 %v407_v50, %v406_v49  ;;  %v410_v60 = vmax.f32 %v374_v51, 0.0  ;;  %v848_v61 = vunpack.c.h.bf16 %v970_v40  ;;  %v333_v62 = vmul.f32 %v847_v52, %v1093_v0 }
  0x2e   : > { %983 = vst [vmem:[%s1127_s26 + $0x40] sm:$0xff] %v912_v54   ;;  %v922_v1 = vpack.c.bf16 %v409_v56, %v408_v55  ;;  %v411_v2 = vmax.f32 %v375_v57, 0.0  ;;  %v851_v3 = vunpack.c.l.bf16 %v971_v53  ;;  %v852_v4 = vunpack.c.h.bf16 %v971_v53 }
  0x2f   : > { %984 = vst [vmem:[%s1127_s26 + $0x48] sm:$0xff] %v917_v59   ;;  %v334_v5 = vmul.f32 %v848_v61, %v1093_v0  ;;  %v376_v6 = vadd.f32 %v1102_v9, %v333_v62  ;;  %v855_v7 = vunpack.c.l.bf16 %v972_v58  ;;  %v856_v8 = vunpack.c.h.bf16 %v972_v58 }
  0x30   : > { %985 = vst [vmem:[%s1127_s26 + $0x50] sm:$0xff] %v922_v1   ;;  %v927_v10 = vpack.c.bf16 %v411_v2, %v410_v60  ;;  %v335_v11 = vmul.f32 %v851_v3, %v1093_v0  ;;  %v336_v12 = vmul.f32 %v852_v4, %v1093_v0  ;;  %v859_v13 = vunpack.c.l.bf16 %v973_v63 }
  0x31   : > { %v377_v15 = vadd.f32 %v1102_v9, %v334_v5  ;;  %v412_v16 = vmax.f32 %v376_v6, 0.0  ;;  %v337_v17 = vmul.f32 %v855_v7, %v1093_v0  ;;  %v338_v18 = vmul.f32 %v856_v8, %v1093_v0 }
  0x32   : > { %986 = vst [vmem:[%s1127_s26 + $0x58] sm:$0xff] %v927_v10   ;;  %v378_v19 = vadd.f32 %v1102_v9, %v335_v11  ;;  %v379_v20 = vadd.f32 %v1102_v9, %v336_v12  ;;  %v860_v21 = vunpack.c.h.bf16 %v973_v63  ;;  %v339_v22 = vmul.f32 %v859_v13, %v1093_v0 }
  0x33   : > { %v413_v23 = vmax.f32 %v377_v15, 0.0  ;;  %v380_v24 = vadd.f32 %v1102_v9, %v337_v17  ;;  %v381_v25 = vadd.f32 %v1102_v9, %v338_v18  ;;  %v863_v26 = vunpack.c.l.bf16 %v974_v14 }
  0x34   : > { %v414_v27 = vmax.f32 %v378_v19, 0.0  ;;  %v415_v28 = vmax.f32 %v379_v20, 0.0  ;;  %v340_v29 = vmul.f32 %v860_v21, %v1093_v0  ;;  %v382_v30 = vadd.f32 %v1102_v9, %v339_v22 }
  0x35   : > { %v932_v32 = vpack.c.bf16 %v413_v23, %v412_v16  ;;  %v416_v33 = vmax.f32 %v380_v24, 0.0  ;;  %v417_v34 = vmax.f32 %v381_v25, 0.0  ;;  %v864_v35 = vunpack.c.h.bf16 %v974_v14 }
  0x36   : > { %v937_v36 = vpack.c.bf16 %v415_v28, %v414_v27  ;;  %v383_v37 = vadd.f32 %v1102_v9, %v340_v29  ;;  %v418_v38 = vmax.f32 %v382_v30, 0.0  ;;  %v341_v39 = vmul.f32 %v863_v26, %v1093_v0 }
  0x37   : > { %987 = vst [vmem:[%s1127_s26 + $0x60] sm:$0xff] %v932_v32   ;;  %v942_v40 = vpack.c.bf16 %v417_v34, %v416_v33  ;;  %v342_v41 = vmul.f32 %v864_v35, %v1093_v0  ;;  %v867_v42 = vunpack.c.l.bf16 %v975_v31  ;;  %v868_v43 = vunpack.c.h.bf16 %v975_v31 }
  0x38   : > { %988 = vst [vmem:[%s1127_s26 + $0x68] sm:$0xff] %v937_v36   ;;  %v419_v44 = vmax.f32 %v383_v37, 0.0  ;;  %v384_v45 = vadd.f32 %v1102_v9, %v341_v39 }
  0x39   : > { %989 = vst [vmem:[%s1127_s26 + $0x70] sm:$0xff] %v942_v40   ;;  %v385_v46 = vadd.f32 %v1102_v9, %v342_v41  ;;  %v343_v47 = vmul.f32 %v867_v42, %v1093_v0  ;;  %v344_v48 = vmul.f32 %v868_v43, %v1093_v0 }
  0x3a   : > { %v947_v49 = vpack.c.bf16 %v419_v44, %v418_v38  ;;  %v420_v50 = vmax.f32 %v384_v45, 0.0 }
  0x3b   : > { %v421_v51 = vmax.f32 %v385_v46, 0.0  ;;  %v386_v52 = vadd.f32 %v1102_v9, %v343_v47  ;;  %v387_v53 = vadd.f32 %v1102_v9, %v344_v48 }
  0x3c   : > { %990 = vst [vmem:[%s1127_s26 + $0x78] sm:$0xff] %v947_v49  }
  0x3d   : > { %v952_v54 = vpack.c.bf16 %v421_v51, %v420_v50  ;;  %v422_v55 = vmax.f32 %v386_v52, 0.0  ;;  %v423_v56 = vmax.f32 %v387_v53, 0.0 }
  0x3f   : > { %991 = vst [vmem:[%s1127_s26 + $0x80] sm:$0xff] %v952_v54   ;;  %v957_v57 = vpack.c.bf16 %v423_v56, %v422_v55 }
  0x41   : > { %992 = vst [vmem:[%s1127_s26 + $0x88] sm:$0xff] %v957_v57  }
  0x42 PF: > { %s13_s14 = sadd.s32 1, %s1040_s14   ;;  %s1228_s12 = smov %s1036_s13 }
  0x43   : > { %p10_p5 = scmp.ge.s32.totalorder %s13_s14, 4   ;;  %s1229_s13 = smov %s1231_s15 }
  0x45   :  { %12 = sbr.rel (!%p10_p5) target bundleno = 2 (0x2), region = 68 }

// kernel: vgg_block_forward.4
= control target key start
LH: loop header
LB: loop body
LE: loop exit
PB: predicated region body
PF: predicated region fallthrough
CT: control target
= control target key end

     0   :  { %s5845_s18 = smov 0   ;;  %s5847_s19 = smov 0   ;;  %s7082_s0 = inlined_call_operand.vmem [shape: bf16[2,342,16], index: 0, kind: input, shape index: {}]   ;;  %s7083_s1 = inlined_call_operand.vmem [shape: bf16[144,64], index: 1, kind: input, shape index: {}]   ;;  %s7084_s2 = inlined_call_operand.vmem [shape: f32[288,1], index: 2, kind: input, shape index: {}]   ;;  %s7085_s3 = inlined_call_operand.vmem [shape: bf16[2,288,64], index: 3, kind: output, shape index: {0}]   ;;  %s7086_s4 = inlined_call_operand.vmem [shape: f32[2,1,64], index: 4, kind: output, shape index: {1}]   ;;  %s7087_s5 = inlined_call_operand.vmem [shape: f32[2,1,64], index: 5, kind: output, shape index: {2}]  }
   0x1   :  { %s5849_s20 = smov 0  }
   0x2 LB: > { %s28_s21 = sadd.s32 1, %s5808_s19  ;;  %p4566_p0 = scmp.ge.s32.totalorder %s5812_s20, 1  ;;  %s5812_s20 = sphi %s5849_s20, %s16_s20   ;;  %s5808_s19 = sphi %s5847_s19, %s7089_s19   ;;  %s5804_s18 = sphi %s5845_s18, %s7088_s18  }
   0x3   : > { %p30_p1 = scmp.ge.s32.totalorder %s28_s21, 2  ;;  %p219_p2 = scmp.lt.s32.totalorder %s5812_s20, 3 }
   0x5   : > { %s7091_s21 = smov (%p30_p1, %s28_s21), 0  ;;  %p220_p3 = pnand %p4566_p0, %p219_p2 }
   0x6   : > { %v5708_v0 = vld [vmem:[%s7083_s1 + $0x20] sm:$0xff] (!%p220_p3)   ;;  %p266_p4 = scmp.lt.s32.totalorder (!%p220_p3), %s5804_s18, 1  ;;  %v5709_v1 = vld [vmem:[%s7083_s1 + $0x8] sm:$0xff] (!%p220_p3)   ;;  %vm430_vm0 = vsmask.f32 (!%p220_p3), 7424  ;;  %vm585_vm1 = vcmask (!%p220_p3), 130048  }
   0x7   : > { %223 = sbr.rel (%p220_p3) target bundleno = 595 (0x253), region = 32  ;;  %5199 = vmatprep.subr.bf16.mxu0 (!%p220_p3), %v5708_v0  ;;  %v5874_v2 = vld [vmem:[%s7083_s1 + $0x28] sm:$0xff] (!%p220_p3)   ;;  %5047 = vmatprep.subr.bf16.mxu1 (!%p220_p3), %v5709_v1  ;;  %v5718_v3 = vld [vmem:[%s7083_s1] sm:$0xff] (!%p220_p3)   ;;  %vm1801_vm2 = vsmask.f32 (!%p220_p3), 6400  ;;  %v5930_v31 = vld [vmem:[%s7083_s1 + $0x10] sm:$0xff] (!%p220_p3)  }
   0x8   : > { %5200 = vmatpush3.bf16.msra.mxu0 (!%p220_p3), %v5708_v0  ;;  %5048 = vmatpush3.bf16.msra.mxu1 (!%p220_p3), %v5709_v1  ;;  %v5960_v56 = vld [vmem:[%s7083_s1 + $0x30] sm:$0xff] (!%p220_p3)   ;;  %vm2251_vm3 = vcmask (!%p220_p3), 1045504   ;;  %vm1042_vm4 = vcmask (!%p220_p3), 1046528   ;;  %vm3010_vm5 = vsmask.f32 (!%p220_p3), 5376  ;;  %vm3460_vm6 = vcmask (!%p220_p3), 1044480  }
   0x9   : > { %5237 = vmatprep.subr.bf16.mxu0 (!%p220_p3), %v5874_v2  ;;  %5085 = vmatprep.subr.bf16.mxu1 (!%p220_p3), %v5718_v3  ;;  %vm4167_vm7 = vcmask (!%p220_p3), 519168   ;;  %vm4204_vm8 = vcmask (!%p220_p3), 523264   ;;  %vm4282_vm9 = vcmask (!%p220_p3), 516096  }
   0xe   : > { %s7093_s18 = smov (!%p266_p4, %s5804_s18), 1 }
   0xf   : > { %s5679_s28 = smul.u32 172, %s7093_s18  ;;  %s288_s22 = scalar_lea.vmem %s7086_s4, %s7093_s18 }
  0x10   : > { %s294_s25 = scalar_lea.vmem %s7087_s5, %s7093_s18 }
  0x11   : > { %s5884_s8 = scalar_lea.vmem %s7082_s0, %s5679_s28 }
  0x12   : > { %v296_v4 = vld [vmem:[%s5884_s8] sm:$0xf]  ;;  %v5888_v5 = vld [vmem:[%s5884_s8 + $0x4] sm:$0xf]  ;;  %v5894_v7 = vld [vmem:[%s5884_s8 + $0x8] sm:$0xff]  }
  0x13   : > { %v5891_v6 = vcombine.low %v296_v4, %v5888_v5  ;;  %v1353_v8 = vld [vmem:[%s5884_s8 + $0x8] sm:$0xe]  ;;  %v5898_v9 = vld [vmem:[%s5884_s8 + $0xc] sm:$0xf]  ;;  %v439_v12 = vshll.u32 %v5894_v7, 16  ;;  %v443_v13 = vshrl.u32 %v5894_v7, 16 }
  0x14   : > { %v5905_v14 = vld [vmem:[%s5884_s8 + $0x10] sm:$0xff]   ;;  %v5911_v16 = vcombine.low %v1353_v8, %v5898_v9  ;;  %v5919_v24 = vld [vmem:[%s5884_s8 + $0x18] sm:$0xff]   ;;  %v5925_v30 = vld [vmem:[%s5884_s8 + $0x20] sm:$0xff]  }
  0x15   : > { %v432_v10 = vshrl.u32 %v5891_v6, 16  ;;  %v434_v11 = vshll.u32 %v5891_v6, 16  ;;  %v5908_v15 = vld [vmem:[%s5884_s8 + $0x10] sm:$0xff]   ;;  %v441_v18 = vrot.slane %v439_v12, 1  ;;  %v1811_v19 = vshrl.u32 %v5905_v14, 16  ;;  %v5922_v29 = vld [vmem:[%s5884_s8 + $0x18] sm:$0xff]  }
  0x16   : > { %v1814_v20 = vshll.u32 %v5905_v14, 16  ;;  %v1803_v21 = vshrl.u32 %v5911_v16, 16  ;;  %v1806_v22 = vshll.u32 %v5911_v16, 16  ;;  %v447_v23 = vshll.u32 %v5908_v15, 16  ;;  %v5940_v44 = vld [vmem:[%s5884_s8 + $0x20] sm:$0xff]   ;;  %v5943_v45 = vld [vmem:[%s5884_s8 + $0x28] sm:$0xff]  }
  0x17   : > { %v436_v17 = vrot.slane %v434_v11, 1  ;;  %v445_v26 = vor.u32 %v443_v13, %v441_v18  ;;  %v1813_v27 = vrot.slane %v1811_v19, 1  ;;  %v1820_v35 = vshrl.u32 %v5919_v24, 16  ;;  %v5949_v50 = vld [vmem:[%s5884_s8 + $0x28] sm:$0xff]   ;;  %v5955_v55 = vld [vmem:[%s5884_s8 + $0x30] sm:$0xff]  }
  0x18   : > { %v1816_v28 = vrot.slane %v1814_v20, 2  ;;  %v1805_v32 = vrot.slane %v1803_v21, 1  ;;  %v1808_v33 = vrot.slane %v1806_v22, 2  ;;  %v449_v34 = vrot.slane %v447_v23, 1  ;;  %v5965_v61 = vld [vmem:[%s5884_s8 + $0x30] sm:$0xff]  }
  0x19   : > { %v437_v25 = vor.u32 %v436_v17, %v432_v10  ;;  %v1823_v38 = vshll.u32 %v5919_v24, 16  ;;  %v451_v39 = vshrl.u32 %v5908_v15, 16  ;;  %v1822_v42 = vrot.slane %v1820_v35, 1 }
  0x1a   : > { %v1817_v37 = vor.u32 %v1816_v28, %v1813_v27  ;;  %v1809_v40 = vor.u32 %v1808_v33, %v1805_v32  ;;  %v450_v41 = vsel %vm430_vm0, %v445_v26, %v449_v34  ;;  %v455_v43 = vshll.u32 %v5922_v29, 16  ;;  %v5987_v28 = vld [vmem:[%s5884_s8 + $0x38] sm:$0xff]  }
  0x1b   : > { %v442_v36 = vsel %vm430_vm0, %v437_v25, %v441_v18  ;;  %v1825_v46 = vrot.slane %v1823_v38, 2  ;;  %v453_v47 = vor.u32 %v451_v39, %v449_v34  ;;  %v1829_v48 = vshrl.u32 %v5925_v30, 16  ;;  %v5978_v18 = vld [vmem:[%s5884_s8 + $0x38] sm:$0xff]   ;;  %v5997_v39 = vld [vmem:[%s5884_s8 + $0x40] sm:$0xff]  }
  0x1c   : > { %5049 = vmatprep.mubr.msk.bf16.mxu1 %vm585_vm1, %v442_v36  ;;  %v1832_v49 = vshll.u32 %v5925_v30, 16  ;;  %v1818_v51 = vsel %vm1801_vm2, %v1809_v40, %v1817_v37  ;;  %v457_v52 = vrot.slane %v455_v43, 1  ;;  %v459_v53 = vshrl.u32 %v5922_v29, 16 }
  0x1d   : > { %5050 = vmatmul.mubr.msk.bf16.vlgmr.msra.gmra.mrb[0].mxu1 %vm585_vm1, %v450_v41  ;;  %v463_v54 = vshll.u32 %v5940_v44, 16  ;;  %5201 = vmatprep.mubr.msk.bf16.mxu0 %vm585_vm1, %v1818_v51  ;;  %v1826_v57 = vor.u32 %v1825_v46, %v1822_v42  ;;  %v1831_v58 = vrot.slane %v1829_v48, 1  ;;  %v1838_v60 = vshrl.u32 %v5943_v45, 16  ;;  %v6002_v46 = vld [vmem:[%s5884_s8 + $0x40] sm:$0xff]  }
  0x1e   : > { %5086 = vmatpush3.bf16.msra.mxu1 %v5718_v3  ;;  %v1834_v59 = vrot.slane %v1832_v49, 2  ;;  %v458_v62 = vsel %vm430_vm0, %v453_v47, %v457_v52  ;;  %v461_v63 = vor.u32 %v459_v53, %v457_v52  ;;  %v1841_v1 = vshll.u32 %v5943_v45, 16 }
  0x1f   : > { %5123 = vmatprep.subr.bf16.mxu1 %v5930_v31  ;;  %v465_v0 = vrot.slane %v463_v54, 1  ;;  %v1827_v3 = vsel %vm1801_vm2, %v1817_v37, %v1826_v57  ;;  %5053 = vmatprep.mubr.msk.bf16.mxu1 %vm585_vm1, %v458_v62  ;;  %v1840_v8 = vrot.slane %v1838_v60, 1  ;;  %v467_v10 = vshrl.u32 %v5940_v44, 16 }
  0x20   : > { %v1835_v4 = vor.u32 %v1834_v59, %v1831_v58  ;;  %5202 = vmatmul.mubr.msk.bf16.vlgmr.msra.gmra.mrb[0].mxu0 %vm585_vm1, %v1827_v3  ;;  %v1843_v12 = vrot.slane %v1841_v1, 2  ;;  %v471_v13 = vshll.u32 %v5949_v50, 16  ;;  %v1847_v17 = vshrl.u32 %v5955_v55, 16  ;;  %v6010_v58 = vld [vmem:[%s5884_s8 + $0x48] sm:$0xff]  }
  0x21   : > { %v466_v11 = vsel %vm430_vm0, %v461_v63, %v465_v0  ;;  %5238 = vmatpush3.bf16.msra.mxu0 %v5874_v2  ;;  %v469_v20 = vor.u32 %v467_v10, %v465_v0  ;;  %v1850_v21 = vshll.u32 %v5955_v55, 16  ;;  %v475_v22 = vshrl.u32 %v5949_v50, 16  ;;  %v6013_v59 = vld [vmem:[%s5884_s8 + $0x48] sm:$0xff]  }
  0x22   : > { %v1836_v19 = vsel %vm1801_vm2, %v1826_v57, %v1835_v4  ;;  %v1844_v23 = vor.u32 %v1843_v12, %v1840_v8  ;;  %v473_v25 = vrot.slane %v471_v13, 1  ;;  %v1849_v26 = vrot.slane %v1847_v17, 1  ;;  %5275 = vmatprep.subr.bf16.mxu0 %v5960_v56 }
  0x23   : > { %5205 = vmatprep.mubr.msk.bf16.mxu0 %vm585_vm1, %v1836_v19  ;;  %v479_v27 = vshll.u32 %v5965_v61, 16  ;;  %v1852_v2 = vrot.slane %v1850_v21, 2  ;;  %v1856_v32 = vshrl.u32 %v5978_v18, 16  ;;  %v1859_v33 = vshll.u32 %v5978_v18, 16  ;;  %v6030_v19 = vld [vmem:[%s5884_s8 + $0x50] sm:$0xff]  }
  0x24   : > { %v483_v34 = vshrl.u32 %v5965_v61, 16  ;;  %v1845_v35 = vsel %vm1801_vm2, %v1835_v4, %v1844_v23  ;;  %v474_v36 = vsel %vm430_vm0, %v469_v20, %v473_v25  ;;  %v477_v37 = vor.u32 %v475_v22, %v473_v25  ;;  %v6022_v4 = vld [vmem:[%s5884_s8 + $0x50] sm:$0xff]   ;;  %v6035_v22 = vld [vmem:[%s5884_s8 + $0x58] sm:$0xff]  }
  0x25   : > { %5054 = vmatmul.mubr.msk.bf16.gmra.mrb[4].mxu1 %vm585_vm1, %v466_v11  ;;  %v481_v38 = vrot.slane %v479_v27, 1  ;;  %v1853_v40 = vor.u32 %v1852_v2, %v1849_v26  ;;  %v1858_v41 = vrot.slane %v1856_v32, 1  ;;  %v1861_v42 = vrot.slane %v1859_v33, 2 }
  0x26   : > { %5057 = vmatprep.mubr.msk.bf16.mxu1 %vm585_vm1, %v474_v36  ;;  %v487_v43 = vshll.u32 %v5987_v28, 16  ;;  %v1865_v49 = vshrl.u32 %v5997_v39, 16  ;;  %v1868_v51 = vshll.u32 %v5997_v39, 16  ;;  %v491_v57 = vshrl.u32 %v5987_v28, 16 }
  0x27   : > { %v482_v47 = vsel %vm430_vm0, %v477_v37, %v481_v38  ;;  %v485_v48 = vor.u32 %v483_v34, %v481_v38  ;;  %v1854_v52 = vsel %vm1801_vm2, %v1844_v23, %v1853_v40  ;;  %v1862_v53 = vor.u32 %v1861_v42, %v1858_v41 }
  0x28   : > { %v489_v54 = vrot.slane %v487_v43, 1  ;;  %5206 = vmatmul.mubr.msk.bf16.gmra.mrb[4].mxu0 %vm585_vm1, %v1845_v35  ;;  %v1867_v60 = vrot.slane %v1865_v49, 1  ;;  %v1870_v62 = vrot.slane %v1868_v51, 2  ;;  %v495_v63 = vshll.u32 %v6002_v46, 16  ;;  %v6040_v35 = vld [vmem:[%s5884_s8 + $0x58] sm:$0xff]  }
  0x29   : > { %v499_v0 = vshrl.u32 %v6002_v46, 16  ;;  %5209 = vmatprep.mubr.msk.bf16.mxu0 %vm585_vm1, %v1854_v52  ;;  %v1874_v3 = vshrl.u32 %v6010_v58, 16  ;;  %v1877_v10 = vshll.u32 %v6010_v58, 16  ;;  %v503_v11 = vshll.u32 %v6013_v59, 16  ;;  %v2245_v51 = vld [vmem:[%s5884_s8 + $0x8] sm:$0xc] }
  0x2a   : > { %v490_v1 = vsel %vm430_vm0, %v485_v48, %v489_v54  ;;  %v1871_v8 = vor.u32 %v1870_v62, %v1867_v60  ;;  %v497_v12 = vrot.slane %v495_v63, 1  ;;  %v1883_v13 = vshrl.u32 %v6022_v4, 16  ;;  %v6054_v52 = vld [vmem:[%s5884_s8 + $0x60] sm:$0xff]  }
  0x2b   : > { %v1886_v17 = vshll.u32 %v6022_v4, 16  ;;  %v1863_v20 = vsel %vm1801_vm2, %v1853_v40, %v1862_v53  ;;  %v493_v21 = vor.u32 %v491_v57, %v489_v54  ;;  %v1876_v23 = vrot.slane %v1874_v3, 1 }
  0x2c   : > { %v1879_v25 = vrot.slane %v1877_v10, 2  ;;  %v501_v26 = vor.u32 %v499_v0, %v497_v12  ;;  %v505_v27 = vrot.slane %v503_v11, 1  ;;  %v1872_v2 = vsel %vm1801_vm2, %v1862_v53, %v1871_v8  ;;  %v6059_v0 = vld [vmem:[%s5884_s8 + $0x68] sm:$0xff]  }
  0x2d   : > { %5058 = vmatmul.mubr.msk.bf16.gmra.mrb[8].mxu1 %vm585_vm1, %v482_v47  ;;  %v1885_v32 = vrot.slane %v1883_v13, 1  ;;  %v1888_v33 = vrot.slane %v1886_v17, 2  ;;  %v511_v34 = vshll.u32 %v6030_v19, 16  ;;  %v498_v36 = vsel %vm430_vm0, %v493_v21, %v497_v12 }
  0x2e   : > { %5061 = vmatprep.mubr.msk.bf16.mxu1 %vm585_vm1, %v490_v1  ;;  %v507_v37 = vshrl.u32 %v6013_v59, 16  ;;  %v1892_v38 = vshrl.u32 %v6035_v22, 16  ;;  %v1895_v40 = vshll.u32 %v6035_v22, 16  ;;  %v1880_v41 = vor.u32 %v1879_v25, %v1876_v23  ;;  %v6076_v25 = vld [vmem:[%s5884_s8 + $0x70] sm:$0xff]  }
  0x2f   : > { %v506_v42 = vsel %vm430_vm0, %v501_v26, %v505_v27  ;;  %v515_v43 = vshrl.u32 %v6030_v19, 16  ;;  %v519_v47 = vshll.u32 %v6040_v35, 16  ;;  %v1889_v48 = vor.u32 %v1888_v33, %v1885_v32  ;;  %v6082_v33 = vld [vmem:[%s5884_s8 + $0x78] sm:$0xff]  }
  0x30   : > { %5210 = vmatmul.mubr.msk.bf16.gmra.mrb[8].mxu0 %vm585_vm1, %v1863_v20  ;;  %v513_v49 = vrot.slane %v511_v34, 1  ;;  %v509_v53 = vor.u32 %v507_v37, %v505_v27  ;;  %v1894_v54 = vrot.slane %v1892_v38, 1  ;;  %v1897_v57 = vrot.slane %v1895_v40, 2 }
  0x31   : > { %5213 = vmatprep.mubr.msk.bf16.mxu0 %vm585_vm1, %v1872_v2  ;;  %v1881_v60 = vsel %vm1801_vm2, %v1871_v8, %v1880_v41  ;;  %v521_v63 = vrot.slane %v519_v47, 1  ;;  %v1890_v1 = vsel %vm1801_vm2, %v1880_v41, %v1889_v48  ;;  %v4704_v3 = vcombine.low %v2245_v51, %v5898_v9 }
  0x32   : > { %v517_v62 = vor.u32 %v515_v43, %v513_v49  ;;  %v527_v10 = vshll.u32 %v6054_v52, 16  ;;  %v514_v11 = vsel %vm430_vm0, %v509_v53, %v513_v49  ;;  %v523_v12 = vshrl.u32 %v6040_v35, 16 }
  0x33   : > { %v6068_v8 = vor.u32 %v1897_v57, %v1894_v54  ;;  %v531_v17 = vshrl.u32 %v6054_v52, 16  ;;  %v535_v20 = vshll.u32 %v6059_v0, 16  ;;  %v2252_v9 = vrot.slane %v4704_v3, 2  ;;  %v6102_v54 = vld [vmem:[%s5884_s8 + $0x88] sm:$0xff]  }
  0x34   : > { %v522_v13 = vsel %vm430_vm0, %v517_v62, %v521_v63  ;;  %v2253_v21 = vrot.slane %v5905_v14, 2  ;;  %v529_v23 = vrot.slane %v527_v10, 1  ;;  %v525_v26 = vor.u32 %v523_v12, %v521_v63 }
  0x35   : > { %5062 = vmatmul.mubr.msk.bf16.gmra.mrb[12].mxu1 %vm585_vm1, %v498_v36  ;;  %v1899_v27 = vsel %vm1801_vm2, %v1889_v48, %v6068_v8  ;;  %v537_v32 = vrot.slane %v535_v20, 1  ;;  %v543_v14 = vshll.u32 %v6076_v25, 16  ;;  %v2255_v37 = vrot.slane %v5919_v24, 2  ;;  %v6097_v48 = vld [vmem:[%s5884_s8 + $0x80] sm:$0xff]  }
  0x36   : > { %5065 = vmatprep.mubr.msk.bf16.mxu1 %vm585_vm1, %v506_v42  ;;  %v533_v2 = vor.u32 %v531_v17, %v529_v23  ;;  %v2254_v34 = vsel %vm2251_vm3, %v2252_v9, %v2253_v21  ;;  %v530_v36 = vsel %vm430_vm0, %v525_v26, %v529_v23  ;;  %v539_v38 = vshrl.u32 %v6059_v0, 16  ;;  %v6125_v17 = vld [vmem:[%s5884_s8 + $0x90] ss:$0 sps:$4 sm:$0x11]  }
  0x37   : > { %v547_v41 = vshrl.u32 %v6076_v25, 16  ;;  %v551_v42 = vshll.u32 %v6082_v33, 16  ;;  %v2257_v43 = vrot.slane %v5925_v30, 2  ;;  %v545_v47 = vrot.slane %v543_v14, 1  ;;  %v6108_v30 = vld [vmem:[%s7083_s1 + $0x38] sm:$0xff]  }
  0x38   : > { %5214 = vmatmul.mubr.msk.bf16.gmra.mrb[12].mxu0 %vm585_vm1, %v1881_v60  ;;  %v538_v40 = vsel %vm430_vm0, %v533_v2, %v537_v32  ;;  %v541_v24 = vor.u32 %v539_v38, %v537_v32  ;;  %v2256_v49 = vsel %vm2251_vm3, %v2253_v21, %v2255_v37  ;;  %v559_v60 = vshll.u32 %v6097_v48, 16 }
  0x39   : > { %5217 = vmatprep.mubr.msk.bf16.mxu0 %vm585_vm1, %v1890_v1  ;;  %v549_v51 = vor.u32 %v547_v41, %v545_v47  ;;  %v553_v53 = vrot.slane %v551_v42, 1  ;;  %v2258_v57 = vsel %vm2251_vm3, %v2255_v37, %v2257_v43  ;;  %v2259_v63 = vrot.slane %v5943_v45, 2  ;;  %v6152_v42 = vld [vmem:[%s5884_s8 + $0x60] sm:$0xff]  }
  0x3a   : > { %v546_v62 = vsel %vm430_vm0, %v541_v24, %v545_v47  ;;  %v555_v1 = vshrl.u32 %v6082_v33, 16  ;;  %v563_v10 = vshrl.u32 %v6097_v48, 16  ;;  %v2261_v12 = vrot.slane %v5955_v55, 2  ;;  %v6175_v24 = vld [vmem:[%s5884_s8 + $0x70] sm:$0xff]  }
  0x3b   : > { %v554_v3 = vsel %vm430_vm0, %v549_v51, %v553_v53  ;;  %v571_v23 = vshrl.u32 %v6102_v54, 16  ;;  %v575_v26 = vshll.u32 %v6125_v17, 16  ;;  %v2265_v32 = vrot.slane %v5997_v39, 2 }
  0x3c   : > { %v557_v45 = vor.u32 %v555_v1, %v553_v53  ;;  %v2262_v21 = vsel %vm2251_vm3, %v2259_v63, %v2261_v12  ;;  %v2269_v39 = vrot.slane %v6022_v4, 2  ;;  %v6160_v4 = vld [vmem:[%s7083_s1 + $0x18] sm:$0xff]   ;;  %v2277_v51 = vrot.slane %v6175_v24, 2 }
  0x3d   : > { %5066 = vmatmul.mubr.msk.bf16.gmra.mrb[16].mxu1 %vm585_vm1, %v514_v11  ;;  %v567_v11 = vshll.u32 %v6102_v54, 16  ;;  %v577_v14 = vrot.slane %v575_v26, 1  ;;  %v6187_v53 = vld [vmem:[%s5884_s8 + $0x78] sm:$0xff]  }
  0x3e   : > { %5069 = vmatprep.mubr.msk.bf16.mxu1 %vm585_vm1, %v522_v13  ;;  %v561_v13 = vrot.slane %v559_v60, 1  ;;  %v6191_v60 = vld [vmem:[%s5884_s8 + $0x80] sm:$0xff]  }
  0x3f   : > { %v569_v9 = vrot.slane %v567_v11, 1  ;;  %v6207_v11 = vld [vmem:[%s5884_s8 + $0x90] sm:$0xff]  }
  0x40   : > { %5218 = vmatmul.mubr.msk.bf16.gmra.mrb[16].mxu0 %vm585_vm1, %v1899_v27  ;;  %v565_v20 = vor.u32 %v563_v10, %v561_v13  ;;  %v562_v55 = vsel %vm430_vm0, %v557_v45, %v561_v13  ;;  %v2263_v27 = vrot.slane %v5978_v18, 2  ;;  %v2267_v18 = vrot.slane %v6010_v58, 2  ;;  %v2562_v45 = vld [vmem:[%s5884_s8 + $0x10] sm:$0xc] }
  0x41   : > { %5239 = vmatprep.mubr.msk.bf16.mxu0 %vm585_vm1, %v2254_v34  ;;  %v573_v34 = vor.u32 %v571_v23, %v569_v9  ;;  %v2271_v58 = vrot.slane %v6035_v22, 2  ;;  %v6170_v22 = vld [vmem:[%s5884_s8 + $0x68] sm:$0xff]   ;;  %v2285_v13 = vrot.slane %v6207_v11, 2  ;;  %v6230_v23 = vld [vmem:[%s5884_s8 + $0x18] sm:$0xff]  }
  0x42   : > { %v570_v2 = vsel %vm430_vm0, %v565_v20, %v569_v9  ;;  %v2266_v37 = vsel %vm2251_vm3, %v2263_v27, %v2265_v32  ;;  %v2270_v41 = vsel %vm2251_vm3, %v2267_v18, %v2269_v39  ;;  %v6223_v9 = vld [vmem:[%s5884_s8 + $0x98] ss:$0 sps:$4 sm:$0x33]  }
  0x43   : > { %v578_v38 = vsel %vm430_vm0, %v573_v34, %v577_v14  ;;  %v2287_v26 = vrot.slane %v6223_v9, 2  ;;  %v6243_v34 = vld [vmem:[%s5884_s8 + $0x20] sm:$0xff]  }
  0x45   : > { %5070 = vmatmul.mubr.msk.bf16.gmra.mrb[20].mxu1 %vm585_vm1, %v530_v36  ;;  %v2264_v36 = vsel %vm2251_vm3, %v2261_v12, %v2263_v27 }
  0x46   : > { %5073 = vmatprep.mubr.msk.bf16.mxu1 %vm585_vm1, %v538_v40  ;;  %v2268_v40 = vsel %vm2251_vm3, %v2265_v32, %v2267_v18  ;;  %v2288_v32 = vsel %vm2251_vm3, %v2285_v13, %v2287_v26 }
  0x48   : > { %5240 = vmatmul.mubr.msk.bf16.vlgmr.msra.gmra.mrb[0].mxu0 %vm585_vm1, %v2256_v49  ;;  %v2275_v49 = vrot.slane %v6170_v22, 2 }
  0x49   : > { %5276 = vmatpush3.bf16.msra.mxu0 %v5960_v56  ;;  %5243 = vmatprep.mubr.msk.bf16.mxu0 %vm585_vm1, %v2258_v57  ;;  %v2260_v56 = vsel %vm2251_vm3, %v2257_v43, %v2259_v63  ;;  %v2272_v43 = vsel %vm2251_vm3, %v2269_v39, %v2271_v58  ;;  %v2281_v63 = vrot.slane %v6191_v60, 2  ;;  %v6259_v39 = vld [vmem:[%s5884_s8 + $0x30] sm:$0xff]  }
  0x4a   : > { %5313 = vmatprep.subr.bf16.mxu0 %v6108_v30  ;;  %v2278_v57 = vsel %vm2251_vm3, %v2275_v49, %v2277_v51 }
  0x4d   : > { %5074 = vmatmul.mubr.msk.bf16.gmra.mrb[24].mxu1 %vm585_vm1, %v546_v62  ;;  %v2279_v62 = vrot.slane %v6187_v53, 2 }
  0x4e   : > { %5077 = vmatprep.mubr.msk.bf16.mxu1 %vm585_vm1, %v554_v3  ;;  %v6203_v3 = vld [vmem:[%s5884_s8 + $0x88] sm:$0xff]  }
  0x4f   : > { %v2280_v1 = vsel %vm2251_vm3, %v2277_v51, %v2279_v62  ;;  %v2282_v10 = vsel %vm2251_vm3, %v2279_v62, %v2281_v63  ;;  %v2283_v12 = vrot.slane %v6203_v3, 2  ;;  %v6286_v51 = vld [vmem:[%s5884_s8 + $0x48] sm:$0xff]  }
  0x50   : > { %5244 = vmatmul.mubr.msk.bf16.gmra.mrb[4].mxu0 %vm585_vm1, %v2260_v56  ;;  %v6217_v56 = vld [vmem:[%s5884_s8 + $0x14] sm:$0xf] }
  0x51   : > { %5247 = vmatprep.mubr.msk.bf16.mxu0 %vm585_vm1, %v2262_v21  ;;  %v2284_v20 = vsel %vm2251_vm3, %v2281_v63, %v2283_v12  ;;  %v2286_v21 = vsel %vm2251_vm3, %v2283_v12, %v2285_v13  ;;  %v2707_v63 = vrot.slane %v6286_v51, 2  ;;  %v1044_v13 = vrot.slane %v5894_v7, 1 }
  0x55   : > { %5078 = vmatmul.mubr.msk.bf16.gmra.mrb[28].mxu1 %vm585_vm1, %v562_v55  ;;  %v6227_v55 = vcombine.low %v2562_v45, %v6217_v56 }
  0x56   : > { %5081 = vmatprep.mubr.msk.bf16.mxu1 %vm585_vm1, %v570_v2  ;;  %v2695_v2 = vrot.slane %v6230_v23, 2 }
  0x57   : > { %v2694_v27 = vrot.slane %v6227_v55, 2 }
  0x58   : > { %5248 = vmatmul.mubr.msk.bf16.gmra.mrb[8].mxu0 %vm585_vm1, %v2264_v36  ;;  %v6247_v36 = vld [vmem:[%s5884_s8 + $0x28] sm:$0xff]  }
  0x59   : > { %5251 = vmatprep.mubr.msk.bf16.mxu0 %vm585_vm1, %v2266_v37  ;;  %v2696_v14 = vsel %vm2251_vm3, %v2694_v27, %v2695_v2  ;;  %v2697_v37 = vrot.slane %v6243_v34, 2 }
  0x5b   : > { %v2698_v18 = vsel %vm2251_vm3, %v2695_v2, %v2697_v37  ;;  %v6318_v2 = vld [vmem:[%s5884_s8 + $0x60] sm:$0xff]  }
  0x5d   : > { %5082 = vmatmul.mubr.msk.bf16.gmra.mrb[32].mxu1 %vm585_vm1, %v578_v38  ;;  %v2699_v38 = vrot.slane %v6247_v36, 2 }
  0x5e   : > { %5087 = vmatprep.mubr.msk.bf16.mxu1 %vm585_vm1, %v5891_v6  ;;  %v2273_v6 = vrot.slane %v6152_v42, 2 }
  0x60   : > { %5252 = vmatmul.mubr.msk.bf16.gmra.mrb[12].mxu0 %vm585_vm1, %v2268_v40  ;;  %v2274_v47 = vsel %vm2251_vm3, %v2271_v58, %v2273_v6  ;;  %v2700_v40 = vsel %vm2251_vm3, %v2697_v37, %v2699_v38  ;;  %v6268_v58 = vld [vmem:[%s7083_s1 + $0x40] sm:$0xff]   ;;  %v6323_v37 = vld [vmem:[%s5884_s8 + $0x68] sm:$0xff]  }
  0x61   : > { %5255 = vmatprep.mubr.msk.bf16.mxu0 %vm585_vm1, %v2270_v41  ;;  %v6263_v41 = vld [vmem:[%s5884_s8 + $0x38] sm:$0xff]  }
  0x65   : > { %5088 = vmatmul.mubr.msk.bf16.vlgmr.msra.gmra.mrb[0].mxu1 %vm585_vm1, %v5894_v7  ;;  %v1046_v7 = vrot.slane %v5908_v15, 1 }
  0x66   : > { %5091 = vmatprep.mubr.msk.bf16.mxu1 %vm585_vm1, %v5908_v15  ;;  %5124 = vmatpush3.bf16.msra.mxu1 %v5930_v31  ;;  %v2276_v31 = vsel %vm2251_vm3, %v2273_v6, %v2275_v49  ;;  %v2701_v6 = vrot.slane %v6259_v39, 2  ;;  %v6282_v49 = vld [vmem:[%s5884_s8 + $0x40] sm:$0xff]  }
  0x67   : > { %5161 = vmatprep.subr.bf16.mxu1 %v6160_v4 }
  0x68   : > { %5256 = vmatmul.mubr.msk.bf16.gmra.mrb[16].mxu0 %vm585_vm1, %v2272_v43  ;;  %v2703_v43 = vrot.slane %v6263_v41, 2 }
  0x69   : > { %5259 = vmatprep.mubr.msk.bf16.mxu0 %vm585_vm1, %v2274_v47  ;;  %v2702_v47 = vsel %vm2251_vm3, %v2699_v38, %v2701_v6  ;;  %v1047_v38 = vsel %vm1042_vm4, %v1044_v13, %v1046_v7 }
  0x6d   : > { %5092 = vmatmul.mubr.msk.bf16.gmra.mrb[4].mxu1 %vm585_vm1, %v5922_v29 }
  0x6e   : > { %5095 = vmatprep.mubr.msk.bf16.mxu1 %vm585_vm1, %v5940_v44 }
  0x70   : > { %5260 = vmatmul.mubr.msk.bf16.gmra.mrb[20].mxu0 %vm585_vm1, %v2276_v31  ;;  %v1036_v31 = vld [vmem:[%s5884_s8] sm:$0xe] }
  0x71   : > { %5263 = vmatprep.mubr.msk.bf16.mxu0 %vm585_vm1, %v2278_v57  ;;  %v2705_v57 = vrot.slane %v6282_v49, 2  ;;  %v4626_v62 = vcombine.low %v1036_v31, %v5888_v5  ;;  %v6305_v5 = vld [vmem:[%s5884_s8 + $0x58] sm:$0xff]   ;;  %v6343_v31 = vld [vmem:[%s7083_s1 + $0x20] sm:$0xff]  }
  0x72   : > { %v2711_v26 = vrot.slane %v6305_v5, 2 }
  0x73   : > { %v1043_v12 = vrot.slane %v4626_v62, 1  ;;  %v2708_v45 = vsel %vm2251_vm3, %v2705_v57, %v2707_v63  ;;  %v6348_v62 = vld [vmem:[%s5884_s8 + $0x78] sm:$0xff]  }
  0x75   : > { %5096 = vmatmul.mubr.msk.bf16.gmra.mrb[8].mxu1 %vm585_vm1, %v5949_v50 }
  0x76   : > { %5099 = vmatprep.mubr.msk.bf16.mxu1 %vm585_vm1, %v5965_v61 }
  0x78   : > { %5264 = vmatmul.mubr.msk.bf16.gmra.mrb[24].mxu0 %vm585_vm1, %v2280_v1  ;;  %v2706_v1 = vsel %vm2251_vm3, %v2703_v43, %v2705_v57 }
  0x79   : > { %5267 = vmatprep.mubr.msk.bf16.mxu0 %vm585_vm1, %v2282_v10  ;;  %v6300_v10 = vld [vmem:[%s5884_s8 + $0x50] sm:$0xff]  }
  0x7d   : > { %5100 = vmatmul.mubr.msk.bf16.gmra.mrb[12].mxu1 %vm585_vm1, %v5987_v28 }
  0x7e   : > { %5103 = vmatprep.mubr.msk.bf16.mxu1 %vm585_vm1, %v6002_v46 }
  0x80   : > { %5268 = vmatmul.mubr.msk.bf16.gmra.mrb[28].mxu0 %vm585_vm1, %v2284_v20  ;;  %v2709_v20 = vrot.slane %v6300_v10, 2 }
  0x81   : > { %5271 = vmatprep.mubr.msk.bf16.mxu0 %vm585_vm1, %v2286_v21  ;;  %v1045_v21 = vsel %vm1042_vm4, %v1043_v12, %v1044_v13  ;;  %v2719_v12 = vrot.slane %v6348_v62, 2  ;;  %v3772_v13 = vld [vmem:[%s7084_s2 + $0x8] sm:$0xff] }
  0x82   : > { %v2710_v27 = vsel %vm2251_vm3, %v2707_v63, %v2709_v20 }
  0x85   : > { %5104 = vmatmul.mubr.msk.bf16.gmra.mrb[16].mxu1 %vm585_vm1, %v6013_v59 }
  0x86   : > { %5107 = vmatprep.mubr.msk.bf16.mxu1 %vm585_vm1, %v6030_v19 }
  0x88   : > { %5272 = vmatmul.mubr.msk.bf16.gmra.mrb[32].mxu0 %vm585_vm1, %v2288_v32  ;;  %v1048_v32 = vrot.slane %v5922_v29, 1  ;;  %v1050_v29 = vrot.slane %v5940_v44, 1 }
  0x89   : > { %5277 = vmatprep.mubr.msk.bf16.mxu0 %vm585_vm1, %v2696_v14  ;;  %v2712_v14 = vsel %vm2251_vm3, %v2709_v20, %v2711_v26 }
  0x8a   : > { %v1049_v15 = vsel %vm1042_vm4, %v1046_v7, %v1048_v32  ;;  %v1051_v44 = vsel %vm1042_vm4, %v1048_v32, %v1050_v29 }
  0x8d   : > { %5108 = vmatmul.mubr.msk.bf16.gmra.mrb[20].mxu1 %vm585_vm1, %v6040_v35 }
  0x8e   : > { %5111 = vmatprep.mubr.msk.bf16.mxu1 %vm585_vm1, %v6054_v52 }
  0x90   : > { %5278 = vmatmul.mubr.msk.bf16.vlgmr.msra.gmra.mrb[0].mxu0 %vm585_vm1, %v2698_v18  ;;  %v2713_v18 = vrot.slane %v6318_v2, 2 }
  0x91   : > { %5314 = vmatpush3.bf16.msra.mxu0 %v6108_v30  ;;  %5281 = vmatprep.mubr.msk.bf16.mxu0 %vm585_vm1, %v2700_v40  ;;  %v2704_v30 = vsel %vm2251_vm3, %v2701_v6, %v2703_v43  ;;  %v2715_v40 = vrot.slane %v6323_v37, 2  ;;  %v5814_v6 = vmov 0  }
  0x92   : > { %5351 = vmatprep.subr.bf16.mxu0 %v6268_v58  ;;  %5706 = vset.pattern.permute.xlu0 %v5814_v6  ;;  %v2714_v43 = vsel %vm2251_vm3, %v2711_v26, %v2713_v18  ;;  %v1056_v26 = vrot.slane %v5987_v28, 1 }
  0x93   : > { %5707 = vset.pattern.permute.xlu1 %v5814_v6  ;;  %v2716_v57 = vsel %vm2251_vm3, %v2713_v18, %v2715_v40  ;;  %v1058_v6 = vrot.slane %v6002_v46, 1  ;;  %v3778_v46 = vld [vmem:[%s7084_s2 + $0x38] sm:$0xff] }
  0x95   : > { %5112 = vmatmul.mubr.msk.bf16.gmra.mrb[24].mxu1 %vm585_vm1, %v6059_v0 }
  0x96   : > { %5115 = vmatprep.mubr.msk.bf16.mxu1 %vm585_vm1, %v6076_v25 }
  0x98   : > { %5282 = vmatmul.mubr.msk.bf16.gmra.mrb[4].mxu0 %vm585_vm1, %v2702_v47  ;;  %v6337_v47 = vld [vmem:[%s5884_s8 + $0x70] sm:$0xff]  }
  0x99   : > { %5285 = vmatprep.mubr.msk.bf16.mxu0 %vm585_vm1, %v2704_v30  ;;  %v1052_v30 = vrot.slane %v5949_v50, 1  ;;  %v3771_v50 = vld [vmem:[%s7084_s2] sm:$0xff]  ;;  %v2717_v63 = vrot.slane %v6337_v47, 2 }
  0x9a   : > { %3809 = vperm.xlu0 %5706, %v3771_v50   ;;  %v1059_v50 = vsel %vm1042_vm4, %v1056_v26, %v1058_v6 }
  0x9b   : > { %v2718_v20 = vsel %vm2251_vm3, %v2715_v40, %v2717_v63  ;;  %v2720_v7 = vsel %vm2251_vm3, %v2717_v63, %v2719_v12  ;;  %v3777_v40 = vld [vmem:[%s7084_s2 + $0x30] sm:$0xff] }
  0x9d   : > { %5116 = vmatmul.mubr.msk.bf16.gmra.mrb[28].mxu1 %vm585_vm1, %v6082_v33 }
  0x9e   : > { %5119 = vmatprep.mubr.msk.bf16.mxu1 %vm585_vm1, %v6097_v48  ;;  %3814 = vperm.xlu0 %5706, %v3772_v13   ;;  %v3015_v13 = vshll.u32 %v6227_v55, 16 }
  0xa0   : > { %5286 = vmatmul.mubr.msk.bf16.gmra.mrb[8].mxu0 %vm585_vm1, %v2706_v1  ;;  %v1053_v1 = vsel %vm1042_vm4, %v1050_v29, %v1052_v30 }
  0xa1   : > { %5289 = vmatprep.mubr.msk.bf16.mxu0 %vm585_vm1, %v2708_v45  ;;  %v1054_v45 = vrot.slane %v5965_v61, 1  ;;  %v3774_v61 = vld [vmem:[%s7084_s2 + $0x18] sm:$0xff] }
  0xa3   : > { %v1055_v32 = vsel %vm1042_vm4, %v1052_v30, %v1054_v45  ;;  %v1060_v30 = vrot.slane %v6013_v59, 1 }
  0xa5   : > { %5120 = vmatmul.mubr.msk.bf16.gmra.mrb[32].mxu1 %vm585_vm1, %v6102_v54  ;;  %v1061_v63 = vsel %vm1042_vm4, %v1058_v6, %v1060_v30 }
  0xa6   : > { %5125 = vmatprep.mubr.msk.bf16.mxu1 %vm585_vm1, %v1045_v21  ;;  %v6370_v21 = vld [vmem:[%s5884_s8 + $0x80] sm:$0xff]  }
  0xa7   : > { %v2721_v28 = vrot.slane %v6370_v21, 2 }
  0xa8   : > { %5290 = vmatmul.mubr.msk.bf16.gmra.mrb[12].mxu0 %vm585_vm1, %v2710_v27  ;;  %v6375_v27 = vld [vmem:[%s5884_s8 + $0x88] sm:$0xff]  }
  0xa9   : > { %5293 = vmatprep.mubr.msk.bf16.mxu0 %vm585_vm1, %v2712_v14  ;;  %v3775_v14 = vld [vmem:[%s7084_s2 + $0x20] sm:$0xff]  ;;  %v2723_v18 = vrot.slane %v6375_v27, 2  ;;  %v2722_v29 = vsel %vm2251_vm3, %v2719_v12, %v2721_v28  ;;  %v3012_v12 = vshrl.u32 %v6227_v55, 16 }
  0xaa   : > { %3829 = vperm.xlu0 %5706, %v3775_v14   ;;  %v5774_v14 = vld [vmem:[%s5884_s8 + $0xa0] ss:$0 sps:$4 sm:$0x33]  }
  0xad   : > { %5126 = vmatmul.mubr.msk.bf16.vlgmr.msra.gmra.mrb[0].mxu1 %vm585_vm1, %v1047_v38  ;;  %v1057_v38 = vsel %vm1042_vm4, %v1054_v45, %v1056_v26  ;;  %v3020_v45 = vshrl.u32 %v6230_v23, 16  ;;  %v3780_v26 = vld [vmem:[%s7084_s2 + $0x48] sm:$0xff] }
  0xae   : > { %5129 = vmatprep.mubr.msk.bf16.mxu1 %vm585_vm1, %v1049_v15  ;;  %5162 = vmatpush3.bf16.msra.mxu1 %v6160_v4  ;;  %v3773_v4 = vld [vmem:[%s7084_s2 + $0x10] sm:$0xff]  ;;  %v3776_v15 = vld [vmem:[%s7084_s2 + $0x28] sm:$0xff] }
  0xaf   : > { %5389 = vmatprep.subr.bf16.mxu1 %v6343_v31  ;;  %3819 = vperm.xlu1 %5707, %v3773_v4   ;;  %v3779_v4 = vld [vmem:[%s7084_s2 + $0x40] sm:$0xff] }
  0xb0   : > { %5294 = vmatmul.mubr.msk.bf16.gmra.mrb[16].mxu0 %vm585_vm1, %v2714_v43  ;;  %v6400_v43 = vld [vmem:[%s5884_s8 + $0x90] sm:$0xff]   ;;  %3839 = vperm.xlu0 %5706, %v3777_v40   ;;  %v3022_v40 = vrot.slane %v3020_v45, 2  ;;  %v1066_v45 = vrot.slane %v6054_v52, 1  ;;  %v3786_v52 = vld [vmem:[%s7084_s2 + $0x78] sm:$0xff] }
  0xb1   : > { %5297 = vmatprep.mubr.msk.bf16.mxu0 %vm585_vm1, %v2716_v57  ;;  %v6404_v57 = vld [vmem:[%s5884_s8 + $0x98] sm:$0xff]   ;;  %v2725_v59 = vrot.slane %v6400_v43, 2 }
  0xb3   : > { %3824 = vperm.xlu1 %5707, %v3774_v61   ;;  %v2726_v55 = vsel %vm2251_vm3, %v2723_v18, %v2725_v59 }
  0xb4   : > { %3849 = vperm.xlu0 %5706, %v3779_v4  }
  0xb5   : > { %5130 = vmatmul.mubr.msk.bf16.gmra.mrb[4].mxu1 %vm585_vm1, %v1051_v44  ;;  %v2724_v44 = vsel %vm2251_vm3, %v2721_v28, %v2723_v18  ;;  %v1064_v28 = vrot.slane %v6040_v35, 1  ;;  %v3783_v18 = vld [vmem:[%s7084_s2 + $0x60] sm:$0xff]  ;;  %v2729_v35 = vrot.slane %v5774_v14, 2 }
  0xb6   : > { %5133 = vmatprep.mubr.msk.bf16.mxu1 %vm585_vm1, %v1053_v1  ;;  %v2727_v1 = vrot.slane %v6404_v57, 2 }
  0xb7   : > { %3834 = vperm.xlu1 %5707, %v3776_v15   ;;  %v3017_v15 = vrot.slane %v3015_v13, 3  ;;  %v3785_v13 = vld [vmem:[%s7084_s2 + $0x70] sm:$0xff] }
  0xb8   : > { %5298 = vmatmul.mubr.msk.bf16.gmra.mrb[20].mxu0 %vm585_vm1, %v2718_v20  ;;  %v3023_v20 = vshll.u32 %v6230_v23, 16  ;;  %v2728_v61 = vsel %vm2251_vm3, %v2725_v59, %v2727_v1  ;;  %v3038_v59 = vshrl.u32 %v6247_v36, 16 }
  0xb9   : > { %5301 = vmatprep.mubr.msk.bf16.mxu0 %vm585_vm1, %v2720_v7  ;;  %v3781_v7 = vld [vmem:[%s7084_s2 + $0x50] sm:$0xff] }
  0xba   : > { %v3025_v6 = vrot.slane %v3023_v20, 3  ;;  %3859 = vperm.xlu0 %5706, %v3781_v7   ;;  %v2730_v20 = vsel %vm2251_vm3, %v2727_v1, %v2729_v35  ;;  %v3787_v1 = vld [vmem:[%s7084_s2 + $0x80] sm:$0xff]  ;;  %v3789_v35 = vld [vmem:[%s7084_s2 + $0x90] sm:$0xff] }
  0xbb   : > { %3844 = vperm.xlu1 %5707, %v3778_v46   ;;  %v3032_v46 = vshll.u32 %v6243_v34, 16 }
  0xbd   : > { %5134 = vmatmul.mubr.msk.bf16.gmra.mrb[8].mxu1 %vm585_vm1, %v1055_v32  ;;  %v1062_v32 = vrot.slane %v6030_v19, 1  ;;  %v3782_v19 = vld [vmem:[%s7084_s2 + $0x58] sm:$0xff]  ;;  %v3034_v7 = vrot.slane %v3032_v46, 3 }
  0xbe   : > { %5137 = vmatprep.mubr.msk.bf16.mxu1 %vm585_vm1, %v1057_v38  ;;  %v3014_v38 = vrot.slane %v3012_v12, 2  ;;  %3869 = vperm.xlu0 %5706, %v3783_v18   ;;  %v3784_v12 = vld [vmem:[%s7084_s2 + $0x68] sm:$0xff] }
  0xbf   : > { %3854 = vperm.xlu1 %5707, %v3780_v26   ;;  %v3788_v18 = vld [vmem:[%s7084_s2 + $0x88] sm:$0xff] }
  0xc0   : > { %5302 = vmatmul.mubr.msk.bf16.gmra.mrb[24].mxu0 %vm585_vm1, %v2722_v29  ;;  %v1063_v29 = vsel %vm1042_vm4, %v1060_v30, %v1062_v32  ;;  %v3018_v4 = vor.u32 %v3017_v15, %v3014_v38  ;;  %v3026_v30 = vor.u32 %v3025_v6, %v3022_v40  ;;  %v1067_v38 = vsel %vm1042_vm4, %v1064_v28, %v1066_v45 }
  0xc1   : > { %5305 = vmatprep.mubr.msk.bf16.mxu0 %vm585_vm1, %v2724_v44  ;;  %v1065_v44 = vsel %vm1042_vm4, %v1062_v32, %v1064_v28  ;;  %v1068_v32 = vrot.slane %v6059_v0, 1  ;;  %v3047_v40 = vshrl.u32 %v6259_v39, 16  ;;  %v3050_v6 = vshll.u32 %v6259_v39, 16 }
  0xc2   : > { %3879 = vperm.xlu0 %5706, %v3785_v13   ;;  %v3056_v28 = vshrl.u32 %v6263_v41, 16 }
  0xc3   : > { %3864 = vperm.xlu1 %5707, %v3782_v19   ;;  %v1069_v15 = vsel %vm1042_vm4, %v1066_v45, %v1068_v32  ;;  %v3059_v19 = vshll.u32 %v6263_v41, 16  ;;  %v3049_v46 = vrot.slane %v3047_v40, 2 }
  0xc5   : > { %5138 = vmatmul.mubr.msk.bf16.gmra.mrb[12].mxu1 %vm585_vm1, %v1059_v50  ;;  %v3029_v50 = vshrl.u32 %v6243_v34, 16  ;;  %v3061_v13 = vrot.slane %v3059_v19, 3 }
  0xc6   : > { %5141 = vmatprep.mubr.msk.bf16.mxu1 %vm585_vm1, %v1061_v63  ;;  %v3041_v63 = vshll.u32 %v6247_v36, 16  ;;  %3889 = vperm.xlu0 %5706, %v3787_v1  }
  0xc7   : > { %v3031_v26 = vrot.slane %v3029_v50, 2  ;;  %3874 = vperm.xlu1 %5707, %v3784_v12   ;;  %v3058_v12 = vrot.slane %v3056_v28, 2 }
  0xc8   : > { %5306 = vmatmul.mubr.msk.bf16.gmra.mrb[28].mxu0 %vm585_vm1, %v2726_v55  ;;  %v3027_v55 = vsel %vm3010_vm5, %v3018_v4, %v3026_v30  ;;  %v3043_v14 = vrot.slane %v3041_v63, 3  ;;  %v3052_v4 = vrot.slane %v3050_v6, 3 }
  0xc9   : > { %5309 = vmatprep.mubr.msk.bf16.mxu0 %vm585_vm1, %v2728_v61  ;;  %v3040_v61 = vrot.slane %v3038_v59, 2  ;;  %v3035_v0 = vor.u32 %v3034_v7, %v3031_v26  ;;  %v1072_v59 = vrot.slane %v6082_v33, 1  ;;  %v3065_v26 = vshrl.u32 %v6282_v49, 16 }
  0xca   : > { %3899 = vperm.xlu0 %5706, %v3789_v35   ;;  %v3053_v33 = vor.u32 %v3052_v4, %v3049_v46  ;;  %v3068_v7 = vshll.u32 %v6282_v49, 16  ;;  %v3092_v46 = vshrl.u32 %v6305_v5, 16  ;;  %v3095_v4 = vshll.u32 %v6305_v5, 16 }
  0xcb   : > { %3884 = vperm.xlu1 %5707, %v3786_v52   ;;  %v3036_v50 = vsel %vm3010_vm5, %v3026_v30, %v3035_v0  ;;  %v3791_v30 = vld [vmem:[%s7084_s2 + $0xa0] sm:$0xff]  ;;  %v3067_v1 = vrot.slane %v3065_v26, 2 }
  0xcd   : > { %5142 = vmatmul.mubr.msk.bf16.gmra.mrb[16].mxu1 %vm585_vm1, %v1063_v29  ;;  %v3044_v29 = vor.u32 %v3043_v14, %v3040_v61  ;;  %v3077_v61 = vshll.u32 %v6286_v51, 16  ;;  %v3793_v14 = vld [vmem:[%s7084_s2 + $0xb0] sm:$0xff] }
  0xce   : > { %5145 = vmatprep.mubr.msk.bf16.mxu1 %vm585_vm1, %v1065_v44  ;;  %v1070_v44 = vrot.slane %v6076_v25, 1  ;;  %v3790_v25 = vld [vmem:[%s7084_s2 + $0x98] sm:$0xff]  ;;  %3909 = vperm.xlu0 %5706, %v3791_v30   ;;  %v1485_v30 = vrot.slane %v5911_v16, 1 }
  0xcf   : > { %3894 = vperm.xlu1 %5707, %v3788_v18   ;;  %v3045_v63 = vsel %vm3010_vm5, %v3035_v0, %v3044_v29  ;;  %v3054_v52 = vsel %vm3010_vm5, %v3044_v29, %v3053_v33  ;;  %v3070_v0 = vrot.slane %v3068_v7, 3  ;;  %v3079_v28 = vrot.slane %v3077_v61, 3  ;;  %v3798_v61 = vld [vmem:[%s7084_s2 + $0xd8] sm:$0xff] }
  0xd0   : > { %5310 = vmatmul.mubr.msk.bf16.gmra.mrb[32].mxu0 %vm585_vm1, %v2730_v20  ;;  %v1071_v45 = vsel %vm1042_vm4, %v1068_v32, %v1070_v44  ;;  %v1073_v20 = vsel %vm1042_vm4, %v1070_v44, %v1072_v59  ;;  %v3062_v32 = vor.u32 %v3061_v13, %v3058_v12  ;;  %v3083_v18 = vshrl.u32 %v6300_v10, 16 }
  0xd1   : > { %5315 = vmatprep.mubr.msk.bf16.mxu0 %vm585_vm1, %v3027_v55  ;;  %v3074_v55 = vshrl.u32 %v6286_v51, 16  ;;  %v3071_v29 = vor.u32 %v3070_v0, %v3067_v1  ;;  %v3086_v44 = vshll.u32 %v6300_v10, 16  ;;  %v1078_v12 = vrot.slane %v6125_v17, 1  ;;  %v3799_v17 = vld [vmem:[%s7084_s2 + $0xe0] sm:$0xff] }
  0xd2   : > { %v3063_v40 = vsel %vm3010_vm5, %v3053_v33, %v3062_v32  ;;  %3919 = vperm.xlu0 %5706, %v3793_v14   ;;  %v3085_v13 = vrot.slane %v3083_v18, 2  ;;  %v5780_v33 = vld [vmem:[%s5884_s8 + $0x10] sm:$0xff]   ;;  %v3094_v7 = vrot.slane %v3092_v46, 2  ;;  %v3101_v14 = vshrl.u32 %v6318_v2, 16 }
  0xd3   : > { %3904 = vperm.xlu1 %5707, %v3790_v25   ;;  %v3076_v6 = vrot.slane %v3074_v55, 2  ;;  %v3088_v25 = vrot.slane %v3086_v44, 3  ;;  %v3097_v55 = vrot.slane %v3095_v4, 3  ;;  %v3110_v1 = vshrl.u32 %v6323_v37, 16  ;;  %v3802_v4 = vld [vmem:[%s7084_s2 + $0xf8] sm:$0xff] }
  0xd4   : > { %v3113_v0 = vshll.u32 %v6323_v37, 16  ;;  %v3103_v18 = vrot.slane %v3101_v14, 2 }
  0xd5   : > { %5146 = vmatmul.mubr.msk.bf16.gmra.mrb[20].mxu1 %vm585_vm1, %v1067_v38  ;;  %v1074_v38 = vrot.slane %v6097_v48, 1  ;;  %v3794_v48 = vld [vmem:[%s7084_s2 + $0xb8] sm:$0xff]  ;;  %v3112_v44 = vrot.slane %v3110_v1, 2 }
  0xd6   : > { %5149 = vmatprep.mubr.msk.bf16.mxu1 %vm585_vm1, %v1069_v15  ;;  %v1076_v15 = vrot.slane %v6102_v54, 1  ;;  %v3795_v54 = vld [vmem:[%s7084_s2 + $0xc0] sm:$0xff]  ;;  %v3115_v46 = vrot.slane %v3113_v0, 3  ;;  %v3806_v0 = vld [vmem:[%s7084_s2 + $0x118] sm:$0xff] }
  0xd7   : > { %v1075_v19 = vsel %vm1042_vm4, %v1072_v59, %v1074_v38  ;;  %3929 = vperm.xlu0 %5706, %v3795_v54   ;;  %v3796_v59 = vld [vmem:[%s7084_s2 + $0xc8] sm:$0xff]  ;;  %v5782_v54 = vld [vmem:[%s5884_s8 + $0x20] sm:$0xff]  }
  0xd8   : > { %5316 = vmatmul.mubr.msk.bf16.vlgmr.msra.gmra.mrb[0].mxu0 %vm585_vm1, %v3036_v50  ;;  %v1077_v35 = vsel %vm1042_vm4, %v1074_v38, %v1076_v15  ;;  %v3080_v50 = vor.u32 %v3079_v28, %v3076_v6  ;;  %v1079_v16 = vsel %vm1042_vm4, %v1076_v15, %v1078_v12  ;;  %v3104_v38 = vshll.u32 %v6318_v2, 16  ;;  %v3800_v15 = vld [vmem:[%s7084_s2 + $0xe8] sm:$0xff]  ;;  %v5781_v6 = vld [vmem:[%s5884_s8 + $0x18] sm:$0xff]  }
  0xd9   : > { %5352 = vmatpush3.bf16.msra.mxu0 %v6268_v58  ;;  %5319 = vmatprep.mubr.msk.bf16.mxu0 %vm585_vm1, %v3045_v63  ;;  %v3792_v58 = vld [vmem:[%s7084_s2 + $0xa8] sm:$0xff]  ;;  %v3797_v63 = vld [vmem:[%s7084_s2 + $0xd0] sm:$0xff]  ;;  %v1488_v28 = vrot.slane %v5781_v6, 1  ;;  %v3140_v6 = vshll.u32 %v6370_v21, 16 }
  0xda   : > { %3914 = vperm.xlu1 %5707, %v3792_v58   ;;  %v3081_v26 = vsel %vm3010_vm5, %v3071_v29, %v3080_v50 }
  0xdb   : > { %3939 = vperm.xlu0 %5706, %v3797_v63  }
  0xdd   : > { %5150 = vmatmul.mubr.msk.bf16.gmra.mrb[24].mxu1 %vm585_vm1, %v1071_v45  ;;  %v3072_v45 = vsel %vm3010_vm5, %v3062_v32, %v3071_v29  ;;  %v3089_v32 = vor.u32 %v3088_v25, %v3085_v13  ;;  %v1490_v29 = vrot.slane %v5782_v54, 1  ;;  %v3119_v13 = vshrl.u32 %v6337_v47, 16 }
  0xde   : > { %5153 = vmatprep.mubr.msk.bf16.mxu1 %vm585_vm1, %v1073_v20  ;;  %3924 = vperm.xlu1 %5707, %v3794_v48   ;;  %v1486_v20 = vrot.slane %v5780_v33, 1  ;;  %v3106_v48 = vrot.slane %v3104_v38, 3  ;;  %v3116_v25 = vor.u32 %v3115_v46, %v3112_v44  ;;  %v3131_v33 = vshll.u32 %v6348_v62, 16  ;;  %v5786_v46 = vld [vmem:[%s5884_s8 + $0x40] sm:$0xff]  }
  0xdf   : > { %3949 = vperm.xlu0 %5706, %v3799_v17   ;;  %v1491_v12 = vsel %vm1042_vm4, %v1488_v28, %v1490_v29  ;;  %v3121_v17 = vrot.slane %v3119_v13, 2  ;;  %v3142_v44 = vrot.slane %v3140_v6, 3 }
  0xe0   : > { %5320 = vmatmul.mubr.msk.bf16.gmra.mrb[4].mxu0 %vm585_vm1, %v3054_v52  ;;  %v1487_v58 = vsel %vm1042_vm4, %v1485_v30, %v1486_v20  ;;  %v3098_v52 = vor.u32 %v3097_v55, %v3094_v7  ;;  %v3107_v63 = vor.u32 %v3106_v48, %v3103_v18  ;;  %v3128_v30 = vshrl.u32 %v6348_v62, 16  ;;  %v5783_v7 = vld [vmem:[%s5884_s8 + $0x28] sm:$0xff]   ;;  %v5785_v48 = vld [vmem:[%s5884_s8 + $0x38] sm:$0xff]  }
  0xe1   : > { %5323 = vmatprep.mubr.msk.bf16.mxu0 %vm585_vm1, %v3063_v40  ;;  %v3801_v40 = vld [vmem:[%s7084_s2 + $0xf0] sm:$0xff]  ;;  %v1492_v55 = vrot.slane %v5783_v7, 1  ;;  %v3133_v1 = vrot.slane %v3131_v33, 3  ;;  %v3149_v18 = vshll.u32 %v6375_v27, 16  ;;  %v1496_v54 = vrot.slane %v5785_v48, 1  ;;  %v5787_v7 = vld [vmem:[%s5884_s8 + $0x48] sm:$0xff]  }
  0xe2   : > { %3934 = vperm.xlu1 %5707, %v3796_v59   ;;  %v3803_v59 = vld [vmem:[%s7084_s2 + $0x100] sm:$0xff]  ;;  %v3117_v14 = vsel %vm3010_vm5, %v3107_v63, %v3116_v25  ;;  %v3130_v38 = vrot.slane %v3128_v30, 2  ;;  %v3158_v30 = vshll.u32 %v6400_v43, 16 }
  0xe3   : > { %3959 = vperm.xlu0 %5706, %v3801_v40   ;;  %v3137_v40 = vshrl.u32 %v6370_v21, 16 }
  0xe5   : > { %5154 = vmatmul.mubr.msk.bf16.gmra.mrb[28].mxu1 %vm585_vm1, %v1075_v19  ;;  %v3090_v19 = vsel %vm3010_vm5, %v3080_v50, %v3089_v32  ;;  %v1489_v50 = vsel %vm1042_vm4, %v1486_v20, %v1488_v28  ;;  %v3804_v20 = vld [vmem:[%s7084_s2 + $0x108] sm:$0xff]  ;;  %v3134_v28 = vor.u32 %v3133_v1, %v3130_v38 }
  0xe6   : > { %5157 = vmatprep.mubr.msk.bf16.mxu1 %vm585_vm1, %v1077_v35  ;;  %3944 = vperm.xlu1 %5707, %v3798_v61   ;;  %v3099_v35 = vsel %vm3010_vm5, %v3089_v32, %v3098_v52  ;;  %v3108_v61 = vsel %vm3010_vm5, %v3098_v52, %v3107_v63  ;;  %v5784_v32 = vld [vmem:[%s5884_s8 + $0x30] sm:$0xff]   ;;  %v3151_v63 = vrot.slane %v3149_v18, 3  ;;  %v5789_v18 = vld [vmem:[%s5884_s8 + $0x58] sm:$0xff]  }
  0xe7   : > { %3969 = vperm.xlu0 %5706, %v3803_v59   ;;  %v1504_v48 = vrot.slane %v5789_v18, 1  ;;  %v1910_v18 = vshrl.u32 %v6170_v22, 16 }
  0xe8   : > { %5324 = vmatmul.mubr.msk.bf16.gmra.mrb[8].mxu0 %vm585_vm1, %v3072_v45  ;;  %v3122_v45 = vshll.u32 %v6337_v47, 16 }
  0xe9   : > { %5327 = vmatprep.mubr.msk.bf16.mxu0 %vm585_vm1, %v3081_v26  ;;  %v3805_v26 = vld [vmem:[%s7084_s2 + $0x110] sm:$0xff] }
  0xea   : > { %3954 = vperm.xlu1 %5707, %v3800_v15  }
  0xeb   : > { %3979 = vperm.xlu0 %5706, %v3805_v26   ;;  %v3167_v26 = vshll.u32 %v6404_v57, 16 }
  0xed   : > { %5158 = vmatmul.mubr.msk.bf16.gmra.mrb[32].mxu1 %vm585_vm1, %v1079_v16  ;;  %v3124_v16 = vrot.slane %v3122_v45, 3 }
  0xee   : > { %5163 = vmatprep.mubr.msk.bf16.mxu1 %vm585_vm1, %v1487_v58  ;;  %3964 = vperm.xlu1 %5707, %v3802_v4   ;;  %v1494_v58 = vrot.slane %v5784_v32, 1  ;;  %v1498_v4 = vrot.slane %v5786_v46, 1  ;;  %v5788_v32 = vld [vmem:[%s5884_s8 + $0x50] sm:$0xff]  }
  0xef   : > { %v3125_v52 = vor.u32 %v3124_v16, %v3121_v17  ;;  %v3160_v16 = vrot.slane %v3158_v30, 3 }
  0xf0   : > { %5328 = vmatmul.mubr.msk.bf16.gmra.mrb[12].mxu0 %vm585_vm1, %v3090_v19  ;;  %v1495_v15 = vsel %vm1042_vm4, %v1492_v55, %v1494_v58  ;;  %v3146_v19 = vshrl.u32 %v6375_v27, 16  ;;  %v1499_v45 = vsel %vm1042_vm4, %v1496_v54, %v1498_v4 }
  0xf1   : > { %5331 = vmatprep.mubr.msk.bf16.mxu0 %vm585_vm1, %v3099_v35  ;;  %v3139_v35 = vrot.slane %v3137_v40, 2  ;;  %v3135_v59 = vsel %vm3010_vm5, %v3125_v52, %v3134_v28 }
  0xf2   : > { %3974 = vperm.xlu1 %5707, %v3804_v20   ;;  %v3164_v20 = vshrl.u32 %v6404_v57, 16 }
  0xf3   : > { %v3143_v13 = vor.u32 %v3142_v44, %v3139_v35  ;;  %v1506_v44 = vrot.slane %v6152_v42, 1 }
  0xf4   : > { %v3166_v1 = vrot.slane %v3164_v20, 2 }
  0xf5   : > { %5164 = vmatmul.mubr.msk.bf16.vlgmr.msra.gmra.mrb[0].mxu1 %vm585_vm1, %v1489_v50  ;;  %v3148_v50 = vrot.slane %v3146_v19, 2  ;;  %v3454_v19 = vld [vmem:[%s5884_s8 + $0x10] sm:$0x8] }
  0xf6   : > { %5167 = vmatprep.mubr.msk.bf16.mxu1 %vm585_vm1, %v1491_v12  ;;  %5390 = vmatpush3.bf16.msra.mxu1 %v6343_v31  ;;  %v1493_v31 = vsel %vm1042_vm4, %v1490_v29, %v1492_v55  ;;  %v3126_v29 = vsel %vm3010_vm5, %v3116_v25, %v3125_v52  ;;  %v1497_v12 = vsel %vm1042_vm4, %v1494_v58, %v1496_v54  ;;  %v3155_v25 = vshrl.u32 %v6400_v43, 16 }
  0xf7   : > { %3984 = vperm.xlu1 %5707, %v3806_v0   ;;  %v3152_v33 = vor.u32 %v3151_v63, %v3148_v50  ;;  %v1500_v55 = vrot.slane %v5787_v7, 1  ;;  %v1502_v58 = vrot.slane %v5788_v32, 1  ;;  %v3169_v0 = vrot.slane %v3167_v26, 3 }
  0xf8   : > { %5332 = vmatmul.mubr.msk.bf16.gmra.mrb[16].mxu0 %vm585_vm1, %v3108_v61  ;;  %v3144_v61 = vsel %vm3010_vm5, %v3134_v28, %v3143_v13  ;;  %v3157_v17 = vrot.slane %v3155_v25, 2  ;;  %v1507_v63 = vsel %vm1042_vm4, %v1504_v48, %v1506_v44  ;;  %v1510_v25 = vrot.slane %v6175_v24, 1 }
  0xf9   : > { %5335 = vmatprep.mubr.msk.bf16.mxu0 %vm585_vm1, %v3117_v14  ;;  %v6626_v14 = vld [vmem:[%s5884_s8 + $0xa0] ss:$0 sps:$4 sm:$0x77]   ;;  %v3153_v38 = vsel %vm3010_vm5, %v3143_v13, %v3152_v33  ;;  %v3170_v28 = vor.u32 %v3169_v0, %v3166_v1  ;;  %v3462_v13 = vrot.slane %v6230_v23, 3  ;;  %v3464_v23 = vrot.slane %v6243_v34, 3 }
  0xfa   : > { %v3161_v52 = vor.u32 %v3160_v16, %v3157_v17  ;;  %v3173_v40 = vshrl.u32 %v6626_v14, 16  ;;  %v3176_v6 = vshll.u32 %v6626_v14, 16  ;;  %v3466_v26 = vrot.slane %v6247_v36, 3 }
  0xfb   : > { %v1512_v7 = vrot.slane %v6187_v53, 1  ;;  %v3468_v36 = vrot.slane %v6259_v39, 3  ;;  %v3470_v32 = vrot.slane %v6263_v41, 3  ;;  %v1518_v1 = vrot.slane %v6207_v11, 1 }
  0xfc   : > { %v3162_v54 = vsel %vm3010_vm5, %v3152_v33, %v3161_v52  ;;  %v3178_v35 = vrot.slane %v3176_v6, 3  ;;  %v3171_v46 = vsel %vm3010_vm5, %v3161_v52, %v3170_v28  ;;  %v3467_v17 = vsel %vm3460_vm6, %v3464_v23, %v3466_v26  ;;  %v5778_v52 = vld [vmem:[%s5884_s8 + $0x98] ss:$0 sps:$4 sm:$0x11]   ;;  %s5680_s8 = smul.u32 144, %s7093_s18 }
  0xfd   : > { %5168 = vmatmul.mubr.msk.bf16.gmra.mrb[4].mxu1 %vm585_vm1, %v1493_v31  ;;  %v1501_v31 = vsel %vm1042_vm4, %v1498_v4, %v1500_v55  ;;  %v4782_v4 = vcombine.low %v3454_v19, %v6217_v56  ;;  %v1513_v34 = vsel %vm1042_vm4, %v1510_v25, %v1512_v7  ;;  %v1901_v0 = vshrl.u32 %v6152_v42, 16 }
  0xfe   : > { %5171 = vmatprep.mubr.msk.bf16.mxu1 %vm585_vm1, %v1495_v15  ;;  %v1503_v15 = vsel %vm1042_vm4, %v1500_v55, %v1502_v58  ;;  %v3465_v55 = vsel %vm3460_vm6, %v3462_v13, %v3464_v23  ;;  %v3471_v39 = vsel %vm3460_vm6, %v3468_v36, %v3470_v32  ;;  %v3474_v19 = vrot.slane %v6286_v51, 3  ;;  %s6811_s15 = scalar_lea.vmem %s7085_s3, %s5680_s8 }
  0xff   : > { %v1903_v6 = vrot.slane %v1901_v0, 1 }
 0x100   : > { %5336 = vmatmul.mubr.msk.bf16.gmra.mrb[20].mxu0 %vm585_vm1, %v3126_v29  ;;  %v3175_v29 = vrot.slane %v3173_v40, 2 }
 0x101   : > { %5339 = vmatprep.mubr.msk.bf16.mxu0 %vm585_vm1, %v3135_v59  ;;  %v1505_v59 = vsel %vm1042_vm4, %v1502_v58, %v1504_v48  ;;  %v1516_v58 = vrot.slane %v6203_v3, 1  ;;  %v1913_v48 = vshll.u32 %v6170_v22, 16 }
 0x102   : > { %v3179_v50 = vor.u32 %v3178_v35, %v3175_v29  ;;  %v1922_v35 = vshll.u32 %v6175_v24, 16 }
 0x103   : > { %v1519_v40 = vsel %vm1042_vm4, %v1516_v58, %v1518_v1 }
 0x104   : > { %v3180_v56 = vsel %vm3010_vm5, %v3170_v28, %v3179_v50 }
 0x105   : > { %5172 = vmatmul.mubr.msk.bf16.gmra.mrb[8].mxu1 %vm585_vm1, %v1497_v12  ;;  %v3461_v12 = vrot.slane %v4782_v4, 3  ;;  %v1915_v4 = vrot.slane %v1913_v48, 2 }
 0x106   : > { %5175 = vmatprep.mubr.msk.bf16.mxu1 %vm585_vm1, %v1499_v45  ;;  %v1508_v45 = vrot.slane %v6170_v22, 1 }
 0x107   : > { %v3463_v30 = vsel %vm3460_vm6, %v3461_v12, %v3462_v13  ;;  %v3478_v12 = vrot.slane %v6305_v5, 3  ;;  %v1928_v13 = vshrl.u32 %v6187_v53, 16 }
 0x108   : > { %5340 = vmatmul.mubr.msk.bf16.gmra.mrb[24].mxu0 %vm585_vm1, %v3144_v61  ;;  %v1509_v33 = vsel %vm1042_vm4, %v1506_v44, %v1508_v45  ;;  %v1511_v20 = vsel %vm1042_vm4, %v1508_v45, %v1510_v25  ;;  %v1514_v61 = vrot.slane %v6191_v60, 1  ;;  %v1931_v45 = vshll.u32 %v6187_v53, 16 }
 0x109   : > { %5343 = vmatprep.mubr.msk.bf16.mxu0 %vm585_vm1, %v3153_v38  ;;  %v3469_v38 = vsel %vm3460_vm6, %v3466_v26, %v3468_v36 }
 0x10a   : > { %v1515_v16 = vsel %vm1042_vm4, %v1512_v7, %v1514_v61  ;;  %v1517_v41 = vsel %vm1042_vm4, %v1514_v61, %v1516_v58  ;;  %v1933_v23 = vrot.slane %v1931_v45, 2  ;;  %v1946_v61 = vshrl.u32 %v6203_v3, 16 }
 0x10c   : > { %v1948_v58 = vrot.slane %v1946_v61, 1 }
 0x10d   : > { %5176 = vmatmul.mubr.msk.bf16.gmra.mrb[12].mxu1 %vm585_vm1, %v1501_v31  ;;  %v1904_v31 = vshll.u32 %v6152_v42, 16  ;;  %v1520_v42 = vrot.slane %v5778_v52, 1  ;;  %v1967_v52 = vshll.u32 %v6223_v9, 16 }
 0x10e   : > { %5179 = vmatprep.mubr.msk.bf16.mxu1 %vm585_vm1, %v1503_v15  ;;  %v3472_v15 = vrot.slane %v6282_v49, 3  ;;  %v1919_v49 = vshrl.u32 %v6175_v24, 16 }
 0x10f   : > { %v1906_v28 = vrot.slane %v1904_v31, 2  ;;  %v1521_v51 = vsel %vm1042_vm4, %v1518_v1, %v1520_v42  ;;  %v3484_v1 = vrot.slane %v6337_v47, 3 }
 0x110   : > { %5344 = vmatmul.mubr.msk.bf16.gmra.mrb[28].mxu0 %vm585_vm1, %v3162_v54  ;;  %v3473_v54 = vsel %vm3460_vm6, %v3470_v32, %v3472_v15  ;;  %v3475_v44 = vsel %vm3460_vm6, %v3472_v15, %v3474_v19  ;;  %v1921_v50 = vrot.slane %v1919_v49, 1  ;;  %v3494_v49 = vrot.slane %v6404_v57, 3 }
 0x111   : > { %5347 = vmatprep.mubr.msk.bf16.mxu0 %vm585_vm1, %v3171_v46  ;;  %v1907_v29 = vor.u32 %v1906_v28, %v1903_v6  ;;  %v1912_v46 = vrot.slane %v1910_v18, 1  ;;  %v3490_v18 = vrot.slane %v6375_v27, 3 }
 0x113   : > { %v1908_v22 = vsel %vm1801_vm2, %v6068_v8, %v1907_v29  ;;  %v1916_v24 = vor.u32 %v1915_v4, %v1912_v46  ;;  %v1940_v8 = vshll.u32 %v6191_v60, 16 }
 0x115   : > { %5180 = vmatmul.mubr.msk.bf16.gmra.mrb[16].mxu1 %vm585_vm1, %v1505_v59  ;;  %v3476_v59 = vrot.slane %v6300_v10, 3  ;;  %v1937_v10 = vshrl.u32 %v6191_v60, 16  ;;  %v1917_v5 = vsel %vm1801_vm2, %v1907_v29, %v1916_v24  ;;  %v1942_v7 = vrot.slane %v1940_v8, 2 }
 0x116   : > { %5183 = vmatprep.mubr.msk.bf16.mxu1 %vm585_vm1, %v1507_v63  ;;  %v1924_v63 = vrot.slane %v1922_v35, 2 }
 0x117   : > { %v1939_v26 = vrot.slane %v1937_v10, 1 }
 0x118   : > { %5348 = vmatmul.mubr.msk.bf16.gmra.mrb[32].mxu0 %vm585_vm1, %v3180_v56  ;;  %v3477_v56 = vsel %vm3460_vm6, %v3474_v19, %v3476_v59  ;;  %v1925_v25 = vor.u32 %v1924_v63, %v1921_v50  ;;  %v3488_v19 = vrot.slane %v6370_v21, 3  ;;  %v3492_v21 = vrot.slane %v6400_v43, 3 }
 0x119   : > { %5353 = vmatprep.mubr.msk.bf16.mxu0 %vm585_vm1, %v3463_v30  ;;  %v3479_v30 = vsel %vm3460_vm6, %v3476_v59, %v3478_v12  ;;  %v1943_v36 = vor.u32 %v1942_v7, %v1939_v26  ;;  %v3810_v63 = vpop.permute.xlu0 %3809 }
 0x11a   : > { %v1926_v53 = vsel %vm1801_vm2, %v1916_v24, %v1925_v25  ;;  %v3493_v27 = vsel %vm3460_vm6, %v3490_v18, %v3492_v21  ;;  %v3495_v35 = vsel %vm3460_vm6, %v3492_v21, %v3494_v49 }
 0x11d   : > { %5184 = vmatmul.mubr.msk.bf16.gmra.mrb[20].mxu1 %vm585_vm1, %v1509_v33  ;;  %v1930_v33 = vrot.slane %v1928_v13, 1 }
 0x11e   : > { %5187 = vmatprep.mubr.msk.bf16.mxu1 %vm585_vm1, %v1511_v20  ;;  %v3480_v20 = vrot.slane %v6318_v2, 3  ;;  %v1955_v2 = vshrl.u32 %v6207_v11, 16 }
 0x11f   : > { %v1934_v60 = vor.u32 %v1933_v23, %v1930_v33 }
 0x120   : > { %5354 = vmatmul.mubr.msk.bf16.vlgmr.msra.gmra.mrb[0].mxu0 %vm585_vm1, %v3465_v55  ;;  %v3482_v55 = vrot.slane %v6323_v37, 3  ;;  %v1957_v0 = vrot.slane %v1955_v2, 1 }
 0x121   : > { %5357 = vmatprep.mubr.msk.bf16.mxu0 %vm585_vm1, %v3467_v17  ;;  %v1949_v17 = vshll.u32 %v6203_v3, 16  ;;  %v1935_v37 = vsel %vm1801_vm2, %v1925_v25, %v1934_v60  ;;  %v1944_v3 = vsel %vm1801_vm2, %v1934_v60, %v1943_v36 }
 0x122   : > { %v3483_v32 = vsel %vm3460_vm6, %v3480_v20, %v3482_v55  ;;  %v3485_v15 = vsel %vm3460_vm6, %v3482_v55, %v3484_v1 }
 0x125   : > { %5188 = vmatmul.mubr.msk.bf16.gmra.mrb[24].mxu1 %vm585_vm1, %v1513_v34  ;;  %v3481_v34 = vsel %vm3460_vm6, %v3478_v12, %v3480_v20 }
 0x126   : > { %5191 = vmatprep.mubr.msk.bf16.mxu1 %vm585_vm1, %v1515_v16  ;;  %v1958_v16 = vshll.u32 %v6207_v11, 16 }
 0x128   : > { %5358 = vmatmul.mubr.msk.bf16.gmra.mrb[4].mxu0 %vm585_vm1, %v3469_v38  ;;  %v1951_v38 = vrot.slane %v1949_v17, 2  ;;  %v1960_v31 = vrot.slane %v1958_v16, 2 }
 0x129   : > { %5361 = vmatprep.mubr.msk.bf16.mxu0 %vm585_vm1, %v3471_v39  ;;  %v3486_v39 = vrot.slane %v6348_v62, 3  ;;  %v1969_v62 = vrot.slane %v1967_v52, 2 }
 0x12a   : > { %v1952_v11 = vor.u32 %v1951_v38, %v1948_v58 }
 0x12b   : > { %v3487_v47 = vsel %vm3460_vm6, %v3484_v1, %v3486_v39  ;;  %v3489_v48 = vsel %vm3460_vm6, %v3486_v39, %v3488_v19 }
 0x12c   : > { %v1953_v6 = vsel %vm1801_vm2, %v1943_v36, %v1952_v11 }
 0x12d   : > { %5192 = vmatmul.mubr.msk.bf16.gmra.mrb[28].mxu1 %vm585_vm1, %v1517_v41  ;;  %v1964_v41 = vshrl.u32 %v6223_v9, 16 }
 0x12e   : > { %5195 = vmatprep.mubr.msk.bf16.mxu1 %vm585_vm1, %v1519_v40  ;;  %v1961_v40 = vor.u32 %v1960_v31, %v1957_v0  ;;  %v3820_v24 = vpop.permute.xlu1 %3819 }
 0x12f   : > { %v1966_v28 = vrot.slane %v1964_v41, 1 }
 0x130   : > { %5362 = vmatmul.mubr.msk.bf16.gmra.mrb[8].mxu0 %vm585_vm1, %v3473_v54  ;;  %v1962_v42 = vsel %vm1801_vm2, %v1952_v11, %v1961_v40  ;;  %v3491_v54 = vsel %vm3460_vm6, %v3488_v19, %v3490_v18 }
 0x131   : > { %5365 = vmatprep.mubr.msk.bf16.mxu0 %vm585_vm1, %v3475_v44  ;;  %v1970_v9 = vor.u32 %v1969_v62, %v1966_v28  ;;  %v3496_v44 = vrot.slane %v6626_v14, 3  ;;  %v3815_v14 = vpop.permute.xlu0 %3814 }
 0x132   : > { %v3825_v25 = vpop.permute.xlu1 %3824 }
 0x133   : > { %v1971_v29 = vsel %vm1801_vm2, %v1961_v40, %v1970_v9 }
 0x135   : > { %5196 = vmatmul.mubr.msk.bf16.gmra.mrb[32].mxu1 %vm585_vm1, %v1521_v51  ;;  %v3497_v51 = vsel %vm3460_vm6, %v3494_v49, %v3496_v44  ;;  %v6773_v8 = vpop.permute.xlu0 %3829 }
 0x136   : > { %5221 = vmatprep.mubr.msk.bf16.mxu1 %vm585_vm1, %v1908_v22 }
 0x138   : > { %5366 = vmatmul.mubr.msk.bf16.gmra.mrb[12].mxu0 %vm585_vm1, %v3477_v56 }
 0x139   : > { %5369 = vmatprep.mubr.msk.bf16.mxu0 %vm585_vm1, %v3479_v30 }
 0x13d   : > { %5222 = vmatmul.mubr.msk.bf16.vlgmr.msra.gmra.mrb[20].mxu1 %vm585_vm1, %v1917_v5  ;;  %v6777_v5 = vpop.permute.xlu1 %3834 }
 0x13e   : > { %5225 = vmatprep.mubr.msk.bf16.mxu1 %vm585_vm1, %v1926_v53  ;;  %v3840_v53 = vpop.permute.xlu0 %3839 }
 0x140   : > { %5370 = vmatmul.mubr.msk.bf16.gmra.mrb[16].mxu0 %vm585_vm1, %v3481_v34 }
 0x141   : > { %5373 = vmatprep.mubr.msk.bf16.mxu0 %vm585_vm1, %v3483_v32  ;;  %v6785_v26 = vpop.permute.xlu1 %3844 }
 0x142   : > { %v6793_v61 = vpop.permute.xlu0 %3849 }
 0x145   : > { %5226 = vmatmul.mubr.msk.bf16.gmra.mrb[24].mxu1 %vm585_vm1, %v1935_v37  ;;  %v6797_v34 = vpop.permute.xlu1 %3854 }
 0x146   : > { %5229 = vmatprep.mubr.msk.bf16.mxu1 %vm585_vm1, %v1944_v3  ;;  %v6799_v36 = vpop.permute.xlu0 %3859 }
 0x148   : > { %5374 = vmatmul.mubr.msk.bf16.gmra.mrb[20].mxu0 %vm585_vm1, %v3485_v15 }
 0x149   : > { %5377 = vmatprep.mubr.msk.bf16.mxu0 %vm585_vm1, %v3487_v47  ;;  %v6801_v2 = vpop.permute.xlu1 %3864 }
 0x14a   : > { %v6804_v58 = vpop.permute.xlu0 %3869 }
 0x14d   : > { %5230 = vmatmul.mubr.msk.bf16.gmra.mrb[28].mxu1 %vm585_vm1, %v1953_v6  ;;  %v6806_v39 = vpop.permute.xlu1 %3874 }
 0x14e   : > { %5233 = vmatprep.mubr.msk.bf16.mxu1 %vm585_vm1, %v1962_v42  ;;  %v6815_v19 = vpop.permute.xlu0 %3879 }
 0x150   : > { %5378 = vmatmul.mubr.msk.bf16.gmra.mrb[24].mxu0 %vm585_vm1, %v3489_v48 }
 0x151   : > { %5381 = vmatprep.mubr.msk.bf16.mxu0 %vm585_vm1, %v3491_v54 }
 0x155   : > { %5234 = vmatmul.mubr.msk.bf16.gmra.mrb[32].mxu1 %vm585_vm1, %v1971_v29 }
 0x158   : > { %5382 = vmatmul.mubr.msk.bf16.gmra.mrb[28].mxu0 %vm585_vm1, %v3493_v27 }
 0x159   : > { %5385 = vmatprep.mubr.msk.bf16.mxu0 %vm585_vm1, %v3495_v35  ;;  %v6823_v35 = vpop.permute.xlu1 %3884 }
 0x160   : > { %5386 = vmatmul.mubr.msk.bf16.gmra.mrb[32].mxu0 %vm585_vm1, %v3497_v51 }
 0x1c8   : > { %v5165_v46 = vpop.f32.mrb[0].mxu1 }
 0x1c9   : > { %v1616_v43 = vpop.f32.mrb[1].mxu1 }
 0x1ca   : > { %v5166_v4 = vpop.f32.mrb[2].mxu1 }
 0x1cb   : > { %v1619_v57 = vpop.f32.mrb[3].mxu1 }
 0x1d0   : > { %v5169_v59 = vpop.f32.mrb[4].mxu1 }
 0x1d1   : > { %v6759_v22 = vpop.f32.mrb[5].mxu1 }
 0x1d2   : > { %v6761_v50 = vpop.f32.mrb[6].mxu1 }
 0x1d3   : > { %v6763_v12 = vpop.f32.mrb[7].mxu1 }
 0x1d8   : > { %v6765_v13 = vpop.f32.mrb[8].mxu1 }
 0x1d9   : > { %v6767_v45 = vpop.f32.mrb[9].mxu1 }
 0x1da   : > { %v6769_v56 = vpop.f32.mrb[10].mxu1 }
 0x1db   : > { %v6771_v10 = vpop.f32.mrb[11].mxu1 }
 0x1e0   : > { %v6775_v30 = vpop.f32.mrb[12].mxu1 }
 0x1e1   : > { %v6779_v33 = vpop.f32.mrb[13].mxu1 }
 0x1e2   : > { %v6781_v23 = vpop.f32.mrb[14].mxu1 }
 0x1e3   : > { %v6783_v20 = vpop.f32.mrb[15].mxu1 }
 0x1e8   : > { %v6787_v7 = vpop.f32.mrb[16].mxu1 }
 0x1e9   : > { %v6789_v55 = vpop.f32.mrb[17].mxu1 }
 0x1ea   : > { %v6791_v60 = vpop.f32.mrb[18].mxu1 }
 0x1eb   : > { %v6795_v17 = vpop.f32.mrb[19].mxu1 }
 0x1f3   : > { %v5355_v16 = vpop.f32.mrb[0].mxu0 }
 0x1f4   : > { %v5391_v32 = vadd.f32 %v5355_v16, %v5165_v46  ;;  %v3592_v37 = vpop.f32.mrb[1].mxu0 }
 0x1f5   : > { %v5392_v38 = vadd.f32 %v3592_v37, %v1616_v43  ;;  %v5356_v1 = vpop.f32.mrb[2].mxu0 }
 0x1f6   : > { %v3989_v3 = vmul.f32 %v5391_v32, %v3820_v24  ;;  %v5393_v0 = vadd.f32 %v5356_v1, %v5166_v4  ;;  %v3595_v31 = vpop.f32.mrb[3].mxu0 }
 0x1f7   : > { %v3987_v11 = vmul.f32 %v5392_v38, %v3810_v63  ;;  %v5394_v41 = vadd.f32 %v3595_v31, %v1619_v57 }
 0x1f8   : > { %v4842_v52 = vpack.c.bf16 %v3989_v3, %v3989_v3  ;;  %v3990_v15 = vmul.f32 %v5393_v0, %v3825_v25  ;;  %v4286_v28 = vmul.f32 %v3989_v3, %v3989_v3  ;;  %v4208_v44 = vsel %vm4204_vm8, %v3989_v3, 0.0  ;;  %v6837_v3 = vpop.permute.xlu0 %3889 }
 0x1f9   : > { %v4840_v40 = vpack.c.bf16 %v3987_v11, %v3987_v11  ;;  %v4284_v47 = vmul.f32 %v3987_v11, %v3987_v11  ;;  %v3988_v6 = vmul.f32 %v5394_v41, %v3815_v14  ;;  %v4205_v42 = vsel %vm4204_vm8, %v3987_v11, 0.0  ;;  %v6844_v41 = vpop.permute.xlu1 %3894 }
 0x1fa   : > { %4170 = vst.msk [vmem:[%s6811_s15 + $0x8] sm:$0xf] %vm4167_vm7, %v4842_v52  ;;  %v4843_v62 = vpack.c.bf16 %v3990_v15, %v3990_v15  ;;  %v4287_v29 = vmul.f32 %v3990_v15, %v3990_v15  ;;  %v4323_v25 = vsel %vm4204_vm8, %v4286_v28, 0.0  ;;  %v4210_v37 = vsel %vm4204_vm8, %v3990_v15, 0.0 }
 0x1fb   : > { %4168 = vst.msk [vmem:[%s6811_s15] sm:$0xf] %vm4167_vm7, %v4840_v40  ;;  %v4841_v18 = vpack.c.bf16 %v3988_v6, %v3988_v6  ;;  %v4206_v9 = vsel %vm4204_vm8, %v3988_v6, 0.0  ;;  %v4285_v48 = vmul.f32 %v3988_v6, %v3988_v6  ;;  %v5359_v54 = vpop.f32.mrb[4].mxu0  ;;  %v4320_v51 = vsel %vm4204_vm8, %v4284_v47, 0.0 }
 0x1fc   : > { %4171 = vst.msk [vmem:[%s6811_s15 + $0xc] sm:$0xf] %vm4167_vm7, %v4843_v62  ;;  %v4207_v21 = vadd.f32 %v4206_v9, %v4205_v42  ;;  %v5395_v49 = vadd.f32 %v5359_v54, %v5169_v59  ;;  %v3608_v27 = vpop.f32.mrb[5].mxu0  ;;  %v4325_v38 = vsel %vm4204_vm8, %v4287_v29, 0.0 }
 0x1fd   : > { %4169 = vst.msk [vmem:[%s6811_s15 + $0x4] sm:$0xf] %vm4167_vm7, %v4841_v18  ;;  %v4321_v46 = vsel %vm4204_vm8, %v4285_v48, 0.0  ;;  %v5396_v43 = vadd.f32 %v3608_v27, %v6759_v22  ;;  %v5360_v4 = vpop.f32.mrb[6].mxu0  ;;  %v6856_v27 = vpop.permute.xlu0 %3899 }
 0x1fe   : > { %v4209_v57 = vadd.f32 %v4208_v44, %v4207_v21  ;;  %v4322_v63 = vadd.f32 %v4321_v46, %v4320_v51  ;;  %v3993_v24 = vmul.f32 %v5395_v49, %v3840_v53  ;;  %v5397_v59 = vadd.f32 %v5360_v4, %v6761_v50  ;;  %v3611_v14 = vpop.f32.mrb[7].mxu0 }
 0x1ff   : > { %v3991_v16 = vmul.f32 %v5396_v43, %v6773_v8  ;;  %v5398_v32 = vadd.f32 %v3611_v14, %v6763_v12 }
 0x200   : > { %v4324_v22 = vadd.f32 %v4323_v25, %v4322_v63  ;;  %v4846_v1 = vpack.c.bf16 %v3993_v24, %v3993_v24  ;;  %v4211_v53 = vadd.f32 %v4210_v37, %v4209_v57  ;;  %v3994_v8 = vmul.f32 %v5397_v59, %v6785_v26 }
 0x201   : > { %v4844_v0 = vpack.c.bf16 %v3991_v16, %v3991_v16  ;;  %v4212_v50 = vsel %vm4204_vm8, %v3991_v16, 0.0  ;;  %v4288_v31 = vmul.f32 %v3991_v16, %v3991_v16  ;;  %v3992_v12 = vmul.f32 %v5398_v32, %v6777_v5 }
 0x202   : > { %4174 = vst.msk [vmem:[%s6811_s15 + $0x18] sm:$0xf] %vm4167_vm7, %v4846_v1  ;;  %v4326_v11 = vadd.f32 %v4325_v38, %v4324_v22  ;;  %v4213_v52 = vadd.f32 %v4212_v50, %v4211_v53  ;;  %v4290_v47 = vmul.f32 %v3993_v24, %v3993_v24  ;;  %v4847_v28 = vpack.c.bf16 %v3994_v8, %v3994_v8  ;;  %v6877_v50 = vpop.permute.xlu0 %3909 }
 0x203   : > { %4172 = vst.msk [vmem:[%s6811_s15 + $0x10] sm:$0xf] %vm4167_vm7, %v4844_v0  ;;  %v4327_v15 = vsel %vm4204_vm8, %v4288_v31, 0.0  ;;  %v5363_v40 = vpop.f32.mrb[8].mxu0  ;;  %v4845_v42 = vpack.c.bf16 %v3992_v12, %v3992_v12  ;;  %v4214_v18 = vsel %vm4204_vm8, %v3992_v12, 0.0  ;;  %v4289_v26 = vmul.f32 %v3992_v12, %v3992_v12 }
 0x204   : > { %v4328_v6 = vadd.f32 %v4327_v15, %v4326_v11  ;;  %v3624_v62 = vpop.f32.mrb[9].mxu0  ;;  %v5399_v5 = vadd.f32 %v5363_v40, %v6765_v13  ;;  %v4216_v48 = vsel %vm4204_vm8, %v3993_v24, 0.0  ;;  %4175 = vst.msk [vmem:[%s6811_s15 + $0x1c] sm:$0xf] %vm4167_vm7, %v4847_v28  ;;  %v4215_v54 = vadd.f32 %v4214_v18, %v4213_v52 }
 0x205   : > { %v5364_v9 = vpop.f32.mrb[10].mxu0  ;;  %v5400_v29 = vadd.f32 %v3624_v62, %v6767_v45  ;;  %v4291_v44 = vmul.f32 %v3994_v8, %v3994_v8  ;;  %4173 = vst.msk [vmem:[%s6811_s15 + $0x14] sm:$0xf] %vm4167_vm7, %v4845_v42  ;;  %v4329_v51 = vsel %vm4204_vm8, %v4289_v26, 0.0  ;;  %v4331_v63 = vsel %vm4204_vm8, %v4290_v47, 0.0 }
 0x206   : > { %v5401_v21 = vadd.f32 %v5364_v9, %v6769_v56  ;;  %v3627_v49 = vpop.f32.mrb[11].mxu0  ;;  %v3997_v13 = vmul.f32 %v5399_v5, %v6799_v36  ;;  %v4217_v43 = vadd.f32 %v4216_v48, %v4215_v54  ;;  %v4330_v4 = vadd.f32 %v4329_v51, %v4328_v6  ;;  %v6865_v56 = vpop.permute.xlu1 %3904 }
 0x207   : > { %v5402_v46 = vadd.f32 %v3627_v49, %v6771_v10  ;;  %v3995_v57 = vmul.f32 %v5400_v29, %v6793_v61  ;;  %v4218_v24 = vsel %vm4204_vm8, %v3994_v8, 0.0  ;;  %v4333_v61 = vsel %vm4204_vm8, %v4291_v44, 0.0 }
 0x208   : > { %v3998_v45 = vmul.f32 %v5401_v21, %v6801_v2  ;;  %v4850_v59 = vpack.c.bf16 %v3997_v13, %v3997_v13  ;;  %v4332_v36 = vadd.f32 %v4331_v63, %v4330_v4  ;;  %v4219_v16 = vadd.f32 %v4218_v24, %v4217_v43  ;;  %v6909_v63 = vpop.permute.xlu0 %3919 }
 0x209   : > { %v3996_v14 = vmul.f32 %v5402_v46, %v6797_v34  ;;  %v4848_v25 = vpack.c.bf16 %v3995_v57, %v3995_v57  ;;  %v4220_v10 = vsel %vm4204_vm8, %v3995_v57, 0.0  ;;  %v4224_v2 = vsel %vm4204_vm8, %v3997_v13, 0.0 }
 0x20a   : > { %4178 = vst.msk [vmem:[%s6811_s15 + $0x28] sm:$0xf] %vm4167_vm7, %v4850_v59  ;;  %v4292_v32 = vmul.f32 %v3995_v57, %v3995_v57  ;;  %v4851_v37 = vpack.c.bf16 %v3998_v45, %v3998_v45  ;;  %v4294_v22 = vmul.f32 %v3997_v13, %v3997_v13  ;;  %v4221_v34 = vadd.f32 %v4220_v10, %v4219_v16  ;;  %v6889_v42 = vpop.permute.xlu1 %3914 }
 0x20b   : > { %v5367_v38 = vpop.f32.mrb[12].mxu0  ;;  %4176 = vst.msk [vmem:[%s6811_s15 + $0x20] sm:$0xf] %vm4167_vm7, %v4848_v25  ;;  %v4334_v1 = vadd.f32 %v4333_v61, %v4332_v36  ;;  %v4849_v0 = vpack.c.bf16 %v3996_v14, %v3996_v14  ;;  %v4222_v11 = vsel %vm4204_vm8, %v3996_v14, 0.0  ;;  %v4293_v8 = vmul.f32 %v3996_v14, %v3996_v14 }
 0x20c   : > { %v3640_v53 = vpop.f32.mrb[13].mxu0  ;;  %v4335_v31 = vsel %vm4204_vm8, %v4292_v32, 0.0  ;;  %4179 = vst.msk [vmem:[%s6811_s15 + $0x2c] sm:$0xf] %vm4167_vm7, %v4851_v37  ;;  %v5403_v12 = vadd.f32 %v5367_v38, %v6775_v30  ;;  %v4295_v40 = vmul.f32 %v3998_v45, %v3998_v45  ;;  %v4223_v47 = vadd.f32 %v4222_v11, %v4221_v34 }
 0x20d   : > { %v5368_v52 = vpop.f32.mrb[14].mxu0  ;;  %v4336_v15 = vadd.f32 %v4335_v31, %v4334_v1  ;;  %4177 = vst.msk [vmem:[%s6811_s15 + $0x24] sm:$0xf] %vm4167_vm7, %v4849_v0  ;;  %v5404_v6 = vadd.f32 %v3640_v53, %v6779_v33  ;;  %v4337_v18 = vsel %vm4204_vm8, %v4293_v8, 0.0  ;;  %v4339_v21 = vsel %vm4204_vm8, %v4294_v22, 0.0 }
 0x20e   : > { %v3643_v28 = vpop.f32.mrb[15].mxu0  ;;  %v4001_v26 = vmul.f32 %v5403_v12, %v6815_v19  ;;  %v5405_v5 = vadd.f32 %v5368_v52, %v6781_v23  ;;  %v4225_v48 = vadd.f32 %v4224_v2, %v4223_v47  ;;  %v4226_v49 = vsel %vm4204_vm8, %v3998_v45, 0.0  ;;  %v6914_v14 = vpop.permute.xlu1 %3924 }
 0x20f   : > { %v5406_v30 = vadd.f32 %v3643_v28, %v6783_v20  ;;  %v4338_v54 = vadd.f32 %v4337_v18, %v4336_v15  ;;  %v3999_v33 = vmul.f32 %v5404_v6, %v6804_v58  ;;  %v4341_v58 = vsel %vm4204_vm8, %v4295_v40, 0.0 }
 0x210   : > { %v6887_v62 = vpop.f32.mrb[20].mxu1  ;;  %v4854_v44 = vpack.c.bf16 %v4001_v26, %v4001_v26  ;;  %v4002_v19 = vmul.f32 %v5405_v5, %v6823_v35  ;;  %v4227_v13 = vadd.f32 %v4226_v49, %v4225_v48  ;;  %v4298_v36 = vmul.f32 %v4001_v26, %v4001_v26 }
 0x211   : > { %v6895_v9 = vpop.f32.mrb[21].mxu1  ;;  %v4340_v20 = vadd.f32 %v4339_v21, %v4338_v54  ;;  %v4852_v51 = vpack.c.bf16 %v3999_v33, %v3999_v33  ;;  %v4228_v46 = vsel %vm4204_vm8, %v3999_v33, 0.0  ;;  %v4296_v43 = vmul.f32 %v3999_v33, %v3999_v33 }
 0x212   : > { %v6898_v29 = vpop.f32.mrb[22].mxu1  ;;  %4182 = vst.msk [vmem:[%s6811_s15 + $0x38] sm:$0xf] %vm4167_vm7, %v4854_v44  ;;  %v4855_v4 = vpack.c.bf16 %v4002_v19, %v4002_v19  ;;  %v4229_v35 = vadd.f32 %v4228_v46, %v4227_v13  ;;  %v4000_v24 = vmul.f32 %v5406_v30, %v6806_v39  ;;  %v4347_v12 = vsel %vm4204_vm8, %v4298_v36, 0.0  ;;  %v6947_v48 = vpop.permute.xlu1 %3934 }
 0x213   : > { %v6903_v23 = vpop.f32.mrb[23].mxu1  ;;  %v5371_v57 = vpop.f32.mrb[16].mxu0  ;;  %4180 = vst.msk [vmem:[%s6811_s15 + $0x30] sm:$0xf] %vm4167_vm7, %v4852_v51  ;;  %v4342_v45 = vadd.f32 %v4341_v58, %v4340_v20  ;;  %v4343_v25 = vsel %vm4204_vm8, %v4296_v43, 0.0  ;;  %v4234_v40 = vsel %vm4204_vm8, %v4002_v19, 0.0 }
 0x214   : > { %v3656_v59 = vpop.f32.mrb[17].mxu0  ;;  %4183 = vst.msk [vmem:[%s6811_s15 + $0x3c] sm:$0xf] %vm4167_vm7, %v4855_v4  ;;  %v5407_v16 = vadd.f32 %v5371_v57, %v6787_v7  ;;  %v4853_v32 = vpack.c.bf16 %v4000_v24, %v4000_v24  ;;  %v4230_v37 = vsel %vm4204_vm8, %v4000_v24, 0.0  ;;  %v4297_v34 = vmul.f32 %v4000_v24, %v4000_v24 }
 0x215   : > { %v5408_v10 = vadd.f32 %v3656_v59, %v6789_v55  ;;  %v5372_v61 = vpop.f32.mrb[18].mxu0  ;;  %v4344_v2 = vadd.f32 %v4343_v25, %v4342_v45  ;;  %v4231_v22 = vadd.f32 %v4230_v37, %v4229_v35  ;;  %v4232_v7 = vsel %vm4204_vm8, %v4001_v26, 0.0 }
 0x216   : > { %v3659_v38 = vpop.f32.mrb[19].mxu0  ;;  %v4005_v1 = vmul.f32 %v5407_v16, %v6856_v27  ;;  %v4299_v55 = vmul.f32 %v4002_v19, %v4002_v19  ;;  %4181 = vst.msk [vmem:[%s6811_s15 + $0x34] sm:$0xf] %vm4167_vm7, %v4853_v32  ;;  %v5409_v31 = vadd.f32 %v5372_v61, %v6791_v60  ;;  %v4345_v27 = vsel %vm4204_vm8, %v4297_v34, 0.0  ;;  %v6941_v60 = vpop.permute.xlu0 %3929 }
 0x217   : > { %v4003_v0 = vmul.f32 %v5408_v10, %v6837_v3  ;;  %v5410_v11 = vadd.f32 %v3659_v38, %v6795_v17  ;;  %v4233_v52 = vadd.f32 %v4232_v7, %v4231_v22  ;;  %v4346_v47 = vadd.f32 %v4345_v27, %v4344_v2 }
 0x218   : > { %v6922_v39 = vpop.f32.mrb[24].mxu1  ;;  %v4858_v3 = vpack.c.bf16 %v4005_v1, %v4005_v1  ;;  %v4006_v26 = vmul.f32 %v5409_v31, %v6865_v56  ;;  %v4349_v54 = vsel %vm4204_vm8, %v4299_v55, 0.0  ;;  %v4240_v44 = vsel %vm4204_vm8, %v4005_v1, 0.0 }
 0x219   : > { %v6926_v53 = vpop.f32.mrb[25].mxu1  ;;  %v4856_v6 = vpack.c.bf16 %v4003_v0, %v4003_v0  ;;  %v4236_v28 = vsel %vm4204_vm8, %v4003_v0, 0.0  ;;  %v4235_v17 = vadd.f32 %v4234_v40, %v4233_v52  ;;  %v4300_v18 = vmul.f32 %v4003_v0, %v4003_v0 }
 0x21a   : > { %v6933_v8 = vpop.f32.mrb[26].mxu1  ;;  %4186 = vst.msk [vmem:[%s6811_s15 + $0x48] sm:$0xf] %vm4167_vm7, %v4858_v3  ;;  %v4004_v5 = vmul.f32 %v5410_v11, %v6844_v41  ;;  %v4348_v33 = vadd.f32 %v4347_v12, %v4346_v47  ;;  %v4859_v56 = vpack.c.bf16 %v4006_v26, %v4006_v26  ;;  %v4302_v51 = vmul.f32 %v4005_v1, %v4005_v1  ;;  %v3940_v61 = vpop.permute.xlu0 %3939 }
 0x21b   : > { %v6937_v15 = vpop.f32.mrb[27].mxu1  ;;  %v5375_v30 = vpop.f32.mrb[20].mxu0  ;;  %4184 = vst.msk [vmem:[%s6811_s15 + $0x40] sm:$0xf] %vm4167_vm7, %v4856_v6  ;;  %v4237_v19 = vadd.f32 %v4236_v28, %v4235_v17  ;;  %v4351_v20 = vsel %vm4204_vm8, %v4300_v18, 0.0  ;;  %v4303_v36 = vmul.f32 %v4006_v26, %v4006_v26  ;;  %v4242_v38 = vsel %vm4204_vm8, %v4006_v26, 0.0 }
 0x21c   : > { %v5411_v21 = vadd.f32 %v5375_v30, %v6887_v62  ;;  %v3672_v49 = vpop.f32.mrb[21].mxu0  ;;  %v4350_v13 = vadd.f32 %v4349_v54, %v4348_v33  ;;  %v4857_v46 = vpack.c.bf16 %v4004_v5, %v4004_v5  ;;  %v4238_v58 = vsel %vm4204_vm8, %v4004_v5, 0.0  ;;  %4187 = vst.msk [vmem:[%s6811_s15 + $0x4c] sm:$0xf] %vm4167_vm7, %v4859_v56 }
 0x21d   : > { %v5376_v41 = vpop.f32.mrb[22].mxu0  ;;  %v4239_v62 = vadd.f32 %v4238_v58, %v4237_v19  ;;  %v4301_v57 = vmul.f32 %v4004_v5, %v4004_v5  ;;  %v5412_v45 = vadd.f32 %v3672_v49, %v6895_v9  ;;  %v3945_v9 = vpop.permute.xlu1 %3944  ;;  %v4357_v55 = vsel %vm4204_vm8, %v4303_v36, 0.0 }
 0x21e   : > { %v3675_v43 = vpop.f32.mrb[23].mxu0  ;;  %v4009_v35 = vmul.f32 %v5411_v21, %v6909_v63  ;;  %v4352_v59 = vadd.f32 %v4351_v20, %v4350_v13  ;;  %4185 = vst.msk [vmem:[%s6811_s15 + $0x44] sm:$0xf] %vm4167_vm7, %v4857_v46  ;;  %v5413_v25 = vadd.f32 %v5376_v41, %v6898_v29  ;;  %v4355_v29 = vsel %vm4204_vm8, %v4302_v51, 0.0  ;;  %v3950_v26 = vpop.permute.xlu0 %3949 }
 0x21f   : > { %v5414_v16 = vadd.f32 %v3675_v43, %v6903_v23  ;;  %v4241_v2 = vadd.f32 %v4240_v44, %v4239_v62  ;;  %v4353_v32 = vsel %vm4204_vm8, %v4301_v57, 0.0  ;;  %v4007_v34 = vmul.f32 %v5412_v45, %v6877_v50 }
 0x220   : > { %v6956_v4 = vpop.f32.mrb[28].mxu1  ;;  %v4862_v63 = vpack.c.bf16 %v4009_v35, %v4009_v35  ;;  %v4354_v22 = vadd.f32 %v4353_v32, %v4352_v59  ;;  %v4010_v1 = vmul.f32 %v5413_v25, %v6914_v14  ;;  %v4248_v50 = vsel %vm4204_vm8, %v4009_v35, 0.0 }
 0x221   : > { %v6962_v24 = vpop.f32.mrb[29].mxu1  ;;  %v4243_v23 = vadd.f32 %v4242_v38, %v4241_v2  ;;  %v4008_v0 = vmul.f32 %v5414_v16, %v6889_v42  ;;  %v4860_v11 = vpack.c.bf16 %v4007_v34, %v4007_v34  ;;  %v4244_v12 = vsel %vm4204_vm8, %v4007_v34, 0.0  ;;  %v3955_v49 = vpop.permute.xlu1 %3954 }
 0x222   : > { %v6968_v10 = vpop.f32.mrb[30].mxu1  ;;  %4190 = vst.msk [vmem:[%s6811_s15 + $0x58] sm:$0xf] %vm4167_vm7, %v4862_v63  ;;  %v4356_v31 = vadd.f32 %v4355_v29, %v4354_v22  ;;  %v4304_v27 = vmul.f32 %v4007_v34, %v4007_v34  ;;  %v4863_v3 = vpack.c.bf16 %v4010_v1, %v4010_v1  ;;  %v4306_v47 = vmul.f32 %v4009_v35, %v4009_v35  ;;  %v3960_v2 = vpop.permute.xlu0 %3959 }
 0x223   : > { %v6971_v37 = vpop.f32.mrb[31].mxu1  ;;  %v5379_v7 = vpop.f32.mrb[24].mxu0  ;;  %v4245_v14 = vadd.f32 %v4244_v12, %v4243_v23  ;;  %4188 = vst.msk [vmem:[%s6811_s15 + $0x50] sm:$0xf] %vm4167_vm7, %v4860_v11  ;;  %v4861_v6 = vpack.c.bf16 %v4008_v0, %v4008_v0  ;;  %v4246_v28 = vsel %vm4204_vm8, %v4008_v0, 0.0  ;;  %v4305_v54 = vmul.f32 %v4008_v0, %v4008_v0 }
 0x224   : > { %v3688_v52 = vpop.f32.mrb[25].mxu0  ;;  %v4358_v42 = vadd.f32 %v4357_v55, %v4356_v31  ;;  %v4359_v5 = vsel %vm4204_vm8, %v4304_v27, 0.0  ;;  %4191 = vst.msk [vmem:[%s6811_s15 + $0x5c] sm:$0xf] %vm4167_vm7, %v4863_v3  ;;  %v5415_v33 = vadd.f32 %v5379_v7, %v6922_v39  ;;  %v4307_v19 = vmul.f32 %v4010_v1, %v4010_v1 }
 0x225   : > { %v5380_v40 = vpop.f32.mrb[26].mxu0  ;;  %v4247_v30 = vadd.f32 %v4246_v28, %v4245_v14  ;;  %4189 = vst.msk [vmem:[%s6811_s15 + $0x54] sm:$0xf] %vm4167_vm7, %v4861_v6  ;;  %v5416_v20 = vadd.f32 %v3688_v52, %v6926_v53  ;;  %v4361_v13 = vsel %vm4204_vm8, %v4305_v54, 0.0  ;;  %v4250_v43 = vsel %vm4204_vm8, %v4010_v1, 0.0  ;;  %v3965_v38 = vpop.permute.xlu1 %3964 }
 0x226   : > { %v3691_v17 = vpop.f32.mrb[27].mxu0  ;;  %v4360_v44 = vadd.f32 %v4359_v5, %v4358_v42  ;;  %v5417_v56 = vadd.f32 %v5380_v40, %v6933_v8  ;;  %v4013_v46 = vmul.f32 %v5415_v33, %v3940_v61  ;;  %v4363_v53 = vsel %vm4204_vm8, %v4306_v47, 0.0 }
 0x227   : > { %v4249_v51 = vadd.f32 %v4248_v50, %v4247_v30  ;;  %v5418_v58 = vadd.f32 %v3691_v17, %v6937_v15  ;;  %v4011_v57 = vmul.f32 %v5416_v20, %v6941_v60  ;;  %v4365_v32 = vsel %vm4204_vm8, %v4307_v19, 0.0 }
 0x228   : > { %v6986_v18 = vpop.f32.mrb[32].mxu1  ;;  %v4362_v62 = vadd.f32 %v4361_v13, %v4360_v44  ;;  %v4014_v35 = vmul.f32 %v5417_v56, %v3945_v9  ;;  %v4866_v8 = vpack.c.bf16 %v4013_v46, %v4013_v46  ;;  %v4310_v31 = vmul.f32 %v4013_v46, %v4013_v46 }
 0x229   : > { %v6992_v21 = vpop.f32.mrb[33].mxu1  ;;  %v4251_v45 = vadd.f32 %v4250_v43, %v4249_v51  ;;  %v4864_v25 = vpack.c.bf16 %v4011_v57, %v4011_v57  ;;  %v4252_v15 = vsel %vm4204_vm8, %v4011_v57, 0.0  ;;  %v4308_v16 = vmul.f32 %v4011_v57, %v4011_v57  ;;  %v3975_v28 = vpop.permute.xlu1 %3974 }
 0x22a   : > { %v6998_v41 = vpop.f32.mrb[34].mxu1  ;;  %v4364_v36 = vadd.f32 %v4363_v53, %v4362_v62  ;;  %4194 = vst.msk [vmem:[%s6811_s15 + $0x68] sm:$0xf] %vm4167_vm7, %v4866_v8  ;;  %v4867_v63 = vpack.c.bf16 %v4014_v35, %v4014_v35  ;;  %v4012_v1 = vmul.f32 %v5418_v58, %v6947_v48  ;;  %v4256_v3 = vsel %vm4204_vm8, %v4013_v46, 0.0 }
 0x22b   : > { %v7002_v39 = vpop.f32.mrb[35].mxu1  ;;  %v5383_v59 = vpop.f32.mrb[28].mxu0  ;;  %v4253_v60 = vadd.f32 %v4252_v15, %v4251_v45  ;;  %4192 = vst.msk [vmem:[%s6811_s15 + $0x60] sm:$0xf] %vm4167_vm7, %v4864_v25  ;;  %v4367_v34 = vsel %vm4204_vm8, %v4308_v16, 0.0  ;;  %v4311_v40 = vmul.f32 %v4014_v35, %v4014_v35  ;;  %v4258_v17 = vsel %vm4204_vm8, %v4014_v35, 0.0 }
 0x22c   : > { %v3704_v61 = vpop.f32.mrb[29].mxu0  ;;  %v4366_v22 = vadd.f32 %v4365_v32, %v4364_v36  ;;  %4195 = vst.msk [vmem:[%s6811_s15 + $0x6c] sm:$0xf] %vm4167_vm7, %v4867_v63  ;;  %v5419_v23 = vadd.f32 %v5383_v59, %v6956_v4  ;;  %v4865_v12 = vpack.c.bf16 %v4012_v1, %v4012_v1  ;;  %v4254_v52 = vsel %vm4204_vm8, %v4012_v1, 0.0 }
 0x22d   : > { %v5384_v9 = vpop.f32.mrb[30].mxu0  ;;  %v5420_v0 = vadd.f32 %v3704_v61, %v6962_v24  ;;  %v4255_v50 = vadd.f32 %v4254_v52, %v4253_v60  ;;  %v4309_v14 = vmul.f32 %v4012_v1, %v4012_v1  ;;  %v4371_v33 = vsel %vm4204_vm8, %v4310_v31, 0.0  ;;  %v3985_v61 = vpop.permute.xlu1 %3984 }
 0x22e   : > { %v3707_v29 = vpop.f32.mrb[31].mxu0  ;;  %v5421_v7 = vadd.f32 %v5384_v9, %v6968_v10  ;;  %v4368_v11 = vadd.f32 %v4367_v34, %v4366_v22  ;;  %v4017_v48 = vmul.f32 %v5419_v23, %v3960_v2  ;;  %4193 = vst.msk [vmem:[%s6811_s15 + $0x64] sm:$0xf] %vm4167_vm7, %v4865_v12  ;;  %v3970_v10 = vpop.permute.xlu0 %3969  ;;  %v4373_v56 = vsel %vm4204_vm8, %v4311_v40, 0.0 }
 0x22f   : > { %v5422_v55 = vadd.f32 %v3707_v29, %v6971_v37  ;;  %v4015_v27 = vmul.f32 %v5420_v0, %v3950_v26  ;;  %v4257_v47 = vadd.f32 %v4256_v3, %v4255_v50  ;;  %v4369_v37 = vsel %vm4204_vm8, %v4309_v14, 0.0 }
 0x230   : > { %v4018_v4 = vmul.f32 %v5421_v7, %v3965_v38  ;;  %v4870_v42 = vpack.c.bf16 %v4017_v48, %v4017_v48  ;;  %v4370_v5 = vadd.f32 %v4369_v37, %v4368_v11  ;;  %v4314_v35 = vmul.f32 %v4017_v48, %v4017_v48 }
 0x231   : > { %v4016_v24 = vmul.f32 %v5422_v55, %v3955_v49  ;;  %v4868_v26 = vpack.c.bf16 %v4015_v27, %v4015_v27  ;;  %v4260_v30 = vsel %vm4204_vm8, %v4015_v27, 0.0  ;;  %v4259_v49 = vadd.f32 %v4258_v17, %v4257_v47 }
 0x232   : > { %4198 = vst.msk [vmem:[%s6811_s15 + $0x78] sm:$0xf] %vm4167_vm7, %v4870_v42  ;;  %v4312_v44 = vmul.f32 %v4015_v27, %v4015_v27  ;;  %v4871_v19 = vpack.c.bf16 %v4018_v4, %v4018_v4  ;;  %v4372_v51 = vadd.f32 %v4371_v33, %v4370_v5  ;;  %v3980_v59 = vpop.permute.xlu0 %3979  ;;  %v4264_v2 = vsel %vm4204_vm8, %v4017_v48, 0.0 }
 0x233   : > { %v5387_v6 = vpop.f32.mrb[32].mxu0  ;;  %4196 = vst.msk [vmem:[%s6811_s15 + $0x70] sm:$0xf] %vm4167_vm7, %v4868_v26  ;;  %v4869_v13 = vpack.c.bf16 %v4016_v24, %v4016_v24  ;;  %v4261_v58 = vadd.f32 %v4260_v30, %v4259_v49  ;;  %v4262_v62 = vsel %vm4204_vm8, %v4016_v24, 0.0  ;;  %v4313_v57 = vmul.f32 %v4016_v24, %v4016_v24 }
 0x234   : > { %v3720_v54 = vpop.f32.mrb[33].mxu0  ;;  %v4375_v43 = vsel %vm4204_vm8, %v4312_v44, 0.0  ;;  %4199 = vst.msk [vmem:[%s6811_s15 + $0x7c] sm:$0xf] %vm4167_vm7, %v4871_v19  ;;  %v4374_v53 = vadd.f32 %v4373_v56, %v4372_v51  ;;  %v5423_v8 = vadd.f32 %v5387_v6, %v6986_v18  ;;  %v4315_v9 = vmul.f32 %v4018_v4, %v4018_v4 }
 0x235   : > { %v5388_v20 = vpop.f32.mrb[34].mxu0  ;;  %4197 = vst.msk [vmem:[%s6811_s15 + $0x74] sm:$0xf] %vm4167_vm7, %v4869_v13  ;;  %v5424_v45 = vadd.f32 %v3720_v54, %v6992_v21  ;;  %v4263_v36 = vadd.f32 %v4262_v62, %v4261_v58  ;;  %v4377_v25 = vsel %vm4204_vm8, %v4313_v57, 0.0  ;;  %v4379_v22 = vsel %vm4204_vm8, %v4314_v35, 0.0 }
 0x236   : > { %v3723_v46 = vpop.f32.mrb[35].mxu0  ;;  %v5425_v15 = vadd.f32 %v5388_v20, %v6998_v41  ;;  %v4376_v32 = vadd.f32 %v4375_v43, %v4374_v53  ;;  %v4021_v60 = vmul.f32 %v5423_v8, %v3980_v59  ;;  %v4266_v34 = vsel %vm4204_vm8, %v4018_v4, 0.0 }
 0x237   : > { %v5426_v16 = vadd.f32 %v3723_v46, %v7002_v39  ;;  %v4019_v63 = vmul.f32 %v5424_v45, %v3970_v10  ;;  %v4265_v18 = vadd.f32 %v4264_v2, %v4263_v36  ;;  %v4381_v31 = vsel %vm4204_vm8, %v4315_v9, 0.0 }
 0x238   : > { %v4022_v38 = vmul.f32 %v5425_v15, %v3985_v61  ;;  %v4378_v41 = vadd.f32 %v4377_v25, %v4376_v32  ;;  %v4874_v1 = vpack.c.bf16 %v4021_v60, %v4021_v60  ;;  %v4318_v27 = vmul.f32 %v4021_v60, %v4021_v60 }
 0x239   : > { %v4020_v21 = vmul.f32 %v5426_v16, %v3975_v28  ;;  %v4872_v39 = vpack.c.bf16 %v4019_v63, %v4019_v63  ;;  %v4267_v29 = vadd.f32 %v4266_v34, %v4265_v18  ;;  %v4268_v23 = vsel %vm4204_vm8, %v4019_v63, 0.0 }
 0x23a   : > { %v4316_v0 = vmul.f32 %v4019_v63, %v4019_v63  ;;  %v4380_v7 = vadd.f32 %v4379_v22, %v4378_v41  ;;  %4202 = vst.msk [vmem:[%s6811_s15 + $0x88] sm:$0xf] %vm4167_vm7, %v4874_v1  ;;  %v4875_v55 = vpack.c.bf16 %v4022_v38, %v4022_v38  ;;  %v4272_v40 = vsel %vm4204_vm8, %v4021_v60, 0.0 }
 0x23b   : > { %4200 = vst.msk [vmem:[%s6811_s15 + $0x80] sm:$0xf] %vm4167_vm7, %v4872_v39  ;;  %v4269_v11 = vadd.f32 %v4268_v23, %v4267_v29  ;;  %v4873_v52 = vpack.c.bf16 %v4020_v21, %v4020_v21  ;;  %v4270_v14 = vsel %vm4204_vm8, %v4020_v21, 0.0  ;;  %v4317_v48 = vmul.f32 %v4020_v21, %v4020_v21 }
 0x23c   : > { %v4383_v12 = vsel %vm4204_vm8, %v4316_v0, 0.0  ;;  %v4382_v50 = vadd.f32 %v4381_v31, %v4380_v7  ;;  %4203 = vst.msk [vmem:[%s6811_s15 + $0x8c] sm:$0xf] %vm4167_vm7, %v4875_v55  ;;  %v4319_v10 = vmul.f32 %v4022_v38, %v4022_v38  ;;  %v4274_v37 = vsel %vm4204_vm8, %v4022_v38, 0.0 }
 0x23d   : > { %4201 = vst.msk [vmem:[%s6811_s15 + $0x84] sm:$0xf] %vm4167_vm7, %v4873_v52  ;;  %v4271_v3 = vadd.f32 %v4270_v14, %v4269_v11  ;;  %v4385_v24 = vsel %vm4204_vm8, %v4317_v48, 0.0  ;;  %v4387_v6 = vsel %vm4204_vm8, %v4318_v27, 0.0 }
 0x23e   : > { %v4384_v4 = vadd.f32 %v4383_v12, %v4382_v50  ;;  %v4389_v5 = vsel %vm4204_vm8, %v4319_v10, 0.0 }
 0x23f   : > { %v4273_v47 = vadd.f32 %v4272_v40, %v4271_v3 }
 0x240   : > { %v4386_v42 = vadd.f32 %v4385_v24, %v4384_v4 }
 0x241   : > { %v4275_v28 = vadd.f32 %v4274_v37, %v4273_v47 }
 0x242   : > { %v4388_v17 = vadd.f32 %v4387_v6, %v4386_v42 }
 0x243   : > { %v4276_v26 = vrot.slane %v4275_v28, 4 }
 0x244   : > { %v4390_v30 = vadd.f32 %v4389_v5, %v4388_v17 }
 0x245   : > { %v4277_v54 = vadd.f32 %v4276_v26, %v4275_v28 }
 0x246   : > { %v4391_v33 = vrot.slane %v4390_v30, 4 }
 0x247   : > { %v4278_v49 = vrot.slane %v4277_v54, 2 }
 0x248   : > { %v4392_v44 = vadd.f32 %v4391_v33, %v4390_v30 }
 0x249   : > { %v4279_v19 = vadd.f32 %v4278_v49, %v4277_v54 }
 0x24a   : > { %v4393_v20 = vrot.slane %v4392_v44, 2 }
 0x24b   : > { %v4280_v56 = vrot.slane %v4279_v19, 1 }
 0x24c   : > { %v4394_v51 = vadd.f32 %v4393_v20, %v4392_v44 }
 0x24d   : > { %v4281_v13 = vadd.f32 %v4280_v56, %v4279_v19 }
 0x24e   : > { %v4395_v46 = vrot.slane %v4394_v51, 1 }
 0x24f   : > { %4283 = vst.msk [vmem:[%s288_s22] sm:$0x1] %vm4282_vm9, %v4281_v13 }
 0x250   : > { %v4396_v58 = vadd.f32 %v4395_v46, %v4394_v51 }
 0x252   : > { %4397 = vst.msk [vmem:[%s294_s25] sm:$0x1] %vm4282_vm9, %v4396_v58 }
 0x253 PF: > { %s16_s20 = sadd.s32 1, %s5812_s20   ;;  %s7088_s18 = smov %s5808_s19 }
 0x254   : > { %p13_p5 = scmp.ge.s32.totalorder %s16_s20, 4   ;;  %s7089_s19 = smov %s7091_s21 }
 0x256   :  { %15 = sbr.rel (!%p13_p5) target bundleno = 2 (0x2), region = 89 }

// kernel: vgg_block_forward.6
= control target key start
LH: loop header
LB: loop body
LE: loop exit
PB: predicated region body
PF: predicated region fallthrough
CT: control target
= control target key end

     0   :  { %s6251_s18 = smov 0   ;;  %s6253_s19 = smov 0   ;;  %s7354_s0 = inlined_call_operand.vmem [shape: bf16[2,342,64], index: 0, kind: input, shape index: {}]   ;;  %s7355_s1 = inlined_call_operand.vmem [shape: bf16[576,128], index: 1, kind: input, shape index: {}]   ;;  %s7356_s2 = inlined_call_operand.vmem [shape: f32[288,1], index: 2, kind: input, shape index: {}]   ;;  %s7357_s3 = inlined_call_operand.vmem [shape: bf16[2,288,128], index: 3, kind: output, shape index: {0}]   ;;  %s7358_s4 = inlined_call_operand.vmem [shape: f32[2,1,128], index: 4, kind: output, shape index: {1}]   ;;  %s7359_s5 = inlined_call_operand.vmem [shape: f32[2,1,128], index: 5, kind: output, shape index: {2}]  }
   0x1   :  { %s6255_s20 = smov 0  }
   0x2 LB: > { %s28_s21 = sadd.s32 1, %s6214_s19  ;;  %p4707_p0 = scmp.ge.s32.totalorder %s6218_s20, 1  ;;  %s6218_s20 = sphi %s6255_s20, %s16_s20   ;;  %s6214_s19 = sphi %s6253_s19, %s7361_s19   ;;  %s6210_s18 = sphi %s6251_s18, %s7360_s18  }
   0x3   : > { %p30_p1 = scmp.ge.s32.totalorder %s28_s21, 2  ;;  %p219_p2 = scmp.lt.s32.totalorder %s6218_s20, 3 }
   0x5   : > { %s7363_s21 = smov (%p30_p1, %s28_s21), 0  ;;  %p220_p3 = pnand %p4707_p0, %p219_p2 }
   0x6   : > { %v6070_v0 = vld [vmem:[%s7355_s1 + $0x20] sm:$0xff] (!%p220_p3)   ;;  %p266_p4 = scmp.lt.s32.totalorder (!%p220_p3), %s6210_s18, 1  ;;  %v6072_v2 = vld [vmem:[%s7355_s1 + $0x28] sm:$0xff] (!%p220_p3)   ;;  %v6074_v4 = vld [vmem:[%s7355_s1 + $0x30] sm:$0xff] (!%p220_p3)   ;;  %vm615_vm0 = vcmask (!%p220_p3), 523264   ;;  %vm2377_vm3 = vcmask (!%p220_p3), 1045504  }
   0x7   : > { %223 = sbr.rel (%p220_p3) target bundleno = 591 (0x24f), region = 32  ;;  %v6071_v1 = vld [vmem:[%s7355_s1 + $0x80] sm:$0xff] (!%p220_p3)   ;;  %5349 = vmatprep.subr.bf16.mxu1 (!%p220_p3), %v6070_v0  ;;  %v6073_v3 = vld [vmem:[%s7355_s1 + $0x88] sm:$0xff] (!%p220_p3)   ;;  %v6075_v5 = vld [vmem:[%s7355_s1 + $0x90] sm:$0xff] (!%p220_p3)   ;;  %vm442_vm1 = vsmask.f32 (!%p220_p3), 7424 }
   0x8   : > { %5525 = vmatprep.subr.bf16.mxu0 (!%p220_p3), %v6071_v1  ;;  %5350 = vmatpush3.bf16.msra.mxu1 (!%p220_p3), %v6070_v0  ;;  %v6076_v6 = vld [vmem:[%s7355_s1 + $0x38] sm:$0xff] (!%p220_p3)   ;;  %vm1903_vm2 = vsmask.f32 (!%p220_p3), 6400  ;;  %v6084_v38 = vld [vmem:[%s7355_s1 + $0xa0] sm:$0xff] (!%p220_p3)   ;;  %v6090_v61 = vld [vmem:[%s7355_s1 + $0xa8] sm:$0xff] (!%p220_p3)   ;;  %vm1096_vm4 = vcmask (!%p220_p3), 1046528  }
   0x9   : > { %5526 = vmatpush3.bf16.msra.mxu0 (!%p220_p3), %v6071_v1  ;;  %5351 = vmatprep.subr.bf16.mxu1 (!%p220_p3), %v6072_v2  ;;  %v6077_v7 = vld [vmem:[%s7355_s1 + $0x98] sm:$0xff] (!%p220_p3)   ;;  %v6088_v56 = vld [vmem:[%s7355_s1] sm:$0xff] (!%p220_p3)   ;;  %vm3184_vm5 = vsmask.f32 (!%p220_p3), 5376  ;;  %vm3658_vm6 = vcmask (!%p220_p3), 1044480  }
   0xa   : > { %5527 = vmatprep.subr.bf16.mxu0 (!%p220_p3), %v6073_v3 }
   0xc   : > { %5352 = vmatpush3.bf16.msra.mxu1 (!%p220_p3), %v6072_v2 }
   0xd   : > { %5528 = vmatpush3.bf16.msra.mxu0 (!%p220_p3), %v6073_v3  ;;  %5353 = vmatprep.subr.bf16.mxu1 (!%p220_p3), %v6074_v4 }
   0xe   : > { %s7365_s18 = smov (!%p266_p4, %s6210_s18), 1  ;;  %5529 = vmatprep.subr.bf16.mxu0 %v6075_v5 }
   0xf   : > { %s6041_s7 = smul.u32 172, %s7365_s18  ;;  %s288_s22 = scalar_lea.vmem %s7358_s4, %s7365_s18 }
  0x10   : > { %5354 = vmatpush3.bf16.msra.mxu1 %v6074_v4  ;;  %s294_s25 = scalar_lea.vmem %s7359_s5, %s7365_s18 }
  0x11   : > { %s6296_s14 = scalar_lea.vmem %s7354_s0, %s6041_s7  ;;  %5530 = vmatpush3.bf16.msra.mxu0 %v6075_v5  ;;  %5355 = vmatprep.subr.bf16.mxu1 %v6076_v6 }
  0x12   : > { %v296_v8 = vld [vmem:[%s6296_s14] sm:$0xf]  ;;  %v297_v9 = vld [vmem:[%s6296_s14 + $0x4] sm:$0xf]  ;;  %v6306_v11 = vld [vmem:[%s6296_s14 + $0x8] sm:$0xff]   ;;  %5531 = vmatprep.subr.bf16.mxu0 %v6077_v7 }
  0x13   : > { %v6303_v10 = vcombine.low %v296_v8, %v297_v9  ;;  %v6309_v12 = vld [vmem:[%s6296_s14 + $0x10] sm:$0xff]   ;;  %v1425_v13 = vld [vmem:[%s6296_s14 + $0x8] sm:$0xe]  ;;  %v6313_v14 = vld [vmem:[%s6296_s14 + $0xc] sm:$0xf]  ;;  %v451_v17 = vshll.u32 %v6306_v11, 16 }
  0x14   : > { %v455_v18 = vshrl.u32 %v6306_v11, 16  ;;  %v6320_v19 = vcombine.low %v1425_v13, %v6313_v14  ;;  %v1913_v20 = vshrl.u32 %v6309_v12, 16  ;;  %v1916_v21 = vshll.u32 %v6309_v12, 16  ;;  %v6325_v24 = vld [vmem:[%s6296_s14 + $0x10] sm:$0xff]   ;;  %v6328_v25 = vld [vmem:[%s6296_s14 + $0x18] sm:$0xff]   ;;  %5356 = vmatpush3.bf16.msra.mxu1 %v6076_v6  ;;  %v6345_v46 = vld [vmem:[%s6296_s14 + $0x20] sm:$0xff]  }
  0x15   : > { %v444_v15 = vshrl.u32 %v6303_v10, 16  ;;  %v446_v16 = vshll.u32 %v6303_v10, 16  ;;  %v453_v23 = vrot.slane %v451_v17, 1  ;;  %v459_v32 = vshll.u32 %v6325_v24, 16  ;;  %5532 = vmatpush3.bf16.msra.mxu0 %v6077_v7  ;;  %v6341_v44 = vld [vmem:[%s6296_s14 + $0x18] sm:$0xff]   ;;  %v6352_v52 = vld [vmem:[%s6296_s14 + $0x20] sm:$0xff]   ;;  %5393 = vmatprep.subr.bf16.mxu1 %v6088_v56 }
  0x16   : > { %v1905_v26 = vshrl.u32 %v6320_v19, 16  ;;  %v1908_v27 = vshll.u32 %v6320_v19, 16  ;;  %v1915_v28 = vrot.slane %v1913_v20, 1  ;;  %v1918_v29 = vrot.slane %v1916_v21, 2  ;;  %5569 = vmatprep.subr.bf16.mxu0 %v6084_v38  ;;  %v6364_v60 = vld [vmem:[%s6296_s14 + $0x28] sm:$0xff]   ;;  %v6379_v8 = vld [vmem:[%s6296_s14 + $0x30] sm:$0xff]  }
  0x17   : > { %v448_v22 = vrot.slane %v446_v16, 1  ;;  %v457_v31 = vor.u32 %v455_v18, %v453_v23  ;;  %v1922_v33 = vshrl.u32 %v6328_v25, 16  ;;  %v1925_v37 = vshll.u32 %v6328_v25, 16  ;;  %v6375_v6 = vld [vmem:[%s6296_s14 + $0x28] sm:$0xff]  }
  0x18   : > { %v1907_v34 = vrot.slane %v1905_v26, 1  ;;  %v1910_v35 = vrot.slane %v1908_v27, 2  ;;  %v1919_v36 = vor.u32 %v1918_v29, %v1915_v28  ;;  %v461_v40 = vrot.slane %v459_v32, 1  ;;  %v6394_v29 = vld [vmem:[%s6296_s14 + $0x38] sm:$0xff]  }
  0x19   : > { %v449_v30 = vor.u32 %v448_v22, %v444_v15  ;;  %v1924_v41 = vrot.slane %v1922_v33, 1  ;;  %v1927_v43 = vrot.slane %v1925_v37, 2  ;;  %v463_v45 = vshrl.u32 %v6325_v24, 16  ;;  %v6383_v15 = vld [vmem:[%s6296_s14 + $0x30] sm:$0xff]  }
  0x1a   : > { %v1911_v42 = vor.u32 %v1910_v35, %v1907_v34  ;;  %v462_v47 = vsel %vm442_vm1, %v457_v31, %v461_v40  ;;  %v467_v51 = vshll.u32 %v6341_v44, 16  ;;  %v1931_v53 = vshrl.u32 %v6345_v46, 16  ;;  %v6095_v33 = vld [vmem:[%s7355_s1 + $0xb0] sm:$0xff]  }
  0x1b   : > { %v454_v39 = vsel %vm442_vm1, %v449_v30, %v453_v23  ;;  %v1928_v49 = vor.u32 %v1927_v43, %v1924_v41  ;;  %v465_v50 = vor.u32 %v463_v45, %v461_v40  ;;  %v1934_v54 = vshll.u32 %v6345_v46, 16  ;;  %v6413_v43 = vld [vmem:[%s6296_s14 + $0x40] sm:$0xff]  }
  0x1c   : > { %5357 = vmatprep.mubr.msk.bf16.mxu1 %vm615_vm0, %v454_v39  ;;  %v1920_v48 = vsel %vm1903_vm2, %v1911_v42, %v1919_v36  ;;  %v471_v55 = vshrl.u32 %v6341_v44, 16  ;;  %v469_v58 = vrot.slane %v467_v51, 1  ;;  %v475_v59 = vshll.u32 %v6352_v52, 16  ;;  %v6410_v42 = vld [vmem:[%s6296_s14 + $0x40] sm:$0xff]  }
  0x1d   : > { %5358 = vmatmul.mubr.msk.bf16.vlgmr.msra.gmra.mrb[0].mxu1 %vm615_vm0, %v462_v47  ;;  %5533 = vmatprep.mubr.msk.bf16.mxu0 %vm615_vm0, %v1920_v48  ;;  %v1929_v57 = vsel %vm1903_vm2, %v1919_v36, %v1928_v49  ;;  %v1933_v62 = vrot.slane %v1931_v53, 1  ;;  %v1936_v63 = vrot.slane %v1934_v54, 2  ;;  %v1940_v3 = vshrl.u32 %v6364_v60, 16 }
  0x1e   : > { %5534 = vmatmul.mubr.msk.bf16.vlgmr.msra.gmra.mrb[0].mxu0 %vm615_vm0, %v1929_v57  ;;  %v470_v0 = vsel %vm442_vm1, %v465_v50, %v469_v58  ;;  %v473_v1 = vor.u32 %v471_v55, %v469_v58  ;;  %v477_v2 = vrot.slane %v475_v59, 1  ;;  %5394 = vmatpush3.bf16.msra.mxu1 %v6088_v56  ;;  %v1943_v5 = vshll.u32 %v6364_v60, 16  ;;  %v6424_v58 = vld [vmem:[%s6296_s14 + $0x48] sm:$0xff]  }
  0x1f   : > { %5570 = vmatpush3.bf16.msra.mxu0 %v6084_v38  ;;  %5361 = vmatprep.mubr.msk.bf16.mxu1 %vm615_vm0, %v470_v0  ;;  %v1937_v4 = vor.u32 %v1936_v63, %v1933_v62  ;;  %v479_v7 = vshrl.u32 %v6352_v52, 16  ;;  %v1942_v13 = vrot.slane %v1940_v3, 1  ;;  %v483_v20 = vshll.u32 %v6375_v6, 16  ;;  %v6403_v38 = vld [vmem:[%s6296_s14 + $0x38] sm:$0xff]   ;;  %v6100_v59 = vld [vmem:[%s7355_s1 + $0x8] sm:$0xff]  }
  0x20   : > { %5571 = vmatprep.subr.bf16.mxu0 %v6090_v61  ;;  %v478_v9 = vsel %vm442_vm1, %v473_v1, %v477_v2  ;;  %v1945_v17 = vrot.slane %v1943_v5, 2  ;;  %v1949_v21 = vshrl.u32 %v6379_v8, 16  ;;  %v1952_v22 = vshll.u32 %v6379_v8, 16  ;;  %v6101_v63 = vld [vmem:[%s7355_s1 + $0xb8] sm:$0xff]   ;;  %5395 = vmatprep.subr.bf16.mxu1 %v6100_v59 }
  0x21   : > { %v1938_v16 = vsel %vm1903_vm2, %v1928_v49, %v1937_v4  ;;  %v481_v18 = vor.u32 %v479_v7, %v477_v2  ;;  %v487_v23 = vshrl.u32 %v6375_v6, 16  ;;  %v491_v26 = vshll.u32 %v6383_v15, 16 }
  0x22   : > { %5537 = vmatprep.mubr.msk.bf16.mxu0 %vm615_vm0, %v1938_v16  ;;  %v1946_v27 = vor.u32 %v1945_v17, %v1942_v13  ;;  %v485_v28 = vrot.slane %v483_v20, 1  ;;  %v1951_v30 = vrot.slane %v1949_v21, 1  ;;  %v1954_v31 = vrot.slane %v1952_v22, 2  ;;  %5396 = vmatpush3.bf16.msra.mxu1 %v6100_v59  ;;  %v6439_v13 = vld [vmem:[%s6296_s14 + $0x48] sm:$0xff]   ;;  %v6445_v21 = vld [vmem:[%s6296_s14 + $0x50] sm:$0xff]  }
  0x23   : > { %5572 = vmatpush3.bf16.msra.mxu0 %v6090_v61  ;;  %v493_v32 = vrot.slane %v491_v26, 1  ;;  %v1958_v37 = vshrl.u32 %v6394_v29, 16  ;;  %v1961_v40 = vshll.u32 %v6394_v29, 16  ;;  %v495_v41 = vshrl.u32 %v6383_v15, 16  ;;  %v6448_v22 = vld [vmem:[%s6296_s14 + $0x50] sm:$0xff]  }
  0x24   : > { %v1947_v34 = vsel %vm1903_vm2, %v1937_v4, %v1946_v27  ;;  %v486_v35 = vsel %vm442_vm1, %v481_v18, %v485_v28  ;;  %v489_v36 = vor.u32 %v487_v23, %v485_v28  ;;  %v1955_v39 = vor.u32 %v1954_v31, %v1951_v30  ;;  %5573 = vmatprep.subr.bf16.mxu0 %v6095_v33 }
  0x25   : > { %5362 = vmatmul.mubr.msk.bf16.gmra.mrb[4].mxu1 %vm615_vm0, %v478_v9  ;;  %v1960_v47 = vrot.slane %v1958_v37, 1  ;;  %v499_v48 = vshll.u32 %v6403_v38, 16  ;;  %v1963_v50 = vrot.slane %v1961_v40, 2  ;;  %v497_v51 = vor.u32 %v495_v41, %v493_v32 }
  0x26   : > { %5538 = vmatmul.mubr.msk.bf16.gmra.mrb[4].mxu0 %vm615_vm0, %v1947_v34  ;;  %5365 = vmatprep.mubr.msk.bf16.mxu1 %vm615_vm0, %v486_v35  ;;  %v494_v45 = vsel %vm442_vm1, %v489_v36, %v493_v32  ;;  %v1956_v49 = vsel %vm1903_vm2, %v1946_v27, %v1955_v39  ;;  %v1967_v53 = vshrl.u32 %v6410_v42, 16  ;;  %v1970_v55 = vshll.u32 %v6410_v42, 16  ;;  %v6458_v34 = vld [vmem:[%s6296_s14 + $0x58] sm:$0xff]  }
  0x27   : > { %5574 = vmatpush3.bf16.msra.mxu0 %v6095_v33  ;;  %5541 = vmatprep.mubr.msk.bf16.mxu0 %vm615_vm0, %v1956_v49  ;;  %v501_v54 = vrot.slane %v499_v48, 1  ;;  %v503_v56 = vshrl.u32 %v6403_v38, 16  ;;  %v507_v57 = vshll.u32 %v6413_v43, 16  ;;  %v1964_v61 = vor.u32 %v1963_v50, %v1960_v47  ;;  %v6461_v36 = vld [vmem:[%s6296_s14 + $0x58] sm:$0xff]   ;;  %v6467_v47 = vld [vmem:[%s6296_s14 + $0x60] sm:$0xff]  }
  0x28   : > { %v1969_v62 = vrot.slane %v1967_v53, 1  ;;  %v1972_v1 = vrot.slane %v1970_v55, 2  ;;  %v1976_v5 = vshrl.u32 %v6424_v58, 16  ;;  %v1979_v7 = vshll.u32 %v6424_v58, 16  ;;  %5575 = vmatprep.subr.bf16.mxu0 %v6101_v63 }
  0x29   : > { %v502_v0 = vsel %vm442_vm1, %v497_v51, %v501_v54  ;;  %v505_v2 = vor.u32 %v503_v56, %v501_v54  ;;  %v509_v3 = vrot.slane %v507_v57, 1  ;;  %v1965_v4 = vsel %vm1903_vm2, %v1955_v39, %v1964_v61 }
  0x2a   : > { %v1973_v9 = vor.u32 %v1972_v1, %v1969_v62  ;;  %v511_v16 = vshrl.u32 %v6413_v43, 16  ;;  %v1978_v18 = vrot.slane %v1976_v5, 1  ;;  %v1981_v20 = vrot.slane %v1979_v7, 2  ;;  %v6109_v62 = vld [vmem:[%s7355_s1 + $0xc0] sm:$0xff]  }
  0x2b   : > { %v510_v17 = vsel %vm442_vm1, %v505_v2, %v509_v3  ;;  %v515_v27 = vshll.u32 %v6439_v13, 16  ;;  %5576 = vmatpush3.bf16.msra.mxu0 %v6101_v63  ;;  %v519_v28 = vshrl.u32 %v6439_v13, 16  ;;  %v1985_v31 = vshrl.u32 %v6445_v21, 16 }
  0x2c   : > { %v1974_v23 = vsel %vm1903_vm2, %v1964_v61, %v1973_v9  ;;  %v513_v26 = vor.u32 %v511_v16, %v509_v3  ;;  %v1982_v30 = vor.u32 %v1981_v20, %v1978_v18  ;;  %v1988_v32 = vshll.u32 %v6445_v21, 16  ;;  %v6487_v3 = vld [vmem:[%s6296_s14 + $0x68] sm:$0xff]   ;;  %5613 = vmatprep.subr.bf16.mxu0 %v6109_v62  ;;  %v6499_v20 = vld [vmem:[%s6296_s14 + $0x70] sm:$0xff]  }
  0x2d   : > { %5366 = vmatmul.mubr.msk.bf16.gmra.mrb[8].mxu1 %vm615_vm0, %v494_v45  ;;  %v523_v33 = vshll.u32 %v6448_v22, 16  ;;  %v517_v35 = vrot.slane %v515_v27, 1  ;;  %v1987_v39 = vrot.slane %v1985_v31, 1  ;;  %v2365_v45 = vld [vmem:[%s6296_s14 + $0x8] sm:$0xc]  ;;  %v1994_v50 = vshrl.u32 %v6458_v34, 16 }
  0x2e   : > { %5369 = vmatprep.mubr.msk.bf16.mxu1 %vm615_vm0, %v502_v0  ;;  %5542 = vmatmul.mubr.msk.bf16.gmra.mrb[8].mxu0 %vm615_vm0, %v1965_v4  ;;  %v1983_v37 = vsel %vm1903_vm2, %v1973_v9, %v1982_v30  ;;  %v1990_v40 = vrot.slane %v1988_v32, 2  ;;  %v1997_v51 = vshll.u32 %v6458_v34, 16  ;;  %v527_v54 = vshrl.u32 %v6448_v22, 16  ;;  %v6506_v31 = vld [vmem:[%s6296_s14 + $0x78] sm:$0xff]  }
  0x2f   : > { %5545 = vmatprep.mubr.msk.bf16.mxu0 %vm615_vm0, %v1974_v23  ;;  %v525_v41 = vrot.slane %v523_v33, 1  ;;  %v518_v48 = vsel %vm442_vm1, %v513_v26, %v517_v35  ;;  %v521_v49 = vor.u32 %v519_v28, %v517_v35  ;;  %v531_v55 = vshll.u32 %v6461_v36, 16  ;;  %v6116_v35 = vld [vmem:[%s7355_s1 + $0x18] sm:$0xff]  }
  0x30   : > { %v1991_v53 = vor.u32 %v1990_v40, %v1987_v39  ;;  %v4860_v56 = vcombine.low %v2365_v45, %v6313_v14  ;;  %v1996_v59 = vrot.slane %v1994_v50, 1  ;;  %v1999_v61 = vrot.slane %v1997_v51, 2  ;;  %v6110_v14 = vld [vmem:[%s7355_s1 + $0x10] sm:$0xff]   ;;  %v6115_v50 = vld [vmem:[%s7355_s1 + $0xc8] sm:$0xff]  }
  0x31   : > { %v526_v57 = vsel %vm442_vm1, %v521_v49, %v525_v41  ;;  %v529_v0 = vor.u32 %v527_v54, %v525_v41  ;;  %v533_v1 = vrot.slane %v531_v55, 1  ;;  %v2379_v2 = vrot.slane %v6309_v12, 2  ;;  %5397 = vmatprep.subr.bf16.mxu1 %v6110_v14  ;;  %v6523_v49 = vld [vmem:[%s6296_s14 + $0x80] sm:$0xff]  }
  0x32   : > { %v1992_v63 = vsel %vm1903_vm2, %v1982_v30, %v1991_v53  ;;  %v6490_v4 = vor.u32 %v1999_v61, %v1996_v59  ;;  %v2378_v5 = vrot.slane %v4860_v56, 2  ;;  %v535_v7 = vshrl.u32 %v6461_v36, 16  ;;  %5398 = vmatpush3.bf16.msra.mxu1 %v6110_v14 }
  0x33   : > { %v539_v9 = vshll.u32 %v6467_v47, 16  ;;  %v534_v12 = vsel %vm442_vm1, %v529_v0, %v533_v1  ;;  %v543_v16 = vshrl.u32 %v6467_v47, 16  ;;  %v2381_v32 = vrot.slane %v6328_v25, 2  ;;  %5399 = vmatprep.subr.bf16.mxu1 %v6116_v35 }
  0x34   : > { %v2001_v23 = vsel %vm1903_vm2, %v1991_v53, %v6490_v4  ;;  %v537_v26 = vor.u32 %v535_v7, %v533_v1  ;;  %v2380_v27 = vsel %vm2377_vm3, %v2378_v5, %v2379_v2  ;;  %v555_v33 = vshll.u32 %v6499_v20, 16  ;;  %v6531_v53 = vld [vmem:[%s6296_s14 + $0x88] sm:$0xff]   ;;  %v6554_v5 = vld [vmem:[%s6296_s14 + $0x90] ss:$0 sps:$4 sm:$0x11]  }
  0x35   : > { %5370 = vmatmul.mubr.msk.bf16.gmra.mrb[12].mxu1 %vm615_vm0, %v510_v17  ;;  %v547_v17 = vshll.u32 %v6487_v3, 16  ;;  %v541_v18 = vrot.slane %v539_v9, 1  ;;  %v2383_v39 = vrot.slane %v6345_v46, 2  ;;  %v551_v40 = vshrl.u32 %v6487_v3, 16 }
  0x36   : > { %5373 = vmatprep.mubr.msk.bf16.mxu1 %vm615_vm0, %v518_v48  ;;  %5546 = vmatmul.mubr.msk.bf16.gmra.mrb[12].mxu0 %vm615_vm0, %v1983_v37  ;;  %v559_v45 = vshrl.u32 %v6499_v20, 16  ;;  %v563_v25 = vshll.u32 %v6506_v31, 16  ;;  %v557_v48 = vrot.slane %v555_v33, 1  ;;  %v2382_v46 = vsel %vm2377_vm3, %v2379_v2, %v2381_v32  ;;  %v6574_v33 = vld [vmem:[%s7355_s1 + $0xe0] sm:$0xff]  }
  0x37   : > { %5549 = vmatprep.mubr.msk.bf16.mxu0 %vm615_vm0, %v1992_v63  ;;  %v545_v28 = vor.u32 %v543_v16, %v541_v18  ;;  %v549_v30 = vrot.slane %v547_v17, 1  ;;  %v542_v37 = vsel %vm442_vm1, %v537_v26, %v541_v18  ;;  %5400 = vmatpush3.bf16.msra.mxu1 %v6116_v35  ;;  %v2384_v54 = vsel %vm2377_vm3, %v2381_v32, %v2383_v39  ;;  %v6125_v18 = vld [vmem:[%s7355_s1 + $0xd8] sm:$0xff]  }
  0x38   : > { %v561_v55 = vor.u32 %v559_v45, %v557_v48  ;;  %v565_v56 = vrot.slane %v563_v25, 1  ;;  %v2385_v59 = vrot.slane %v6364_v60, 2  ;;  %v2387_v61 = vrot.slane %v6379_v8, 2  ;;  %v6119_v8 = vld [vmem:[%s7355_s1 + $0xd0] sm:$0xff]  }
  0x39   : > { %v550_v41 = vsel %vm442_vm1, %v545_v28, %v549_v30  ;;  %v553_v51 = vor.u32 %v551_v40, %v549_v30  ;;  %v571_v63 = vshll.u32 %v6523_v49, 16  ;;  %v567_v1 = vshrl.u32 %v6506_v31, 16 }
  0x3a   : > { %v575_v2 = vshrl.u32 %v6523_v49, 16  ;;  %v566_v14 = vsel %vm442_vm1, %v561_v55, %v565_v56  ;;  %v579_v60 = vshll.u32 %v6531_v53, 16  ;;  %v2386_v7 = vsel %vm2377_vm3, %v2383_v39, %v2385_v59  ;;  %v6141_v55 = vld [vmem:[%s7355_s1 + $0x58] sm:$0xff]  }
  0x3b   : > { %v558_v0 = vsel %vm442_vm1, %v553_v51, %v557_v48  ;;  %v569_v9 = vor.u32 %v567_v1, %v565_v56  ;;  %v587_v28 = vshll.u32 %v6554_v5, 16  ;;  %v2391_v32 = vrot.slane %v6410_v42, 2  ;;  %v6120_v48 = vld [vmem:[%s6296_s14 + $0x60] sm:$0xff]   ;;  %v6608_v51 = vld [vmem:[%s6296_s14 + $0x70] sm:$0xff]   ;;  %v6649_v1 = vld [vmem:[%s6296_s14 + $0x88] sm:$0xff]  }
  0x3c   : > { %v581_v17 = vrot.slane %v579_v60, 1  ;;  %v2393_v40 = vrot.slane %v6424_v58, 2  ;;  %v2399_v58 = vrot.slane %v6120_v48, 2  ;;  %v2409_v60 = vrot.slane %v6649_v1, 2  ;;  %v6147_v48 = vld [vmem:[%s7355_s1 + $0xf0] sm:$0xff]  }
  0x3d   : > { %5374 = vmatmul.mubr.msk.bf16.gmra.mrb[16].mxu1 %vm615_vm0, %v526_v57  ;;  %v6537_v57 = vld [vmem:[%s7355_s1 + $0x40] sm:$0xff]  }
  0x3e   : > { %5377 = vmatprep.mubr.msk.bf16.mxu1 %vm615_vm0, %v534_v12  ;;  %5550 = vmatmul.mubr.msk.bf16.gmra.mrb[16].mxu0 %vm615_vm0, %v2001_v23  ;;  %v2388_v12 = vsel %vm2377_vm3, %v2385_v59, %v2387_v61  ;;  %v2389_v23 = vrot.slane %v6394_v29, 2  ;;  %v2394_v45 = vsel %vm2377_vm3, %v2391_v32, %v2393_v40 }
  0x3f   : > { %5577 = vmatprep.mubr.msk.bf16.mxu0 %vm615_vm0, %v2380_v27  ;;  %5437 = vmatprep.subr.bf16.mxu1 %v6537_v57  ;;  %v583_v27 = vshrl.u32 %v6531_v53, 16 }
  0x40   : > { %v2390_v29 = vsel %vm2377_vm3, %v2387_v61, %v2389_v23  ;;  %v2392_v39 = vsel %vm2377_vm3, %v2389_v23, %v2391_v32  ;;  %v6631_v61 = vld [vmem:[%s6296_s14 + $0x80] sm:$0xff]   ;;  %v6690_v32 = vld [vmem:[%s6296_s14 + $0x28] sm:$0xff]  }
  0x41   : > { %v585_v35 = vor.u32 %v583_v27, %v581_v17 }
  0x45   : > { %5378 = vmatmul.mubr.msk.bf16.gmra.mrb[20].mxu1 %vm615_vm0, %v542_v37  ;;  %v589_v37 = vrot.slane %v587_v28, 1  ;;  %v6686_v28 = vld [vmem:[%s6296_s14 + $0x20] sm:$0xff]  }
  0x46   : > { %5381 = vmatprep.mubr.msk.bf16.mxu1 %vm615_vm0, %v550_v41  ;;  %5578 = vmatmul.mubr.msk.bf16.vlgmr.msra.gmra.mrb[0].mxu0 %vm615_vm0, %v2382_v46  ;;  %v2395_v41 = vrot.slane %v6445_v21, 2  ;;  %v6128_v21 = vld [vmem:[%s7355_s1 + $0x48] sm:$0xff]  }
  0x47   : > { %5614 = vmatpush3.bf16.msra.mxu0 %v6109_v62  ;;  %5581 = vmatprep.mubr.msk.bf16.mxu0 %vm615_vm0, %v2384_v54  ;;  %v573_v62 = vrot.slane %v571_v63, 1  ;;  %v590_v42 = vsel %vm442_vm1, %v585_v35, %v589_v37  ;;  %v6601_v46 = vld [vmem:[%s6296_s14 + $0x68] sm:$0xff]   ;;  %v6636_v63 = vld [vmem:[%s7355_s1 + $0x60] sm:$0xff]   ;;  %v2849_v35 = vrot.slane %v6690_v32, 2 }
  0x48   : > { %5615 = vmatprep.subr.bf16.mxu0 %v6115_v50  ;;  %v2396_v25 = vsel %vm2377_vm3, %v2393_v40, %v2395_v41  ;;  %v2401_v54 = vrot.slane %v6601_v46, 2  ;;  %v6706_v40 = vld [vmem:[%s6296_s14 + $0x38] sm:$0xff]  }
  0x49   : > { %v577_v16 = vor.u32 %v575_v2, %v573_v62  ;;  %v574_v26 = vsel %vm442_vm1, %v569_v9, %v573_v62  ;;  %v2706_v62 = vld [vmem:[%s6296_s14 + $0x10] sm:$0xc]  ;;  %v6130_v9 = vld [vmem:[%s6296_s14 + $0x98] ss:$0 sps:$4 sm:$0x33]  }
  0x4a   : > { %v2402_v56 = vsel %vm2377_vm3, %v2399_v58, %v2401_v54 }
  0x4b   : > { %5616 = vmatpush3.bf16.msra.mxu0 %v6115_v50  ;;  %v582_v30 = vsel %vm442_vm1, %v577_v16, %v581_v17  ;;  %v2397_v50 = vrot.slane %v6458_v34, 2  ;;  %v6674_v17 = vld [vmem:[%s6296_s14 + $0x18] sm:$0xff]  }
  0x4c   : > { %5617 = vmatprep.subr.bf16.mxu0 %v6119_v8 }
  0x4d   : > { %5382 = vmatmul.mubr.msk.bf16.gmra.mrb[24].mxu1 %vm615_vm0, %v558_v0  ;;  %v2400_v34 = vsel %vm2377_vm3, %v2397_v50, %v2399_v58 }
  0x4e   : > { %5385 = vmatprep.mubr.msk.bf16.mxu1 %vm615_vm0, %v566_v14  ;;  %5582 = vmatmul.mubr.msk.bf16.gmra.mrb[4].mxu0 %vm615_vm0, %v2386_v7  ;;  %v6653_v14 = vld [vmem:[%s6296_s14 + $0x90] sm:$0xff]  }
  0x4f   : > { %5585 = vmatprep.mubr.msk.bf16.mxu0 %vm615_vm0, %v2388_v12  ;;  %5618 = vmatpush3.bf16.msra.mxu0 %v6119_v8  ;;  %v2411_v8 = vrot.slane %v6653_v14, 2  ;;  %v6661_v7 = vld [vmem:[%s6296_s14 + $0x14] sm:$0xf] }
  0x50   : > { %5619 = vmatprep.subr.bf16.mxu0 %v6125_v18  ;;  %v6671_v16 = vcombine.low %v2706_v62, %v6661_v7 }
  0x51   : > { %v2412_v12 = vsel %vm2377_vm3, %v2409_v60, %v2411_v8 }
  0x52   : > { %v2844_v23 = vrot.slane %v6671_v16, 2 }
  0x53   : > { %5620 = vmatpush3.bf16.msra.mxu0 %v6125_v18  ;;  %v2413_v18 = vrot.slane %v6130_v9, 2 }
  0x54   : > { %5657 = vmatprep.subr.bf16.mxu0 %v6574_v33 }
  0x55   : > { %5386 = vmatmul.mubr.msk.bf16.gmra.mrb[28].mxu1 %vm615_vm0, %v574_v26  ;;  %v2845_v26 = vrot.slane %v6674_v17, 2  ;;  %v2414_v27 = vsel %vm2377_vm3, %v2411_v8, %v2413_v18  ;;  %v6756_v8 = vld [vmem:[%s6296_s14 + $0x58] sm:$0xff]   ;;  %v6170_v18 = vld [vmem:[%s6296_s14 + $0x10] sm:$0xff]  }
  0x56   : > { %5389 = vmatprep.mubr.msk.bf16.mxu1 %vm615_vm0, %v582_v30  ;;  %5586 = vmatmul.mubr.msk.bf16.gmra.mrb[8].mxu0 %vm615_vm0, %v2390_v29  ;;  %v2847_v29 = vrot.slane %v6686_v28, 2  ;;  %v2861_v9 = vrot.slane %v6756_v8, 2 }
  0x57   : > { %5589 = vmatprep.mubr.msk.bf16.mxu0 %vm615_vm0, %v2392_v39  ;;  %v2846_v30 = vsel %vm2377_vm3, %v2844_v23, %v2845_v26  ;;  %v6702_v39 = vld [vmem:[%s6296_s14 + $0x30] sm:$0xff]   ;;  %v1100_v23 = vrot.slane %v6170_v18, 1  ;;  %v6825_v18 = vld [vmem:[%s6296_s14 + $0x80] sm:$0xff]  }
  0x58   : > { %v2848_v37 = vsel %vm2377_vm3, %v2845_v26, %v2847_v29  ;;  %v6770_v26 = vld [vmem:[%s6296_s14 + $0x60] sm:$0xff]  }
  0x5d   : > { %5390 = vmatmul.mubr.msk.bf16.gmra.mrb[32].mxu1 %vm615_vm0, %v590_v42  ;;  %v2850_v42 = vsel %vm2377_vm3, %v2847_v29, %v2849_v35 }
  0x5e   : > { %5401 = vmatprep.mubr.msk.bf16.mxu1 %vm615_vm0, %v6303_v10  ;;  %5590 = vmatmul.mubr.msk.bf16.gmra.mrb[12].mxu0 %vm615_vm0, %v2394_v45  ;;  %v2398_v10 = vsel %vm2377_vm3, %v2395_v41, %v2397_v50  ;;  %v6140_v41 = vld [vmem:[%s7355_s1 + $0xe8] sm:$0xff]   ;;  %v2851_v45 = vrot.slane %v6702_v39, 2 }
  0x5f   : > { %5593 = vmatprep.mubr.msk.bf16.mxu0 %vm615_vm0, %v2396_v25  ;;  %v2853_v25 = vrot.slane %v6706_v40, 2 }
  0x60   : > { %v2852_v50 = vsel %vm2377_vm3, %v2849_v35, %v2851_v45  ;;  %v6775_v35 = vld [vmem:[%s6296_s14 + $0x68] sm:$0xff]  }
  0x61   : > { %v2854_v58 = vsel %vm2377_vm3, %v2851_v45, %v2853_v25  ;;  %v2865_v45 = vrot.slane %v6775_v35, 2 }
  0x65   : > { %5402 = vmatmul.mubr.msk.bf16.vlgmr.msra.gmra.mrb[0].mxu1 %vm615_vm0, %v6306_v11  ;;  %v6135_v11 = vld [vmem:[%s7355_s1 + $0x50] sm:$0xff]  }
  0x66   : > { %5405 = vmatprep.mubr.msk.bf16.mxu1 %vm615_vm0, %v6325_v24  ;;  %5438 = vmatpush3.bf16.msra.mxu1 %v6537_v57  ;;  %v2403_v24 = vrot.slane %v6608_v51, 2  ;;  %v6627_v57 = vld [vmem:[%s6296_s14 + $0x78] sm:$0xff]  }
  0x67   : > { %5439 = vmatprep.subr.bf16.mxu1 %v6128_v21  ;;  %5594 = vmatmul.mubr.msk.bf16.gmra.mrb[16].mxu0 %vm615_vm0, %v2398_v10  ;;  %v6153_v10 = vld [vmem:[%s7355_s1 + $0xf8] sm:$0xff]  }
  0x68   : > { %5597 = vmatprep.mubr.msk.bf16.mxu0 %vm615_vm0, %v2400_v34  ;;  %v2404_v59 = vsel %vm2377_vm3, %v2401_v54, %v2403_v24  ;;  %v1084_v34 = vld [vmem:[%s6296_s14] sm:$0xe] }
  0x6a   : > { %5440 = vmatpush3.bf16.msra.mxu1 %v6128_v21  ;;  %v6729_v21 = vld [vmem:[%s6296_s14 + $0x48] sm:$0xff]  }
  0x6b   : > { %5441 = vmatprep.subr.bf16.mxu1 %v6135_v11  ;;  %v2857_v54 = vrot.slane %v6729_v21, 2 }
  0x6d   : > { %5406 = vmatmul.mubr.msk.bf16.gmra.mrb[4].mxu1 %vm615_vm0, %v6341_v44  ;;  %v2405_v44 = vrot.slane %v6627_v57, 2 }
  0x6e   : > { %5409 = vmatprep.mubr.msk.bf16.mxu1 %vm615_vm0, %v6352_v52  ;;  %5442 = vmatpush3.bf16.msra.mxu1 %v6135_v11  ;;  %v2407_v52 = vrot.slane %v6631_v61, 2 }
  0x6f   : > { %5443 = vmatprep.subr.bf16.mxu1 %v6141_v55  ;;  %5598 = vmatmul.mubr.msk.bf16.gmra.mrb[20].mxu0 %vm615_vm0, %v2402_v56  ;;  %v2406_v0 = vsel %vm2377_vm3, %v2403_v24, %v2405_v44  ;;  %v6168_v24 = vld [vmem:[%s6296_s14 + $0x4] sm:$0xf] }
  0x70   : > { %5601 = vmatprep.mubr.msk.bf16.mxu0 %vm615_vm0, %v2404_v59  ;;  %v2408_v2 = vsel %vm2377_vm3, %v2405_v44, %v2407_v52  ;;  %v6743_v56 = vld [vmem:[%s7355_s1 + $0x100] sm:$0xff]   ;;  %v6751_v44 = vld [vmem:[%s6296_s14 + $0x50] sm:$0xff]  }
  0x71   : > { %v2859_v62 = vrot.slane %v6751_v44, 2 }
  0x72   : > { %5444 = vmatpush3.bf16.msra.mxu1 %v6141_v55  ;;  %v4773_v55 = vcombine.low %v1084_v34, %v6168_v24  ;;  %v6160_v24 = vld [vmem:[%s7355_s1 + $0x70] sm:$0xff]  }
  0x73   : > { %5481 = vmatprep.subr.bf16.mxu1 %v6636_v63 }
  0x75   : > { %5410 = vmatmul.mubr.msk.bf16.gmra.mrb[8].mxu1 %vm615_vm0, %v6375_v6 }
  0x76   : > { %5413 = vmatprep.mubr.msk.bf16.mxu1 %vm615_vm0, %v6383_v15  ;;  %v2410_v15 = vsel %vm2377_vm3, %v2407_v52, %v2409_v60 }
  0x77   : > { %5602 = vmatmul.mubr.msk.bf16.gmra.mrb[24].mxu0 %vm615_vm0, %v2406_v0  ;;  %v1097_v0 = vrot.slane %v4773_v55, 1  ;;  %v6220_v55 = vmov 0  }
  0x78   : > { %5605 = vmatprep.mubr.msk.bf16.mxu0 %vm615_vm0, %v2408_v2  ;;  %v6169_v2 = vld [vmem:[%s6296_s14 + $0x8] sm:$0xff]   ;;  %6068 = vset.pattern.permute.xlu0 %v6220_v55 }
  0x79   : > { %v1098_v60 = vrot.slane %v6169_v2, 1  ;;  %6069 = vset.pattern.permute.xlu1 %v6220_v55 }
  0x7d   : > { %5414 = vmatmul.mubr.msk.bf16.gmra.mrb[12].mxu1 %vm615_vm0, %v6403_v38 }
  0x7e   : > { %5417 = vmatprep.mubr.msk.bf16.mxu1 %vm615_vm0, %v6413_v43 }
  0x7f   : > { %5606 = vmatmul.mubr.msk.bf16.gmra.mrb[28].mxu0 %vm615_vm0, %v2410_v15  ;;  %v1099_v15 = vsel %vm1096_vm4, %v1097_v0, %v1098_v60 }
  0x80   : > { %5609 = vmatprep.mubr.msk.bf16.mxu0 %vm615_vm0, %v2412_v12  ;;  %v2860_v12 = vsel %vm2377_vm3, %v2857_v54, %v2859_v62 }
  0x85   : > { %5418 = vmatmul.mubr.msk.bf16.gmra.mrb[16].mxu1 %vm615_vm0, %v6439_v13 }
  0x86   : > { %5421 = vmatprep.mubr.msk.bf16.mxu1 %vm615_vm0, %v6448_v22 }
  0x87   : > { %5610 = vmatmul.mubr.msk.bf16.gmra.mrb[32].mxu0 %vm615_vm0, %v2414_v27  ;;  %v2862_v27 = vsel %vm2377_vm3, %v2859_v62, %v2861_v9  ;;  %v3988_v62 = vld [vmem:[%s7356_s2 + $0x8] sm:$0xff] }
  0x88   : > { %5621 = vmatprep.mubr.msk.bf16.mxu0 %vm615_vm0, %v2846_v30  ;;  %v6171_v30 = vld [vmem:[%s6296_s14 + $0x18] sm:$0xff]  }
  0x89   : > { %v1102_v29 = vrot.slane %v6171_v30, 1  ;;  %v6830_v30 = vld [vmem:[%s6296_s14 + $0x88] sm:$0xff]  }
  0x8d   : > { %5422 = vmatmul.mubr.msk.bf16.gmra.mrb[20].mxu1 %vm615_vm0, %v6461_v36 }
  0x8e   : > { %5425 = vmatprep.mubr.msk.bf16.mxu1 %vm615_vm0, %v6467_v47 }
  0x8f   : > { %5622 = vmatmul.mubr.msk.bf16.vlgmr.msra.gmra.mrb[0].mxu0 %vm615_vm0, %v2848_v37  ;;  %v1101_v37 = vsel %vm1096_vm4, %v1098_v60, %v1100_v23  ;;  %v6162_v60 = vld [vmem:[%s7355_s1 + $0x78] sm:$0xff]  }
  0x90   : > { %5658 = vmatpush3.bf16.msra.mxu0 %v6574_v33  ;;  %5625 = vmatprep.mubr.msk.bf16.mxu0 %vm615_vm0, %v2850_v42  ;;  %v6725_v33 = vld [vmem:[%s6296_s14 + $0x40] sm:$0xff]   ;;  %v2863_v42 = vrot.slane %v6770_v26, 2 }
  0x91   : > { %5659 = vmatprep.subr.bf16.mxu0 %v6140_v41  ;;  %v2855_v11 = vrot.slane %v6725_v33, 2 }
  0x92   : > { %v2866_v34 = vsel %vm2377_vm3, %v2863_v42, %v2865_v45 }
  0x93   : > { %v2856_v59 = vsel %vm2377_vm3, %v2853_v25, %v2855_v11  ;;  %v2858_v52 = vsel %vm2377_vm3, %v2855_v11, %v2857_v54  ;;  %v6156_v25 = vld [vmem:[%s7355_s1 + $0x68] sm:$0xff]   ;;  %v1106_v11 = vrot.slane %v6375_v6, 1  ;;  %v6797_v54 = vld [vmem:[%s6296_s14 + $0x78] sm:$0xff]  }
  0x94   : > { %5660 = vmatpush3.bf16.msra.mxu0 %v6140_v41  ;;  %v1103_v41 = vsel %vm1096_vm4, %v1100_v23, %v1102_v29  ;;  %v2869_v2 = vrot.slane %v6797_v54, 2 }
  0x95   : > { %5426 = vmatmul.mubr.msk.bf16.gmra.mrb[24].mxu1 %vm615_vm0, %v6487_v3  ;;  %5661 = vmatprep.subr.bf16.mxu0 %v6147_v48 }
  0x96   : > { %5429 = vmatprep.mubr.msk.bf16.mxu1 %vm615_vm0, %v6499_v20 }
  0x97   : > { %5626 = vmatmul.mubr.msk.bf16.gmra.mrb[4].mxu0 %vm615_vm0, %v2852_v50  ;;  %v6172_v50 = vld [vmem:[%s6296_s14 + $0x20] sm:$0xff]  }
  0x98   : > { %5629 = vmatprep.mubr.msk.bf16.mxu0 %vm615_vm0, %v2854_v58  ;;  %5662 = vmatpush3.bf16.msra.mxu0 %v6147_v48  ;;  %v2864_v48 = vsel %vm2377_vm3, %v2861_v9, %v2863_v42  ;;  %v1104_v58 = vrot.slane %v6172_v50, 1  ;;  %v6173_v9 = vld [vmem:[%s6296_s14 + $0x30] sm:$0xff]  }
  0x99   : > { %5663 = vmatprep.subr.bf16.mxu0 %v6153_v10  ;;  %v3993_v50 = vld [vmem:[%s7356_s2 + $0x30] sm:$0xff] }
  0x9a   : > { %v1105_v6 = vsel %vm1096_vm4, %v1102_v29, %v1104_v58  ;;  %v1107_v0 = vsel %vm1096_vm4, %v1104_v58, %v1106_v11  ;;  %v3990_v29 = vld [vmem:[%s7356_s2 + $0x18] sm:$0xff] }
  0x9c   : > { %5664 = vmatpush3.bf16.msra.mxu0 %v6153_v10  ;;  %v6791_v10 = vld [vmem:[%s6296_s14 + $0x70] sm:$0xff]  }
  0x9d   : > { %5430 = vmatmul.mubr.msk.bf16.gmra.mrb[28].mxu1 %vm615_vm0, %v6506_v31  ;;  %5701 = vmatprep.subr.bf16.mxu0 %v6743_v56 }
  0x9e   : > { %5433 = vmatprep.mubr.msk.bf16.mxu1 %vm615_vm0, %v6523_v49 }
  0x9f   : > { %5630 = vmatmul.mubr.msk.bf16.gmra.mrb[8].mxu0 %vm615_vm0, %v2856_v59  ;;  %v3987_v59 = vld [vmem:[%s7356_s2] sm:$0xff] }
  0xa0   : > { %5633 = vmatprep.mubr.msk.bf16.mxu0 %vm615_vm0, %v2858_v52  ;;  %v3989_v52 = vld [vmem:[%s7356_s2 + $0x10] sm:$0xff]  ;;  %4025 = vperm.xlu0 %6068, %v3987_v59   ;;  %v6866_v59 = vld [vmem:[%s6296_s14 + $0x98] sm:$0xff]  }
  0xa1   : > { %4035 = vperm.xlu1 %6069, %v3989_v52  }
  0xa4   : > { %4030 = vperm.xlu0 %6068, %v3988_v62   ;;  %v3194_v62 = vshrl.u32 %v6674_v17, 16 }
  0xa5   : > { %5434 = vmatmul.mubr.msk.bf16.gmra.mrb[32].mxu1 %vm615_vm0, %v6531_v53  ;;  %4040 = vperm.xlu1 %6069, %v3990_v29   ;;  %v1118_v29 = vrot.slane %v6461_v36, 1  ;;  %v3999_v36 = vld [vmem:[%s7356_s2 + $0x60] sm:$0xff] }
  0xa6   : > { %5445 = vmatprep.mubr.msk.bf16.mxu1 %vm615_vm0, %v1099_v15 }
  0xa7   : > { %5634 = vmatmul.mubr.msk.bf16.gmra.mrb[12].mxu0 %vm615_vm0, %v2860_v12  ;;  %v1108_v12 = vrot.slane %v6173_v9, 1  ;;  %v3996_v9 = vld [vmem:[%s7356_s2 + $0x48] sm:$0xff] }
  0xa8   : > { %5637 = vmatprep.mubr.msk.bf16.mxu0 %vm615_vm0, %v2862_v27  ;;  %v1110_v27 = vrot.slane %v6403_v38, 1  ;;  %v2871_v38 = vrot.slane %v6825_v18, 2 }
  0xa9   : > { %v1109_v42 = vsel %vm1096_vm4, %v1106_v11, %v1108_v12  ;;  %v6861_v11 = vld [vmem:[%s6296_s14 + $0x90] sm:$0xff]  }
  0xaa   : > { %v2872_v58 = vsel %vm2377_vm3, %v2869_v2, %v2871_v38 }
  0xad   : > { %5446 = vmatmul.mubr.msk.bf16.vlgmr.msra.gmra.mrb[0].mxu1 %vm615_vm0, %v1101_v37  ;;  %v3991_v37 = vld [vmem:[%s7356_s2 + $0x20] sm:$0xff] }
  0xae   : > { %5449 = vmatprep.mubr.msk.bf16.mxu1 %vm615_vm0, %v1103_v41  ;;  %5482 = vmatpush3.bf16.msra.mxu1 %v6636_v63  ;;  %v2867_v63 = vrot.slane %v6791_v10, 2  ;;  %v1111_v41 = vsel %vm1096_vm4, %v1108_v12, %v1110_v27  ;;  %v1116_v12 = vrot.slane %v6448_v22, 1 }
  0xaf   : > { %5483 = vmatprep.subr.bf16.mxu1 %v6156_v25  ;;  %5638 = vmatmul.mubr.msk.bf16.gmra.mrb[16].mxu0 %vm615_vm0, %v2864_v48  ;;  %v3992_v48 = vld [vmem:[%s7356_s2 + $0x28] sm:$0xff] }
  0xb0   : > { %5641 = vmatprep.mubr.msk.bf16.mxu0 %vm615_vm0, %v2866_v34  ;;  %v2868_v15 = vsel %vm2377_vm3, %v2865_v45, %v2867_v63  ;;  %v2870_v23 = vsel %vm2377_vm3, %v2867_v63, %v2869_v2  ;;  %v2873_v45 = vrot.slane %v6830_v30, 2  ;;  %4045 = vperm.xlu0 %6068, %v3991_v37   ;;  %v1112_v34 = vrot.slane %v6413_v43, 1  ;;  %v3995_v43 = vld [vmem:[%s7356_s2 + $0x40] sm:$0xff] }
  0xb1   : > { %4050 = vperm.xlu1 %6069, %v3992_v48   ;;  %v2875_v63 = vrot.slane %v6861_v11, 2  ;;  %v2877_v2 = vrot.slane %v6866_v59, 2 }
  0xb2   : > { %5484 = vmatpush3.bf16.msra.mxu1 %v6156_v25  ;;  %v6847_v25 = vld [vmem:[%s7355_s1 + $0x80] sm:$0xff]   ;;  %v2874_v55 = vsel %vm2377_vm3, %v2871_v38, %v2873_v45 }
  0xb3   : > { %5485 = vmatprep.subr.bf16.mxu1 %v6160_v24 }
  0xb4   : > { %4055 = vperm.xlu0 %6068, %v3993_v50  }
  0xb5   : > { %5450 = vmatmul.mubr.msk.bf16.gmra.mrb[4].mxu1 %vm615_vm0, %v1105_v6  ;;  %v3994_v6 = vld [vmem:[%s7356_s2 + $0x38] sm:$0xff] }
  0xb6   : > { %5453 = vmatprep.mubr.msk.bf16.mxu1 %vm615_vm0, %v1107_v0  ;;  %5486 = vmatpush3.bf16.msra.mxu1 %v6160_v24  ;;  %v1114_v24 = vrot.slane %v6439_v13, 1  ;;  %v1113_v13 = vsel %vm1096_vm4, %v1110_v27, %v1112_v34  ;;  %v3186_v0 = vshrl.u32 %v6671_v16, 16  ;;  %v6158_v27 = vld [vmem:[%s6296_s14 + $0xa0] ss:$0 sps:$4 sm:$0x33]  }
  0xb7   : > { %5487 = vmatprep.subr.bf16.mxu1 %v6162_v60  ;;  %5642 = vmatmul.mubr.msk.bf16.gmra.mrb[20].mxu0 %vm615_vm0, %v2868_v15  ;;  %v3197_v15 = vshll.u32 %v6674_v17, 16  ;;  %v2879_v50 = vrot.slane %v6158_v27, 2 }
  0xb8   : > { %5645 = vmatprep.mubr.msk.bf16.mxu0 %vm615_vm0, %v2870_v23  ;;  %v1115_v52 = vsel %vm1096_vm4, %v1112_v34, %v1114_v24  ;;  %4060 = vperm.xlu1 %6069, %v3994_v6   ;;  %v3997_v23 = vld [vmem:[%s7356_s2 + $0x50] sm:$0xff]  ;;  %v3188_v37 = vrot.slane %v3186_v0, 2  ;;  %v1117_v22 = vsel %vm1096_vm4, %v1114_v24, %v1116_v12  ;;  %v3203_v34 = vshrl.u32 %v6686_v28, 16 }
  0xb9   : > { %4065 = vperm.xlu0 %6068, %v3995_v43   ;;  %v3199_v48 = vrot.slane %v3197_v15, 3  ;;  %v3212_v24 = vshrl.u32 %v6690_v32, 16  ;;  %v2880_v0 = vsel %vm2377_vm3, %v2877_v2, %v2879_v50  ;;  %v1124_v50 = vrot.slane %v6499_v20, 1  ;;  %v4006_v20 = vld [vmem:[%s7356_s2 + $0x98] sm:$0xff] }
  0xba   : > { %5488 = vmatpush3.bf16.msra.mxu1 %v6162_v60  ;;  %v3189_v60 = vshll.u32 %v6671_v16, 16  ;;  %v2876_v16 = vsel %vm2377_vm3, %v2873_v45, %v2875_v63  ;;  %v3998_v45 = vld [vmem:[%s7356_s2 + $0x58] sm:$0xff] }
  0xbb   : > { %5745 = vmatprep.subr.bf16.mxu1 %v6847_v25 }
  0xbc   : > { %v3191_v38 = vrot.slane %v3189_v60, 3  ;;  %4070 = vperm.xlu1 %6069, %v3996_v9   ;;  %v1120_v60 = vrot.slane %v6467_v47, 1  ;;  %v4003_v47 = vld [vmem:[%s7356_s2 + $0x80] sm:$0xff] }
  0xbd   : > { %5454 = vmatmul.mubr.msk.bf16.gmra.mrb[8].mxu1 %vm615_vm0, %v1109_v42  ;;  %v2878_v42 = vsel %vm2377_vm3, %v2875_v63, %v2877_v2  ;;  %4075 = vperm.xlu0 %6068, %v3997_v23   ;;  %v4000_v63 = vld [vmem:[%s7356_s2 + $0x68] sm:$0xff]  ;;  %v3214_v23 = vrot.slane %v3212_v24, 2  ;;  %v4002_v2 = vld [vmem:[%s7356_s2 + $0x78] sm:$0xff] }
  0xbe   : > { %5457 = vmatprep.mubr.msk.bf16.mxu1 %vm615_vm0, %v1111_v41  ;;  %v3196_v41 = vrot.slane %v3194_v62, 2  ;;  %v3192_v6 = vor.u32 %v3191_v38, %v3188_v37  ;;  %v3205_v62 = vrot.slane %v3203_v34, 2  ;;  %v1121_v27 = vsel %vm1096_vm4, %v1118_v29, %v1120_v60 }
  0xbf   : > { %5646 = vmatmul.mubr.msk.bf16.gmra.mrb[24].mxu0 %vm615_vm0, %v2872_v58  ;;  %v1119_v58 = vsel %vm1096_vm4, %v1116_v12, %v1118_v29  ;;  %v1122_v12 = vrot.slane %v6487_v3, 1  ;;  %v3221_v3 = vshrl.u32 %v6702_v39, 16  ;;  %v4005_v29 = vld [vmem:[%s7356_s2 + $0x90] sm:$0xff] }
  0xc0   : > { %5649 = vmatprep.mubr.msk.bf16.mxu0 %vm615_vm0, %v2874_v55  ;;  %v3206_v55 = vshll.u32 %v6686_v28, 16  ;;  %v3200_v43 = vor.u32 %v3199_v48, %v3196_v41  ;;  %4080 = vperm.xlu1 %6069, %v3998_v45   ;;  %v3230_v48 = vshrl.u32 %v6706_v40, 16  ;;  %v4004_v45 = vld [vmem:[%s7356_s2 + $0x88] sm:$0xff] }
  0xc1   : > { %4085 = vperm.xlu0 %6068, %v3999_v36   ;;  %v1123_v38 = vsel %vm1096_vm4, %v1120_v60, %v1122_v12  ;;  %v3242_v60 = vshll.u32 %v6725_v33, 16 }
  0xc2   : > { %v3208_v15 = vrot.slane %v3206_v55, 3  ;;  %v3201_v9 = vsel %vm3184_vm5, %v3192_v6, %v3200_v43  ;;  %v1126_v6 = vrot.slane %v6506_v31, 1  ;;  %v3232_v24 = vrot.slane %v3230_v48, 2 }
  0xc3   : > { %v1125_v31 = vsel %vm1096_vm4, %v1122_v12, %v1124_v50  ;;  %v4008_v12 = vld [vmem:[%s7356_s2 + $0xa8] sm:$0xff] }
  0xc4   : > { %4090 = vperm.xlu1 %6069, %v4000_v63   ;;  %v3209_v37 = vor.u32 %v3208_v15, %v3205_v62  ;;  %v6161_v63 = vld [vmem:[%s7355_s1 + $0x108] sm:$0xff]   ;;  %v1127_v62 = vsel %vm1096_vm4, %v1124_v50, %v1126_v6 }
  0xc5   : > { %5458 = vmatmul.mubr.msk.bf16.gmra.mrb[12].mxu1 %vm615_vm0, %v1113_v13  ;;  %v3215_v13 = vshll.u32 %v6690_v32, 16 }
  0xc6   : > { %5461 = vmatprep.mubr.msk.bf16.mxu1 %vm615_vm0, %v1115_v52  ;;  %v4001_v52 = vld [vmem:[%s7356_s2 + $0x70] sm:$0xff]  ;;  %v3210_v36 = vsel %vm3184_vm5, %v3200_v43, %v3209_v37  ;;  %v4007_v43 = vld [vmem:[%s7356_s2 + $0xa0] sm:$0xff] }
  0xc7   : > { %5650 = vmatmul.mubr.msk.bf16.gmra.mrb[28].mxu0 %vm615_vm0, %v2876_v16  ;;  %v3217_v16 = vrot.slane %v3215_v13, 3  ;;  %4095 = vperm.xlu0 %6068, %v4001_v52  }
  0xc8   : > { %5653 = vmatprep.mubr.msk.bf16.mxu0 %vm615_vm0, %v2878_v42  ;;  %v3224_v42 = vshll.u32 %v6702_v39, 16  ;;  %4100 = vperm.xlu1 %6069, %v4002_v2  }
  0xc9   : > { %v3218_v41 = vor.u32 %v3217_v16, %v3214_v23  ;;  %v3251_v23 = vshll.u32 %v6729_v21, 16  ;;  %v4009_v16 = vld [vmem:[%s7356_s2 + $0xb0] sm:$0xff] }
  0xca   : > { %v3226_v34 = vrot.slane %v3224_v42, 3  ;;  %v1130_v42 = vrot.slane %v6531_v53, 1 }
  0xcb   : > { %4105 = vperm.xlu0 %6068, %v4003_v47   ;;  %v3219_v55 = vsel %vm3184_vm5, %v3209_v37, %v3218_v41  ;;  %v1128_v47 = vrot.slane %v6523_v49, 1  ;;  %v3244_v37 = vrot.slane %v3242_v60, 3  ;;  %v3253_v48 = vrot.slane %v3251_v23, 3  ;;  %v4010_v49 = vld [vmem:[%s7356_s2 + $0xb8] sm:$0xff] }
  0xcc   : > { %4110 = vperm.xlu1 %6069, %v4004_v45  }
  0xcd   : > { %5462 = vmatmul.mubr.msk.bf16.gmra.mrb[16].mxu1 %vm615_vm0, %v1117_v22  ;;  %v3233_v22 = vshll.u32 %v6706_v40, 16  ;;  %v1129_v53 = vsel %vm1096_vm4, %v1126_v6, %v1128_v47  ;;  %v1131_v50 = vsel %vm1096_vm4, %v1128_v47, %v1130_v42  ;;  %v4012_v6 = vld [vmem:[%s7356_s2 + $0xc8] sm:$0xff]  ;;  %v3284_v47 = vshrl.u32 %v6775_v35, 16 }
  0xce   : > { %5465 = vmatprep.mubr.msk.bf16.mxu1 %vm615_vm0, %v1119_v58  ;;  %v3223_v58 = vrot.slane %v3221_v3, 2 }
  0xcf   : > { %5654 = vmatmul.mubr.msk.bf16.gmra.mrb[32].mxu0 %vm615_vm0, %v2880_v0  ;;  %v3235_v13 = vrot.slane %v3233_v22, 3  ;;  %4115 = vperm.xlu0 %6068, %v4005_v29   ;;  %v3239_v0 = vshrl.u32 %v6725_v33, 16  ;;  %v6164_v22 = vld [vmem:[%s7355_s1 + $0x118] sm:$0xff]   ;;  %v3257_v29 = vshrl.u32 %v6751_v44, 16 }
  0xd0   : > { %5665 = vmatprep.mubr.msk.bf16.mxu0 %vm615_vm0, %v3201_v9  ;;  %v3227_v52 = vor.u32 %v3226_v34, %v3223_v58  ;;  %v3248_v9 = vshrl.u32 %v6729_v21, 16  ;;  %4120 = vperm.xlu1 %6069, %v4006_v20   ;;  %v3266_v34 = vshrl.u32 %v6756_v8, 16 }
  0xd1   : > { %v3236_v15 = vor.u32 %v3235_v13, %v3232_v24  ;;  %v1132_v24 = vrot.slane %v6554_v5, 1  ;;  %v4013_v13 = vld [vmem:[%s7356_s2 + $0xd0] sm:$0xff]  ;;  %v3259_v20 = vrot.slane %v3257_v29, 2  ;;  %v4014_v5 = vld [vmem:[%s7356_s2 + $0xd8] sm:$0xff]  ;;  %v3286_v29 = vrot.slane %v3284_v47, 2 }
  0xd2   : > { %v3228_v2 = vsel %vm3184_vm5, %v3218_v41, %v3227_v52  ;;  %v4011_v41 = vld [vmem:[%s7356_s2 + $0xc0] sm:$0xff] }
  0xd3   : > { %4125 = vperm.xlu0 %6068, %v4007_v43   ;;  %v3237_v3 = vsel %vm3184_vm5, %v3227_v52, %v3236_v15 }
  0xd4   : > { %4130 = vperm.xlu1 %6069, %v4008_v12   ;;  %v3278_v12 = vshll.u32 %v6770_v26, 16 }
  0xd5   : > { %5466 = vmatmul.mubr.msk.bf16.gmra.mrb[20].mxu1 %vm615_vm0, %v1121_v27  ;;  %v3241_v27 = vrot.slane %v3239_v0, 2  ;;  %v6175_v0 = vld [vmem:[%s6296_s14 + $0x10] sm:$0xff]  }
  0xd6   : > { %5469 = vmatprep.mubr.msk.bf16.mxu1 %vm615_vm0, %v1123_v38  ;;  %v3250_v38 = vrot.slane %v3248_v9, 2  ;;  %v1564_v60 = vrot.slane %v6175_v0, 1 }
  0xd7   : > { %5666 = vmatmul.mubr.msk.bf16.vlgmr.msra.gmra.mrb[0].mxu0 %vm615_vm0, %v3210_v36  ;;  %4135 = vperm.xlu0 %6068, %v4009_v16   ;;  %v3245_v45 = vor.u32 %v3244_v37, %v3241_v27  ;;  %v3260_v36 = vshll.u32 %v6751_v44, 16  ;;  %v3287_v27 = vshll.u32 %v6775_v35, 16  ;;  %v4016_v37 = vld [vmem:[%s7356_s2 + $0xe8] sm:$0xff] }
  0xd8   : > { %5702 = vmatpush3.bf16.msra.mxu0 %v6743_v56  ;;  %5669 = vmatprep.mubr.msk.bf16.mxu0 %vm615_vm0, %v3219_v55  ;;  %v6163_v56 = vld [vmem:[%s7355_s1 + $0x110] sm:$0xff]   ;;  %v3254_v58 = vor.u32 %v3253_v48, %v3250_v38  ;;  %v3269_v55 = vshll.u32 %v6756_v8, 16  ;;  %v6176_v38 = vld [vmem:[%s6296_s14 + $0x18] sm:$0xff]  }
  0xd9   : > { %5703 = vmatprep.subr.bf16.mxu0 %v6161_v63  ;;  %4140 = vperm.xlu1 %6069, %v4010_v49   ;;  %v3262_v43 = vrot.slane %v3260_v36, 3  ;;  %v1566_v48 = vrot.slane %v6176_v38, 1  ;;  %v3280_v49 = vrot.slane %v3278_v12, 3  ;;  %v3289_v36 = vrot.slane %v3287_v27, 3 }
  0xda   : > { %v3255_v52 = vsel %vm3184_vm5, %v3245_v45, %v3254_v58  ;;  %v3271_v9 = vrot.slane %v3269_v55, 3  ;;  %v3311_v27 = vshrl.u32 %v6825_v18, 16  ;;  %v3320_v38 = vshrl.u32 %v6830_v30, 16 }
  0xdb   : > { %4145 = vperm.xlu0 %6068, %v4011_v41   ;;  %v3263_v23 = vor.u32 %v3262_v43, %v3259_v20  ;;  %v3302_v20 = vshrl.u32 %v6797_v54, 16  ;;  %v3305_v43 = vshll.u32 %v6797_v54, 16 }
  0xdc   : > { %5704 = vmatpush3.bf16.msra.mxu0 %v6161_v63  ;;  %v3246_v63 = vsel %vm3184_vm5, %v3236_v15, %v3245_v45  ;;  %v4015_v15 = vld [vmem:[%s7356_s2 + $0xe0] sm:$0xff] }
  0xdd   : > { %5470 = vmatmul.mubr.msk.bf16.gmra.mrb[24].mxu1 %vm615_vm0, %v1125_v31  ;;  %5705 = vmatprep.subr.bf16.mxu0 %v6163_v56  ;;  %v1563_v31 = vrot.slane %v6320_v19, 1  ;;  %v1133_v19 = vsel %vm1096_vm4, %v1130_v42, %v1132_v24  ;;  %v3264_v42 = vsel %vm3184_vm5, %v3254_v58, %v3263_v23  ;;  %v4019_v58 = vld [vmem:[%s7356_s2 + $0x100] sm:$0xff]  ;;  %v3296_v24 = vshll.u32 %v6791_v10, 16 }
  0xde   : > { %5473 = vmatprep.mubr.msk.bf16.mxu1 %vm615_vm0, %v1127_v62  ;;  %v3268_v62 = vrot.slane %v3266_v34, 2  ;;  %4150 = vperm.xlu1 %6069, %v4012_v6   ;;  %v1567_v34 = vsel %vm1096_vm4, %v1564_v60, %v1566_v48  ;;  %v3293_v6 = vshrl.u32 %v6791_v10, 16  ;;  %v3307_v12 = vrot.slane %v3305_v43, 3 }
  0xdf   : > { %5670 = vmatmul.mubr.msk.bf16.gmra.mrb[4].mxu0 %vm615_vm0, %v3228_v2  ;;  %4155 = vperm.xlu0 %6068, %v4013_v13   ;;  %v1565_v16 = vsel %vm1096_vm4, %v1563_v31, %v1564_v60  ;;  %v4020_v31 = vld [vmem:[%s7356_s2 + $0x108] sm:$0xff] }
  0xe0   : > { %5673 = vmatprep.mubr.msk.bf16.mxu0 %vm615_vm0, %v3237_v3  ;;  %5706 = vmatpush3.bf16.msra.mxu0 %v6163_v56  ;;  %v3275_v56 = vshrl.u32 %v6770_v26, 16  ;;  %v3272_v2 = vor.u32 %v3271_v9, %v3268_v62  ;;  %v4017_v3 = vld [vmem:[%s7356_s2 + $0xf0] sm:$0xff]  ;;  %v6178_v60 = vld [vmem:[%s6296_s14 + $0x28] sm:$0xff]   ;;  %v3295_v9 = vrot.slane %v3293_v6, 2  ;;  %v6184_v6 = vld [vmem:[%s7355_s1 + $0x98] sm:$0xff]  }
  0xe1   : > { %5707 = vmatprep.subr.bf16.mxu0 %v6164_v22  ;;  %v1570_v62 = vrot.slane %v6178_v60, 1 }
  0xe2   : > { %4160 = vperm.xlu1 %6069, %v4014_v5   ;;  %v3273_v41 = vsel %vm3184_vm5, %v3263_v23, %v3272_v2  ;;  %v3298_v5 = vrot.slane %v3296_v24, 3 }
  0xe3   : > { %4165 = vperm.xlu0 %6068, %v4015_v15  }
  0xe4   : > { %5708 = vmatpush3.bf16.msra.mxu0 %v6164_v22  ;;  %v3277_v22 = vrot.slane %v3275_v56, 2  ;;  %v3304_v56 = vrot.slane %v3302_v20, 2  ;;  %v3299_v47 = vor.u32 %v3298_v5, %v3295_v9  ;;  %v3332_v20 = vshll.u32 %v6861_v11, 16 }
  0xe5   : > { %5474 = vmatmul.mubr.msk.bf16.gmra.mrb[28].mxu1 %vm615_vm0, %v1129_v53  ;;  %v6177_v53 = vld [vmem:[%s6296_s14 + $0x20] sm:$0xff]  }
  0xe6   : > { %5477 = vmatprep.mubr.msk.bf16.mxu1 %vm615_vm0, %v1131_v50  ;;  %v1568_v45 = vrot.slane %v6177_v53, 1  ;;  %4170 = vperm.xlu1 %6069, %v4016_v37   ;;  %v4018_v50 = vld [vmem:[%s7356_s2 + $0xf8] sm:$0xff]  ;;  %v3281_v55 = vor.u32 %v3280_v49, %v3277_v22  ;;  %v3314_v37 = vshll.u32 %v6825_v18, 16  ;;  %v6181_v22 = vld [vmem:[%s7355_s1 + $0x90] sm:$0xff]  }
  0xe7   : > { %5674 = vmatmul.mubr.msk.bf16.gmra.mrb[8].mxu0 %vm615_vm0, %v3246_v63  ;;  %4175 = vperm.xlu0 %6068, %v4017_v3   ;;  %v3290_v63 = vor.u32 %v3289_v36, %v3286_v29 }
  0xe8   : > { %5677 = vmatprep.mubr.msk.bf16.mxu0 %vm615_vm0, %v3255_v52  ;;  %v1569_v13 = vsel %vm1096_vm4, %v1566_v48, %v1568_v45  ;;  %v4021_v52 = vld [vmem:[%s7356_s2 + $0x110] sm:$0xff]  ;;  %v3282_v0 = vsel %vm3184_vm5, %v3272_v2, %v3281_v55  ;;  %v4022_v2 = vld [vmem:[%s7356_s2 + $0x118] sm:$0xff]  ;;  %v3323_v48 = vshll.u32 %v6830_v30, 16  ;;  %v3316_v29 = vrot.slane %v3314_v37, 3 }
  0xe9   : > { %v3291_v15 = vsel %vm3184_vm5, %v3281_v55, %v3290_v63  ;;  %v3300_v49 = vsel %vm3184_vm5, %v3290_v63, %v3299_v47  ;;  %v3329_v63 = vshrl.u32 %v6861_v11, 16 }
  0xea   : > { %4180 = vperm.xlu1 %6069, %v4018_v50   ;;  %v6183_v50 = vld [vmem:[%s6296_s14 + $0x40] sm:$0xff]   ;;  %v3325_v55 = vrot.slane %v3323_v48, 3 }
  0xeb   : > { %4185 = vperm.xlu0 %6068, %v4019_v58   ;;  %v1576_v58 = vrot.slane %v6183_v50, 1  ;;  %v3331_v5 = vrot.slane %v3329_v63, 2 }
  0xed   : > { %5478 = vmatmul.mubr.msk.bf16.gmra.mrb[32].mxu1 %vm615_vm0, %v1133_v19  ;;  %v6179_v19 = vld [vmem:[%s6296_s14 + $0x30] sm:$0xff]  }
  0xee   : > { %5489 = vmatprep.mubr.msk.bf16.mxu1 %vm615_vm0, %v1565_v16  ;;  %v1572_v23 = vrot.slane %v6179_v19, 1  ;;  %v6180_v16 = vld [vmem:[%s7355_s1 + $0x88] sm:$0xff]   ;;  %4190 = vperm.xlu1 %6069, %v4020_v31   ;;  %v7104_v19 = vld [vmem:[%s6296_s14 + $0xa0] ss:$0 sps:$4 sm:$0x77]  }
  0xef   : > { %5678 = vmatmul.mubr.msk.bf16.gmra.mrb[12].mxu0 %vm615_vm0, %v3264_v42  ;;  %4195 = vperm.xlu0 %6068, %v4021_v52   ;;  %v3308_v42 = vor.u32 %v3307_v12, %v3304_v56  ;;  %v3338_v52 = vshrl.u32 %v6866_v59, 16  ;;  %v6186_v56 = vld [vmem:[%s6296_s14 + $0x50] sm:$0xff]   ;;  %v3350_v37 = vshll.u32 %v7104_v19, 16 }
  0xf0   : > { %5681 = vmatprep.mubr.msk.bf16.mxu0 %vm615_vm0, %v3273_v41  ;;  %v1573_v3 = vsel %vm1096_vm4, %v1570_v62, %v1572_v23  ;;  %v6182_v41 = vld [vmem:[%s6296_s14 + $0x38] sm:$0xff]   ;;  %v1580_v12 = vrot.slane %v6186_v56, 1 }
  0xf1   : > { %v1574_v53 = vrot.slane %v6182_v41, 1  ;;  %v3309_v36 = vsel %vm3184_vm5, %v3299_v47, %v3308_v42 }
  0xf2   : > { %4200 = vperm.xlu1 %6069, %v4022_v2  }
  0xf3   : > { %v1575_v24 = vsel %vm1096_vm4, %v1572_v23, %v1574_v53  ;;  %v1577_v43 = vsel %vm1096_vm4, %v1574_v53, %v1576_v58  ;;  %v3352_v53 = vrot.slane %v3350_v37, 3 }
  0xf5   : > { %5490 = vmatmul.mubr.msk.bf16.vlgmr.msra.gmra.mrb[0].mxu1 %vm615_vm0, %v1567_v34  ;;  %v3322_v34 = vrot.slane %v3320_v38, 2  ;;  %v3646_v38 = vld [vmem:[%s6296_s14 + $0x10] sm:$0x8] }
  0xf6   : > { %5493 = vmatprep.mubr.msk.bf16.mxu1 %vm615_vm0, %v1569_v13  ;;  %5749 = vmatpush3.bf16.msra.mxu1 %v6847_v25  ;;  %v1571_v25 = vsel %vm1096_vm4, %v1568_v45, %v1570_v62  ;;  %v3313_v45 = vrot.slane %v3311_v27, 2  ;;  %v6185_v62 = vld [vmem:[%s6296_s14 + $0x48] sm:$0xff]   ;;  %v3347_v27 = vshrl.u32 %v7104_v19, 16  ;;  %v4947_v50 = vcombine.low %v3646_v38, %v6661_v7  ;;  %v6190_v38 = vld [vmem:[%s6296_s14 + $0x70] sm:$0xff]  }
  0xf7   : > { %5746 = vmatprep.subr.bf16.mxu1 %v6180_v16  ;;  %5682 = vmatmul.mubr.msk.bf16.gmra.mrb[16].mxu0 %vm615_vm0, %v3282_v0  ;;  %v3326_v31 = vor.u32 %v3325_v55, %v3322_v34  ;;  %v3341_v0 = vshll.u32 %v6866_v59, 16  ;;  %v1578_v9 = vrot.slane %v6185_v62, 1  ;;  %v1586_v7 = vrot.slane %v6601_v46, 1 }
  0xf8   : > { %5685 = vmatprep.mubr.msk.bf16.mxu0 %vm615_vm0, %v3291_v15  ;;  %v3317_v13 = vor.u32 %v3316_v29, %v3313_v45  ;;  %v3334_v15 = vrot.slane %v3332_v20, 3  ;;  %v3349_v41 = vrot.slane %v3347_v27, 2  ;;  %v6188_v29 = vld [vmem:[%s6296_s14 + $0x60] sm:$0xff]   ;;  %v1588_v20 = vrot.slane %v6608_v51, 1  ;;  %v6189_v27 = vld [vmem:[%s6296_s14 + $0x68] sm:$0xff]  }
  0xf9   : > { %v3343_v2 = vrot.slane %v3341_v0, 3  ;;  %v1590_v51 = vrot.slane %v6627_v57, 1  ;;  %v2006_v56 = vshll.u32 %v6188_v29, 16  ;;  %v2012_v37 = vshrl.u32 %v6189_v27, 16 }
  0xfa   : > { %5750 = vmatpush3.bf16.msra.mxu1 %v6180_v16  ;;  %v3318_v60 = vsel %vm3184_vm5, %v3308_v42, %v3317_v13  ;;  %v3327_v23 = vsel %vm3184_vm5, %v3317_v13, %v3326_v31  ;;  %v3340_v16 = vrot.slane %v3338_v52, 2  ;;  %v3335_v47 = vor.u32 %v3334_v15, %v3331_v5 }
  0xfb   : > { %5747 = vmatprep.subr.bf16.mxu1 %v6181_v22  ;;  %v3353_v34 = vor.u32 %v3352_v53, %v3349_v41  ;;  %v3664_v52 = vrot.slane %v6690_v32, 3  ;;  %v3666_v32 = vrot.slane %v6702_v39, 3  ;;  %v1596_v15 = vrot.slane %v6653_v14, 1 }
  0xfc   : > { %v3344_v42 = vor.u32 %v3343_v2, %v3340_v16  ;;  %v3336_v48 = vsel %vm3184_vm5, %v3326_v31, %v3335_v47  ;;  %v1589_v31 = vsel %vm1096_vm4, %v1586_v7, %v1588_v20  ;;  %v2014_v41 = vrot.slane %v2012_v37, 1 }
  0xfd   : > { %5494 = vmatmul.mubr.msk.bf16.gmra.mrb[4].mxu1 %vm615_vm0, %v1571_v25  ;;  %v1579_v25 = vsel %vm1096_vm4, %v1576_v58, %v1578_v9  ;;  %v3667_v57 = vsel %vm3658_vm6, %v3664_v52, %v3666_v32  ;;  %v3686_v37 = vrot.slane %v6825_v18, 3 }
  0xfe   : > { %5497 = vmatprep.mubr.msk.bf16.mxu1 %vm615_vm0, %v1573_v3  ;;  %5751 = vmatpush3.bf16.msra.mxu1 %v6181_v22  ;;  %v1581_v3 = vsel %vm1096_vm4, %v1578_v9, %v1580_v12  ;;  %v6187_v22 = vld [vmem:[%s6296_s14 + $0x58] sm:$0xff]   ;;  %v3345_v45 = vsel %vm3184_vm5, %v3335_v47, %v3344_v42  ;;  %v3354_v13 = vsel %vm3184_vm5, %v3344_v42, %v3353_v34  ;;  %v3668_v9 = vrot.slane %v6706_v40, 3 }
  0xff   : > { %5748 = vmatprep.subr.bf16.mxu1 %v6184_v6  ;;  %5686 = vmatmul.mubr.msk.bf16.gmra.mrb[20].mxu0 %vm615_vm0, %v3300_v49  ;;  %v1582_v49 = vrot.slane %v6187_v22, 1  ;;  %v3670_v40 = vrot.slane %v6725_v33, 3  ;;  %v2024_v22 = vshll.u32 %v6190_v38, 16 }
 0x100   : > { %5689 = vmatprep.mubr.msk.bf16.mxu0 %vm615_vm0, %v3309_v36  ;;  %v1584_v36 = vrot.slane %v6188_v29, 1  ;;  %v3669_v5 = vsel %vm3658_vm6, %v3666_v32, %v3668_v9 }
 0x101   : > { %v1583_v58 = vsel %vm1096_vm4, %v1580_v12, %v1582_v49  ;;  %v6167_v12 = vld [vmem:[%s6296_s14 + $0x98] ss:$0 sps:$4 sm:$0x11]   ;;  %v3671_v14 = vsel %vm3658_vm6, %v3668_v9, %v3670_v40 }
 0x102   : > { %5752 = vmatpush3.bf16.msra.mxu1 %v6184_v6  ;;  %v1585_v55 = vsel %vm1096_vm4, %v1582_v49, %v1584_v36  ;;  %v3659_v6 = vrot.slane %v4947_v50, 3  ;;  %v1598_v47 = vrot.slane %v6167_v12, 1  ;;  %v3674_v49 = vrot.slane %v6751_v44, 3 }
 0x103   : > { %v2026_v50 = vrot.slane %v2024_v22, 2 }
 0x105   : > { %5498 = vmatmul.mubr.msk.bf16.gmra.mrb[8].mxu1 %vm615_vm0, %v1575_v24  ;;  %v3660_v24 = vrot.slane %v6674_v17, 3  ;;  %v3662_v17 = vrot.slane %v6686_v28, 3  ;;  %v1591_v28 = vsel %vm1096_vm4, %v1588_v20, %v1590_v51  ;;  %v3678_v20 = vrot.slane %v6770_v26, 3 }
 0x106   : > { %5501 = vmatprep.mubr.msk.bf16.mxu1 %vm615_vm0, %v1577_v43  ;;  %v1587_v43 = vsel %vm1096_vm4, %v1584_v36, %v1586_v7  ;;  %v6192_v7 = vld [vmem:[%s6296_s14 + $0x80] sm:$0xff]  }
 0x107   : > { %5690 = vmatmul.mubr.msk.bf16.gmra.mrb[24].mxu0 %vm615_vm0, %v3318_v60  ;;  %v3661_v63 = vsel %vm3658_vm6, %v3659_v6, %v3660_v24  ;;  %v3663_v46 = vsel %vm3658_vm6, %v3660_v24, %v3662_v17  ;;  %v3665_v0 = vsel %vm3658_vm6, %v3662_v17, %v3664_v52  ;;  %v1592_v60 = vrot.slane %v6631_v61, 1 }
 0x108   : > { %5693 = vmatprep.mubr.msk.bf16.mxu0 %vm615_vm0, %v3327_v23  ;;  %v1594_v61 = vrot.slane %v6649_v1, 1  ;;  %v2003_v23 = vshrl.u32 %v6188_v29, 16  ;;  %v3672_v1 = vrot.slane %v6729_v21, 3  ;;  %v1599_v21 = vsel %vm1096_vm4, %v1596_v15, %v1598_v47 }
 0x109   : > { %v1593_v62 = vsel %vm1096_vm4, %v1590_v51, %v1592_v60  ;;  %v3676_v29 = vrot.slane %v6756_v8, 3  ;;  %v3680_v52 = vrot.slane %v6775_v35, 3 }
 0x10a   : > { %v1595_v39 = vsel %vm1096_vm4, %v1592_v60, %v1594_v61  ;;  %v1597_v16 = vsel %vm1096_vm4, %v1594_v61, %v1596_v15  ;;  %v2005_v2 = vrot.slane %v2003_v23, 1  ;;  %v3673_v42 = vsel %vm3658_vm6, %v3670_v40, %v3672_v1 }
 0x10b   : > { %v3677_v24 = vsel %vm3658_vm6, %v3674_v49, %v3676_v29  ;;  %v3681_v26 = vsel %vm3658_vm6, %v3678_v20, %v3680_v52  ;;  %v3682_v15 = vrot.slane %v6791_v10, 3  ;;  %v3684_v40 = vrot.slane %v6797_v54, 3 }
 0x10d   : > { %5502 = vmatmul.mubr.msk.bf16.gmra.mrb[12].mxu1 %vm615_vm0, %v1579_v25  ;;  %v2008_v25 = vrot.slane %v2006_v56, 2  ;;  %v3685_v10 = vsel %vm3658_vm6, %v3682_v15, %v3684_v40 }
 0x10e   : > { %5505 = vmatprep.mubr.msk.bf16.mxu1 %vm615_vm0, %v1581_v3  ;;  %v2015_v3 = vshll.u32 %v6189_v27, 16 }
 0x10f   : > { %5694 = vmatmul.mubr.msk.bf16.gmra.mrb[28].mxu0 %vm615_vm0, %v3336_v48  ;;  %v2009_v33 = vor.u32 %v2008_v25, %v2005_v2  ;;  %v2021_v48 = vshrl.u32 %v6190_v38, 16  ;;  %v6195_v25 = vld [vmem:[%s6296_s14 + $0x98] ss:$0 sps:$4 sm:$0x33]   ;;  %v3688_v38 = vrot.slane %v6830_v30, 3 }
 0x110   : > { %5697 = vmatprep.mubr.msk.bf16.mxu0 %vm615_vm0, %v3345_v45  ;;  %v2017_v53 = vrot.slane %v2015_v3, 2  ;;  %v2069_v47 = vshll.u32 %v6195_v25, 16 }
 0x111   : > { %v2010_v45 = vsel %vm1903_vm2, %v6490_v4, %v2009_v33  ;;  %v2023_v36 = vrot.slane %v2021_v48, 1  ;;  %v2042_v4 = vshll.u32 %v6192_v7, 16  ;;  %v3687_v48 = vsel %vm3658_vm6, %v3684_v40, %v3686_v37 }
 0x112   : > { %v2018_v34 = vor.u32 %v2017_v53, %v2014_v41  ;;  %v3692_v41 = vrot.slane %v6866_v59, 3 }
 0x113   : > { %v2044_v51 = vrot.slane %v2042_v4, 2 }
 0x114   : > { %v2019_v8 = vsel %vm1903_vm2, %v2009_v33, %v2018_v34 }
 0x115   : > { %5506 = vmatmul.mubr.msk.bf16.gmra.mrb[16].mxu1 %vm615_vm0, %v1583_v58  ;;  %v3675_v58 = vsel %vm3658_vm6, %v3672_v1, %v3674_v49  ;;  %v3683_v1 = vsel %vm3658_vm6, %v3680_v52, %v3682_v15  ;;  %v3690_v49 = vrot.slane %v6861_v11, 3 }
 0x116   : > { %5509 = vmatprep.mubr.msk.bf16.mxu1 %vm615_vm0, %v1585_v55  ;;  %v6191_v55 = vld [vmem:[%s6296_s14 + $0x78] sm:$0xff]  }
 0x117   : > { %5698 = vmatmul.mubr.msk.bf16.gmra.mrb[32].mxu0 %vm615_vm0, %v3354_v13  ;;  %v2030_v6 = vshrl.u32 %v6191_v55, 16  ;;  %v2033_v44 = vshll.u32 %v6191_v55, 16  ;;  %v2027_v13 = vor.u32 %v2026_v50, %v2023_v36  ;;  %v3691_v30 = vsel %vm3658_vm6, %v3688_v38, %v3690_v49 }
 0x118   : > { %5709 = vmatprep.mubr.msk.bf16.mxu0 %vm615_vm0, %v3661_v63  ;;  %v2039_v63 = vshrl.u32 %v6192_v7, 16  ;;  %v3693_v53 = vsel %vm3658_vm6, %v3690_v49, %v3692_v41 }
 0x119   : > { %v2035_v17 = vrot.slane %v2033_v44, 2 }
 0x11d   : > { %5510 = vmatmul.mubr.msk.bf16.gmra.mrb[20].mxu1 %vm615_vm0, %v1587_v43  ;;  %v2032_v43 = vrot.slane %v2030_v6, 1 }
 0x11e   : > { %5513 = vmatprep.mubr.msk.bf16.mxu1 %vm615_vm0, %v1589_v31  ;;  %v2028_v31 = vsel %vm1903_vm2, %v2018_v34, %v2027_v13 }
 0x11f   : > { %5710 = vmatmul.mubr.msk.bf16.vlgmr.msra.gmra.mrb[0].mxu0 %vm615_vm0, %v3663_v46  ;;  %v2041_v46 = vrot.slane %v2039_v63, 1  ;;  %v2036_v60 = vor.u32 %v2035_v17, %v2032_v43  ;;  %v4026_v34 = vpop.permute.xlu0 %4025 }
 0x120   : > { %5713 = vmatprep.mubr.msk.bf16.mxu0 %vm615_vm0, %v3665_v0  ;;  %v3679_v0 = vsel %vm3658_vm6, %v3676_v29, %v3678_v20  ;;  %v4036_v6 = vpop.permute.xlu1 %4035 }
 0x121   : > { %v2045_v9 = vor.u32 %v2044_v51, %v2041_v46  ;;  %v2037_v35 = vsel %vm1903_vm2, %v2027_v13, %v2036_v60 }
 0x123   : > { %v4031_v13 = vpop.permute.xlu0 %4030 }
 0x124   : > { %v4041_v7 = vpop.permute.xlu1 %4040 }
 0x125   : > { %5514 = vmatmul.mubr.msk.bf16.gmra.mrb[24].mxu1 %vm615_vm0, %v1591_v28  ;;  %v6193_v28 = vld [vmem:[%s6296_s14 + $0x88] sm:$0xff]  }
 0x126   : > { %5517 = vmatprep.mubr.msk.bf16.mxu1 %vm615_vm0, %v1593_v62  ;;  %v2048_v32 = vshrl.u32 %v6193_v28, 16  ;;  %v2051_v62 = vshll.u32 %v6193_v28, 16 }
 0x127   : > { %5714 = vmatmul.mubr.msk.bf16.gmra.mrb[4].mxu0 %vm615_vm0, %v3667_v57  ;;  %v6194_v57 = vld [vmem:[%s6296_s14 + $0x90] sm:$0xff]   ;;  %s6042_s14 = smul.u32 144, %s7365_s18 }
 0x128   : > { %5717 = vmatprep.mubr.msk.bf16.mxu0 %vm615_vm0, %v3669_v5  ;;  %v2057_v61 = vshrl.u32 %v6194_v57, 16  ;;  %v2060_v5 = vshll.u32 %v6194_v57, 16  ;;  %v2050_v23 = vrot.slane %v2048_v32, 1  ;;  %v2053_v56 = vrot.slane %v2051_v62, 2 }
 0x129   : > { %s7269_s15 = scalar_lea.vmem %s7357_s3, %s6042_s14 }
 0x12a   : > { %v2059_v12 = vrot.slane %v2057_v61, 1  ;;  %v2054_v2 = vor.u32 %v2053_v56, %v2050_v23 }
 0x12c   : > { %v2055_v54 = vsel %vm1903_vm2, %v2045_v9, %v2054_v2 }
 0x12d   : > { %5518 = vmatmul.mubr.msk.bf16.gmra.mrb[28].mxu1 %vm615_vm0, %v1595_v39  ;;  %v2046_v39 = vsel %vm1903_vm2, %v2036_v60, %v2045_v9 }
 0x12e   : > { %5521 = vmatprep.mubr.msk.bf16.mxu1 %vm615_vm0, %v1597_v16  ;;  %v2062_v16 = vrot.slane %v2060_v5, 2 }
 0x12f   : > { %5718 = vmatmul.mubr.msk.bf16.gmra.mrb[8].mxu0 %vm615_vm0, %v3671_v14  ;;  %v2066_v14 = vshrl.u32 %v6195_v25, 16  ;;  %v4046_v20 = vpop.permute.xlu0 %4045 }
 0x130   : > { %5721 = vmatprep.mubr.msk.bf16.mxu0 %vm615_vm0, %v3673_v42  ;;  %v2063_v27 = vor.u32 %v2062_v16, %v2059_v12  ;;  %v2071_v42 = vrot.slane %v2069_v47, 2  ;;  %v4051_v43 = vpop.permute.xlu1 %4050 }
 0x131   : > { %v2068_v3 = vrot.slane %v2066_v14, 1 }
 0x132   : > { %v2064_v33 = vsel %vm1903_vm2, %v2054_v2, %v2063_v27 }
 0x133   : > { %v2072_v22 = vor.u32 %v2071_v42, %v2068_v3  ;;  %v4056_v46 = vpop.permute.xlu0 %4055 }
 0x135   : > { %5522 = vmatmul.mubr.msk.bf16.gmra.mrb[32].mxu1 %vm615_vm0, %v1599_v21  ;;  %v3689_v21 = vsel %vm3658_vm6, %v3686_v37, %v3688_v38  ;;  %v2073_v18 = vsel %vm1903_vm2, %v2063_v27, %v2072_v22 }
 0x136   : > { %5553 = vmatprep.mubr.msk.bf16.mxu1 %vm615_vm0, %v2010_v45  ;;  %v3694_v45 = vrot.slane %v7104_v19, 3 }
 0x137   : > { %5722 = vmatmul.mubr.msk.bf16.gmra.mrb[12].mxu0 %vm615_vm0, %v3675_v58 }
 0x138   : > { %5725 = vmatprep.mubr.msk.bf16.mxu0 %vm615_vm0, %v3677_v24  ;;  %v3695_v29 = vsel %vm3658_vm6, %v3692_v41, %v3694_v45  ;;  %v7247_v28 = vpop.permute.xlu0 %4065 }
 0x13c   : > { %v7257_v57 = vpop.permute.xlu0 %4075 }
 0x13d   : > { %5554 = vmatmul.mubr.msk.bf16.vlgmr.msra.gmra.mrb[20].mxu1 %vm615_vm0, %v2019_v8 }
 0x13e   : > { %5557 = vmatprep.mubr.msk.bf16.mxu1 %vm615_vm0, %v2028_v31 }
 0x13f   : > { %5726 = vmatmul.mubr.msk.bf16.gmra.mrb[16].mxu0 %vm615_vm0, %v3679_v0  ;;  %v4061_v0 = vpop.permute.xlu1 %4060 }
 0x140   : > { %5729 = vmatprep.mubr.msk.bf16.mxu0 %vm615_vm0, %v3681_v26 }
 0x143   : > { %v7251_v62 = vpop.permute.xlu1 %4070 }
 0x145   : > { %5558 = vmatmul.mubr.msk.bf16.gmra.mrb[24].mxu1 %vm615_vm0, %v2037_v35  ;;  %v7261_v35 = vpop.permute.xlu0 %4085 }
 0x146   : > { %5561 = vmatprep.mubr.msk.bf16.mxu1 %vm615_vm0, %v2046_v39 }
 0x147   : > { %5730 = vmatmul.mubr.msk.bf16.gmra.mrb[20].mxu0 %vm615_vm0, %v3683_v1  ;;  %v7259_v61 = vpop.permute.xlu1 %4080 }
 0x148   : > { %5733 = vmatprep.mubr.msk.bf16.mxu0 %vm615_vm0, %v3685_v10 }
 0x149   : > { %v7271_v10 = vpop.permute.xlu0 %4095 }
 0x14b   : > { %v7263_v56 = vpop.permute.xlu1 %4090 }
 0x14d   : > { %5562 = vmatmul.mubr.msk.bf16.gmra.mrb[28].mxu1 %vm615_vm0, %v2055_v54 }
 0x14e   : > { %5565 = vmatprep.mubr.msk.bf16.mxu1 %vm615_vm0, %v2064_v33 }
 0x14f   : > { %5734 = vmatmul.mubr.msk.bf16.gmra.mrb[24].mxu0 %vm615_vm0, %v3687_v48  ;;  %v7273_v54 = vpop.permute.xlu1 %4100 }
 0x150   : > { %5737 = vmatprep.mubr.msk.bf16.mxu0 %vm615_vm0, %v3689_v21 }
 0x155   : > { %5566 = vmatmul.mubr.msk.bf16.gmra.mrb[32].mxu1 %vm615_vm0, %v2073_v18 }
 0x157   : > { %5738 = vmatmul.mubr.msk.bf16.gmra.mrb[28].mxu0 %vm615_vm0, %v3691_v30 }
 0x158   : > { %5741 = vmatprep.mubr.msk.bf16.mxu0 %vm615_vm0, %v3693_v53 }
 0x15f   : > { %5742 = vmatmul.mubr.msk.bf16.gmra.mrb[32].mxu0 %vm615_vm0, %v3695_v29 }
 0x1c8   : > { %v5491_v36 = vpop.f32.mrb[0].mxu1 }
 0x1c9   : > { %v1712_v11 = vpop.f32.mrb[1].mxu1 }
 0x1ca   : > { %v5492_v50 = vpop.f32.mrb[2].mxu1 }
 0x1cb   : > { %v1715_v59 = vpop.f32.mrb[3].mxu1 }
 0x1d0   : > { %v5495_v58 = vpop.f32.mrb[4].mxu1 }
 0x1d1   : > { %v1728_v55 = vpop.f32.mrb[5].mxu1 }
 0x1d2   : > { %v5496_v44 = vpop.f32.mrb[6].mxu1 }
 0x1d3   : > { %v1731_v24 = vpop.f32.mrb[7].mxu1 }
 0x1d8   : > { %v7229_v63 = vpop.f32.mrb[8].mxu1 }
 0x1d9   : > { %v7231_v4 = vpop.f32.mrb[9].mxu1 }
 0x1da   : > { %v7233_v19 = vpop.f32.mrb[10].mxu1 }
 0x1db   : > { %v7235_v8 = vpop.f32.mrb[11].mxu1 }
 0x1e0   : > { %v7237_v17 = vpop.f32.mrb[12].mxu1 }
 0x1e1   : > { %v7239_v31 = vpop.f32.mrb[13].mxu1 }
 0x1e2   : > { %v7241_v52 = vpop.f32.mrb[14].mxu1 }
 0x1e3   : > { %v7243_v51 = vpop.f32.mrb[15].mxu1 }
 0x1e8   : > { %v7245_v60 = vpop.f32.mrb[16].mxu1 }
 0x1e9   : > { %v7249_v32 = vpop.f32.mrb[17].mxu1 }
 0x1ea   : > { %v7253_v26 = vpop.f32.mrb[18].mxu1 }
 0x1eb   : > { %v7255_v9 = vpop.f32.mrb[19].mxu1 }
 0x1f2   : > { %v5711_v5 = vpop.f32.mrb[0].mxu0 }
 0x1f3   : > { %v5753_v15 = vadd.f32 %v5711_v5, %v5491_v36  ;;  %v3808_v23 = vpop.f32.mrb[1].mxu0 }
 0x1f4   : > { %v5754_v39 = vadd.f32 %v3808_v23, %v1712_v11  ;;  %v5712_v40 = vpop.f32.mrb[2].mxu0 }
 0x1f5   : > { %v5755_v12 = vadd.f32 %v5712_v40, %v5492_v50  ;;  %v3811_v16 = vpop.f32.mrb[3].mxu0  ;;  %v4205_v25 = vmul.f32 %v5753_v15, %v4036_v6 }
 0x1f6   : > { %v4203_v1 = vmul.f32 %v5754_v39, %v4026_v34  ;;  %v5756_v2 = vadd.f32 %v3811_v16, %v1715_v59  ;;  %v7277_v34 = vpop.permute.xlu0 %4105 }
 0x1f7   : > { %v4206_v14 = vmul.f32 %v5755_v12, %v4041_v7  ;;  %v4463_v21 = vmul.f32 %v4205_v25, %v4205_v25 }
 0x1f8   : > { %v4204_v47 = vmul.f32 %v5756_v2, %v4031_v13  ;;  %v4461_v37 = vmul.f32 %v4203_v1, %v4203_v1 }
 0x1f9   : > { %v5052_v27 = vpack.c.bf16 %v4206_v14, %v4205_v25  ;;  %v4464_v53 = vmul.f32 %v4206_v14, %v4206_v14 }
 0x1fa   : > { %v5047_v3 = vpack.c.bf16 %v4204_v47, %v4203_v1  ;;  %v4419_v42 = vadd.f32 %v4204_v47, %v4203_v1  ;;  %v4462_v33 = vmul.f32 %v4204_v47, %v4204_v47  ;;  %v5715_v38 = vpop.f32.mrb[4].mxu0 }
 0x1fb   : > { %5134 = vst [vmem:[%s7269_s15 + $0x8] sm:$0xff] %v5052_v27   ;;  %v5757_v48 = vadd.f32 %v5715_v38, %v5495_v58  ;;  %v3824_v22 = vpop.f32.mrb[5].mxu0  ;;  %v7279_v58 = vpop.permute.xlu1 %4110 }
 0x1fc   : > { %5048 = vst [vmem:[%s7269_s15] sm:$0xff] %v5047_v3   ;;  %v4420_v18 = vadd.f32 %v4419_v42, %v4205_v25  ;;  %v4497_v49 = vadd.f32 %v4462_v33, %v4461_v37  ;;  %v5758_v41 = vadd.f32 %v3824_v22, %v1728_v55  ;;  %v5716_v30 = vpop.f32.mrb[6].mxu0 }
 0x1fd   : > { %v5759_v45 = vadd.f32 %v5716_v30, %v5496_v44  ;;  %v3827_v29 = vpop.f32.mrb[7].mxu0  ;;  %v4209_v6 = vmul.f32 %v5757_v48, %v4056_v46 }
 0x1fe   : > { %v4498_v36 = vadd.f32 %v4497_v49, %v4463_v21  ;;  %v4207_v11 = vmul.f32 %v5758_v41, %v4046_v20  ;;  %v4421_v50 = vadd.f32 %v4420_v18, %v4206_v14  ;;  %v5760_v59 = vadd.f32 %v3827_v29, %v1731_v24  ;;  %v7285_v14 = vpop.permute.xlu0 %4115 }
 0x1ff   : > { %v4210_v13 = vmul.f32 %v5759_v45, %v4061_v0  ;;  %v4467_v1 = vmul.f32 %v4209_v6, %v4209_v6  ;;  %v7288_v37 = vpop.permute.xlu1 %4120 }
 0x200   : > { %v4422_v7 = vadd.f32 %v4421_v50, %v4207_v11  ;;  %v4465_v5 = vmul.f32 %v4207_v11, %v4207_v11  ;;  %v4499_v15 = vadd.f32 %v4498_v36, %v4464_v53  ;;  %v4208_v55 = vmul.f32 %v5760_v59, %v4051_v43 }
 0x201   : > { %v5062_v23 = vpack.c.bf16 %v4210_v13, %v4209_v6  ;;  %v4468_v43 = vmul.f32 %v4210_v13, %v4210_v13 }
 0x202   : > { %v4500_v39 = vadd.f32 %v4499_v15, %v4465_v5  ;;  %v5057_v44 = vpack.c.bf16 %v4208_v55, %v4207_v11  ;;  %v4423_v40 = vadd.f32 %v4422_v7, %v4208_v55  ;;  %v4466_v12 = vmul.f32 %v4208_v55, %v4208_v55  ;;  %v5719_v20 = vpop.f32.mrb[8].mxu0  ;;  %v7295_v45 = vpop.permute.xlu0 %4125 }
 0x203   : > { %5136 = vst [vmem:[%s7269_s15 + $0x18] sm:$0xff] %v5062_v23   ;;  %v5761_v24 = vadd.f32 %v5719_v20, %v7229_v63  ;;  %v3840_v16 = vpop.f32.mrb[9].mxu0  ;;  %v7299_v29 = vpop.permute.xlu1 %4130 }
 0x204   : > { %5135 = vst [vmem:[%s7269_s15 + $0x10] sm:$0xff] %v5057_v44   ;;  %v4424_v46 = vadd.f32 %v4423_v40, %v4209_v6  ;;  %v4501_v0 = vadd.f32 %v4500_v39, %v4466_v12  ;;  %v5762_v2 = vadd.f32 %v3840_v16, %v7231_v4  ;;  %v5720_v25 = vpop.f32.mrb[10].mxu0 }
 0x205   : > { %v5763_v47 = vadd.f32 %v5720_v25, %v7233_v19  ;;  %v3843_v27 = vpop.f32.mrb[11].mxu0  ;;  %v4213_v38 = vmul.f32 %v5761_v24, %v7257_v57 }
 0x206   : > { %v4502_v3 = vadd.f32 %v4501_v0, %v4467_v1  ;;  %v4211_v42 = vmul.f32 %v5762_v2, %v7247_v28  ;;  %v4425_v63 = vadd.f32 %v4424_v46, %v4210_v13  ;;  %v5764_v33 = vadd.f32 %v3843_v27, %v7235_v8  ;;  %v4136_v24 = vpop.permute.xlu0 %4135 }
 0x207   : > { %v4214_v4 = vmul.f32 %v5763_v47, %v7259_v61  ;;  %v4471_v61 = vmul.f32 %v4213_v38, %v4213_v38  ;;  %v4141_v1 = vpop.permute.xlu1 %4140 }
 0x208   : > { %v4426_v48 = vadd.f32 %v4425_v63, %v4211_v42  ;;  %v4469_v22 = vmul.f32 %v4211_v42, %v4211_v42  ;;  %v4503_v21 = vadd.f32 %v4502_v3, %v4468_v43  ;;  %v4212_v19 = vmul.f32 %v5764_v33, %v7251_v62 }
 0x209   : > { %v5072_v18 = vpack.c.bf16 %v4214_v4, %v4213_v38  ;;  %v4472_v59 = vmul.f32 %v4214_v4, %v4214_v4 }
 0x20a   : > { %v4504_v49 = vadd.f32 %v4503_v21, %v4469_v22  ;;  %v5067_v41 = vpack.c.bf16 %v4212_v19, %v4211_v42  ;;  %v4427_v30 = vadd.f32 %v4426_v48, %v4212_v19  ;;  %v4470_v53 = vmul.f32 %v4212_v19, %v4212_v19  ;;  %v5723_v28 = vpop.f32.mrb[12].mxu0 }
 0x20b   : > { %5138 = vst [vmem:[%s7269_s15 + $0x28] sm:$0xff] %v5072_v18   ;;  %v5765_v8 = vadd.f32 %v5723_v28, %v7237_v17  ;;  %v3856_v57 = vpop.f32.mrb[13].mxu0 }
 0x20c   : > { %5137 = vst [vmem:[%s7269_s15 + $0x20] sm:$0xff] %v5067_v41   ;;  %v4428_v36 = vadd.f32 %v4427_v30, %v4213_v38  ;;  %v4505_v11 = vadd.f32 %v4504_v49, %v4470_v53  ;;  %v5766_v62 = vadd.f32 %v3856_v57, %v7239_v31  ;;  %v5724_v50 = vpop.f32.mrb[14].mxu0  ;;  %v7320_v49 = vpop.permute.xlu1 %4150 }
 0x20d   : > { %v5767_v6 = vadd.f32 %v5724_v50, %v7241_v52  ;;  %v3859_v13 = vpop.f32.mrb[15].mxu0  ;;  %v4217_v23 = vmul.f32 %v5765_v8, %v7271_v10 }
 0x20e   : > { %v4506_v7 = vadd.f32 %v4505_v11, %v4471_v61  ;;  %v4215_v5 = vmul.f32 %v5766_v62, %v7261_v35  ;;  %v4429_v15 = vadd.f32 %v4428_v36, %v4214_v4  ;;  %v5768_v17 = vadd.f32 %v3859_v13, %v7243_v51 }
 0x20f   : > { %v4218_v39 = vmul.f32 %v5767_v6, %v7273_v54  ;;  %v4475_v43 = vmul.f32 %v4217_v23, %v4217_v23 }
 0x210   : > { %v5555_v55 = vpop.f32.mrb[20].mxu1  ;;  %v4430_v40 = vadd.f32 %v4429_v15, %v4215_v5  ;;  %v4473_v31 = vmul.f32 %v4215_v5, %v4215_v5  ;;  %v4507_v12 = vadd.f32 %v4506_v7, %v4472_v59  ;;  %v4216_v52 = vmul.f32 %v5768_v17, %v7263_v56  ;;  %v4161_v17 = vpop.permute.xlu1 %4160 }
 0x211   : > { %v2266_v44 = vpop.f32.mrb[21].mxu1  ;;  %v5082_v16 = vpack.c.bf16 %v4218_v39, %v4217_v23  ;;  %v4476_v42 = vmul.f32 %v4218_v39, %v4218_v39 }
 0x212   : > { %v5556_v20 = vpop.f32.mrb[22].mxu1  ;;  %v4508_v46 = vadd.f32 %v4507_v12, %v4473_v31  ;;  %v5077_v51 = vpack.c.bf16 %v4216_v52, %v4215_v5  ;;  %v4431_v0 = vadd.f32 %v4430_v40, %v4216_v52  ;;  %v4474_v2 = vmul.f32 %v4216_v52, %v4216_v52  ;;  %v5727_v10 = vpop.f32.mrb[16].mxu0 }
 0x213   : > { %v2269_v35 = vpop.f32.mrb[23].mxu1  ;;  %5140 = vst [vmem:[%s7269_s15 + $0x38] sm:$0xff] %v5082_v16   ;;  %v5769_v54 = vadd.f32 %v5727_v10, %v7245_v60  ;;  %v3872_v25 = vpop.f32.mrb[17].mxu0 }
 0x214   : > { %5139 = vst [vmem:[%s7269_s15 + $0x30] sm:$0xff] %v5077_v51   ;;  %v4432_v47 = vadd.f32 %v4431_v0, %v4217_v23  ;;  %v4509_v27 = vadd.f32 %v4508_v46, %v4474_v2  ;;  %v5770_v56 = vadd.f32 %v3872_v25, %v7249_v32  ;;  %v5728_v3 = vpop.f32.mrb[18].mxu0  ;;  %v7316_v60 = vpop.permute.xlu0 %4145 }
 0x215   : > { %v5771_v63 = vadd.f32 %v5728_v3, %v7253_v26  ;;  %v3875_v33 = vpop.f32.mrb[19].mxu0  ;;  %v4221_v19 = vmul.f32 %v5769_v54, %v7285_v14 }
 0x216   : > { %v4510_v38 = vadd.f32 %v4509_v27, %v4475_v43  ;;  %v4219_v4 = vmul.f32 %v5770_v56, %v7277_v34  ;;  %v4433_v48 = vadd.f32 %v4432_v47, %v4218_v39  ;;  %v5772_v22 = vadd.f32 %v3875_v33, %v7255_v9 }
 0x217   : > { %v4222_v18 = vmul.f32 %v5771_v63, %v7288_v37  ;;  %v4479_v62 = vmul.f32 %v4221_v19, %v4221_v19 }
 0x218   : > { %v5559_v21 = vpop.f32.mrb[24].mxu1  ;;  %v4434_v41 = vadd.f32 %v4433_v48, %v4219_v4  ;;  %v4477_v26 = vmul.f32 %v4219_v4, %v4219_v4  ;;  %v4511_v30 = vadd.f32 %v4510_v38, %v4476_v42  ;;  %v4220_v34 = vmul.f32 %v5772_v22, %v7279_v58  ;;  %v4156_v7 = vpop.permute.xlu0 %4155 }
 0x219   : > { %v2282_v32 = vpop.f32.mrb[25].mxu1  ;;  %v5092_v28 = vpack.c.bf16 %v4222_v18, %v4221_v19  ;;  %v4480_v5 = vmul.f32 %v4222_v18, %v4222_v18 }
 0x21a   : > { %v5560_v53 = vpop.f32.mrb[26].mxu1  ;;  %v4512_v8 = vadd.f32 %v4511_v30, %v4477_v26  ;;  %v5087_v57 = vpack.c.bf16 %v4220_v34, %v4219_v4  ;;  %v4435_v61 = vadd.f32 %v4434_v41, %v4220_v34  ;;  %v4478_v36 = vmul.f32 %v4220_v34, %v4220_v34  ;;  %v5731_v14 = vpop.f32.mrb[20].mxu0 }
 0x21b   : > { %v2285_v9 = vpop.f32.mrb[27].mxu1  ;;  %5142 = vst [vmem:[%s7269_s15 + $0x48] sm:$0xff] %v5092_v28   ;;  %v5773_v11 = vadd.f32 %v5731_v14, %v5555_v55  ;;  %v3888_v37 = vpop.f32.mrb[21].mxu0 }
 0x21c   : > { %5141 = vst [vmem:[%s7269_s15 + $0x40] sm:$0xff] %v5087_v57   ;;  %v4436_v50 = vadd.f32 %v4435_v61, %v4221_v19  ;;  %v4513_v59 = vadd.f32 %v4512_v8, %v4478_v36  ;;  %v5774_v6 = vadd.f32 %v3888_v37, %v2266_v44  ;;  %v5732_v13 = vpop.f32.mrb[22].mxu0 }
 0x21d   : > { %v5775_v58 = vadd.f32 %v5732_v13, %v5556_v20  ;;  %v3891_v15 = vpop.f32.mrb[23].mxu0  ;;  %v4225_v52 = vmul.f32 %v5773_v11, %v4136_v24 }
 0x21e   : > { %v4514_v23 = vadd.f32 %v4513_v59, %v4479_v62  ;;  %v4223_v39 = vmul.f32 %v5774_v6, %v7295_v45  ;;  %v4437_v40 = vadd.f32 %v4436_v50, %v4222_v18  ;;  %v5776_v31 = vadd.f32 %v3891_v15, %v2269_v35  ;;  %v4166_v35 = vpop.permute.xlu0 %4165 }
 0x21f   : > { %v4226_v55 = vmul.f32 %v5775_v58, %v4141_v1  ;;  %v4171_v1 = vpop.permute.xlu1 %4170  ;;  %v4483_v56 = vmul.f32 %v4225_v52, %v4225_v52 }
 0x220   : > { %v5563_v12 = vpop.f32.mrb[28].mxu1  ;;  %v4438_v46 = vadd.f32 %v4437_v40, %v4223_v39  ;;  %v4481_v51 = vmul.f32 %v4223_v39, %v4223_v39  ;;  %v4515_v0 = vadd.f32 %v4514_v23, %v4480_v5  ;;  %v4224_v44 = vmul.f32 %v5776_v31, %v7299_v29 }
 0x221   : > { %v2298_v16 = vpop.f32.mrb[29].mxu1  ;;  %v5102_v20 = vpack.c.bf16 %v4226_v55, %v4225_v52  ;;  %v4484_v29 = vmul.f32 %v4226_v55, %v4226_v55 }
 0x222   : > { %v5564_v2 = vpop.f32.mrb[30].mxu1  ;;  %v4516_v54 = vadd.f32 %v4515_v0, %v4481_v51  ;;  %v5097_v25 = vpack.c.bf16 %v4224_v44, %v4223_v39  ;;  %v4439_v43 = vadd.f32 %v4438_v46, %v4224_v44  ;;  %v4482_v45 = vmul.f32 %v4224_v44, %v4224_v44  ;;  %v5735_v47 = vpop.f32.mrb[24].mxu0 }
 0x223   : > { %v2301_v10 = vpop.f32.mrb[31].mxu1  ;;  %5144 = vst [vmem:[%s7269_s15 + $0x58] sm:$0xff] %v5102_v20   ;;  %v5777_v24 = vadd.f32 %v5735_v47, %v5559_v21  ;;  %v3904_v27 = vpop.f32.mrb[25].mxu0 }
 0x224   : > { %5143 = vst [vmem:[%s7269_s15 + $0x50] sm:$0xff] %v5097_v25   ;;  %v4440_v3 = vadd.f32 %v4439_v43, %v4225_v52  ;;  %v4517_v42 = vadd.f32 %v4516_v54, %v4482_v45  ;;  %v5778_v63 = vadd.f32 %v3904_v27, %v2282_v32  ;;  %v5736_v33 = vpop.f32.mrb[26].mxu0  ;;  %v4176_v61 = vpop.permute.xlu0 %4175 }
 0x225   : > { %v5779_v38 = vadd.f32 %v5736_v33, %v5560_v53  ;;  %v3907_v4 = vpop.f32.mrb[27].mxu0  ;;  %v4229_v26 = vmul.f32 %v5777_v24, %v4156_v7  ;;  %v4181_v14 = vpop.permute.xlu1 %4180 }
 0x226   : > { %v4518_v48 = vadd.f32 %v4517_v42, %v4483_v56  ;;  %v4227_v22 = vmul.f32 %v5778_v63, %v7316_v60  ;;  %v4441_v19 = vadd.f32 %v4440_v3, %v4226_v55  ;;  %v5780_v18 = vadd.f32 %v3907_v4, %v2285_v9 }
 0x227   : > { %v4230_v30 = vmul.f32 %v5779_v38, %v4161_v17  ;;  %v4487_v6 = vmul.f32 %v4229_v26, %v4229_v26 }
 0x228   : > { %v5567_v41 = vpop.f32.mrb[32].mxu1  ;;  %v4442_v34 = vadd.f32 %v4441_v19, %v4227_v22  ;;  %v4485_v28 = vmul.f32 %v4227_v22, %v4227_v22  ;;  %v4519_v8 = vadd.f32 %v4518_v48, %v4484_v29  ;;  %v4228_v32 = vmul.f32 %v5780_v18, %v7320_v49  ;;  %v4186_v46 = vpop.permute.xlu0 %4185 }
 0x229   : > { %v2314_v21 = vpop.f32.mrb[33].mxu1  ;;  %v5112_v53 = vpack.c.bf16 %v4230_v30, %v4229_v26  ;;  %v4488_v49 = vmul.f32 %v4230_v30, %v4230_v30 }
 0x22a   : > { %v5568_v57 = vpop.f32.mrb[34].mxu1  ;;  %v4520_v11 = vadd.f32 %v4519_v8, %v4485_v28  ;;  %v5107_v60 = vpack.c.bf16 %v4228_v32, %v4227_v22  ;;  %v4443_v37 = vadd.f32 %v4442_v34, %v4228_v32  ;;  %v4486_v9 = vmul.f32 %v4228_v32, %v4228_v32  ;;  %v5739_v62 = vpop.f32.mrb[28].mxu0 }
 0x22b   : > { %v2317_v36 = vpop.f32.mrb[35].mxu1  ;;  %5146 = vst [vmem:[%s7269_s15 + $0x68] sm:$0xff] %v5112_v53   ;;  %v5781_v50 = vadd.f32 %v5739_v62, %v5563_v12  ;;  %v3920_v59 = vpop.f32.mrb[29].mxu0 }
 0x22c   : > { %5145 = vst [vmem:[%s7269_s15 + $0x60] sm:$0xff] %v5107_v60   ;;  %v4444_v13 = vadd.f32 %v4443_v37, %v4229_v26  ;;  %v4521_v7 = vadd.f32 %v4520_v11, %v4486_v9  ;;  %v5782_v5 = vadd.f32 %v3920_v59, %v2298_v16  ;;  %v5740_v58 = vpop.f32.mrb[30].mxu0  ;;  %v4191_v12 = vpop.permute.xlu1 %4190 }
 0x22d   : > { %v5783_v15 = vadd.f32 %v5740_v58, %v5564_v2  ;;  %v3923_v17 = vpop.f32.mrb[31].mxu0  ;;  %v4233_v52 = vmul.f32 %v5781_v50, %v4176_v61  ;;  %v4196_v29 = vpop.permute.xlu0 %4195 }
 0x22e   : > { %v4522_v23 = vadd.f32 %v4521_v7, %v4487_v6  ;;  %v4231_v39 = vmul.f32 %v5782_v5, %v4166_v35  ;;  %v4445_v40 = vadd.f32 %v4444_v13, %v4230_v30  ;;  %v5784_v31 = vadd.f32 %v3923_v17, %v2301_v10 }
 0x22f   : > { %v4234_v55 = vmul.f32 %v5783_v15, %v4181_v14  ;;  %v4491_v24 = vmul.f32 %v4233_v52, %v4233_v52 }
 0x230   : > { %v4446_v51 = vadd.f32 %v4445_v40, %v4231_v39  ;;  %v4489_v0 = vmul.f32 %v4231_v39, %v4231_v39  ;;  %v4523_v44 = vadd.f32 %v4522_v23, %v4488_v49  ;;  %v4232_v20 = vmul.f32 %v5784_v31, %v4171_v1  ;;  %v4201_v1 = vpop.permute.xlu1 %4200 }
 0x231   : > { %v5122_v54 = vpack.c.bf16 %v4234_v55, %v4233_v52  ;;  %v4492_v42 = vmul.f32 %v4234_v55, %v4234_v55 }
 0x232   : > { %v4524_v16 = vadd.f32 %v4523_v44, %v4489_v0  ;;  %v5117_v25 = vpack.c.bf16 %v4232_v20, %v4231_v39  ;;  %v4447_v43 = vadd.f32 %v4446_v51, %v4232_v20  ;;  %v4490_v2 = vmul.f32 %v4232_v20, %v4232_v20  ;;  %v5743_v45 = vpop.f32.mrb[32].mxu0 }
 0x233   : > { %5148 = vst [vmem:[%s7269_s15 + $0x78] sm:$0xff] %v5122_v54   ;;  %v5785_v47 = vadd.f32 %v5743_v45, %v5567_v41  ;;  %v3936_v35 = vpop.f32.mrb[33].mxu0 }
 0x234   : > { %5147 = vst [vmem:[%s7269_s15 + $0x70] sm:$0xff] %v5117_v25   ;;  %v4448_v10 = vadd.f32 %v4447_v43, %v4233_v52  ;;  %v4525_v27 = vadd.f32 %v4524_v16, %v4490_v2  ;;  %v5786_v56 = vadd.f32 %v3936_v35, %v2314_v21  ;;  %v5744_v3 = vpop.f32.mrb[34].mxu0 }
 0x235   : > { %v5787_v63 = vadd.f32 %v5744_v3, %v5568_v57  ;;  %v3939_v33 = vpop.f32.mrb[35].mxu0  ;;  %v4237_v19 = vmul.f32 %v5785_v47, %v4196_v29 }
 0x236   : > { %v4526_v38 = vadd.f32 %v4525_v27, %v4491_v24  ;;  %v4235_v4 = vmul.f32 %v5786_v56, %v4186_v46  ;;  %v4449_v48 = vadd.f32 %v4448_v10, %v4234_v55  ;;  %v5788_v22 = vadd.f32 %v3939_v33, %v2317_v36 }
 0x237   : > { %v4238_v18 = vmul.f32 %v5787_v63, %v4201_v1  ;;  %v4495_v61 = vmul.f32 %v4237_v19, %v4237_v19 }
 0x238   : > { %v4450_v41 = vadd.f32 %v4449_v48, %v4235_v4  ;;  %v4493_v26 = vmul.f32 %v4235_v4, %v4235_v4  ;;  %v4527_v30 = vadd.f32 %v4526_v38, %v4492_v42  ;;  %v4236_v34 = vmul.f32 %v5788_v22, %v4191_v12 }
 0x239   : > { %v5132_v28 = vpack.c.bf16 %v4238_v18, %v4237_v19  ;;  %v4496_v11 = vmul.f32 %v4238_v18, %v4238_v18 }
 0x23a   : > { %v4528_v21 = vadd.f32 %v4527_v30, %v4493_v26  ;;  %v5127_v8 = vpack.c.bf16 %v4236_v34, %v4235_v4  ;;  %v4451_v32 = vadd.f32 %v4450_v41, %v4236_v34  ;;  %v4494_v57 = vmul.f32 %v4236_v34, %v4236_v34 }
 0x23b   : > { %5150 = vst [vmem:[%s7269_s15 + $0x88] sm:$0xff] %v5132_v28  }
 0x23c   : > { %5149 = vst [vmem:[%s7269_s15 + $0x80] sm:$0xff] %v5127_v8   ;;  %v4452_v53 = vadd.f32 %v4451_v32, %v4237_v19  ;;  %v4529_v14 = vadd.f32 %v4528_v21, %v4494_v57 }
 0x23e   : > { %v4453_v36 = vadd.f32 %v4452_v53, %v4238_v18  ;;  %v4530_v60 = vadd.f32 %v4529_v14, %v4495_v61 }
 0x240   : > { %v4454_v37 = vrot.slane %v4453_v36, 4  ;;  %v4531_v9 = vadd.f32 %v4530_v60, %v4496_v11 }
 0x242   : > { %v4455_v62 = vadd.f32 %v4454_v37, %v4453_v36  ;;  %v4532_v50 = vrot.slane %v4531_v9, 4 }
 0x244   : > { %v4456_v59 = vrot.slane %v4455_v62, 2  ;;  %v4533_v6 = vadd.f32 %v4532_v50, %v4531_v9 }
 0x246   : > { %v4457_v13 = vadd.f32 %v4456_v59, %v4455_v62  ;;  %v4534_v7 = vrot.slane %v4533_v6, 2 }
 0x248   : > { %v4458_v5 = vrot.slane %v4457_v13, 1  ;;  %v4535_v58 = vadd.f32 %v4534_v7, %v4533_v6 }
 0x24a   : > { %v4459_v49 = vadd.f32 %v4458_v5, %v4457_v13  ;;  %v4536_v15 = vrot.slane %v4535_v58, 1 }
 0x24c   : > { %4460 = vst [vmem:[%s288_s22] sm:$0x1] %v4459_v49  ;;  %v4537_v17 = vadd.f32 %v4536_v15, %v4535_v58 }
 0x24e   : > { %4538 = vst [vmem:[%s294_s25] sm:$0x1] %v4537_v17 }
 0x24f PF: > { %s16_s20 = sadd.s32 1, %s6218_s20   ;;  %s7360_s18 = smov %s6214_s19 }
 0x250   : > { %p13_p5 = scmp.ge.s32.totalorder %s16_s20, 4   ;;  %s7361_s19 = smov %s7363_s21 }
 0x252   :  { %15 = sbr.rel (!%p13_p5) target bundleno = 2 (0x2), region = 89 }

</bundles_post_ra>
